<compile_context>
chip_gen: v6e
topology: v6e:2x2x1
jax: 0.10.0
libtpu: 0.0.40
codegen_flags: <defaults>
</compile_context>

<pallas_src>
import math

import jax
import jax.numpy as jnp
from jax.experimental import pallas as pl
from jax.experimental.pallas import tpu as pltpu


# --------------------------------------------------------------------------
# in-kernel math helpers
# --------------------------------------------------------------------------
def _erf(x):
    # Abramowitz & Stegun 7.1.26 (|err| < 1.5e-7). Reproduces PyTorch's exact
    # (erf-based) nn.GELU with ops that lower cleanly on Mosaic.
    p = 0.3275911
    a1, a2, a3, a4, a5 = 0.254829592, -0.284496736, 1.421413741, -1.453152027, 1.061405429
    sgn = jnp.where(x >= 0.0, 1.0, -1.0)
    ax = jnp.abs(x)
    t = 1.0 / (1.0 + p * ax)
    poly = ((((a5 * t + a4) * t + a3) * t + a2) * t + a1) * t
    return sgn * (1.0 - poly * jnp.exp(-ax * ax))   # exp() goes to the EUP slot


def _gelu_exact(x):
    return 0.5 * x * (1.0 + _erf(x * 0.7071067811865476))


# --------------------------------------------------------------------------
# fused MLP kernel: one (TM, Din) row-tile of tokens per grid step
# --------------------------------------------------------------------------
def _mlp_kernel(x_ref, w1_ref, b1_ref, w2_ref, b2_ref, o_ref):
    # fc1: (TM, Din)bf16 @ (Din, H)bf16 -> f32 accumulate, + bias (f32)
    x_bf = x_ref[...].astype(jnp.bfloat16)
    h = jnp.dot(x_bf, w1_ref[...], preferred_element_type=jnp.float32) + b1_ref[...]
    # GELU (exact, erf-based) in f32
    h = _gelu_exact(h)
    # fc2: (TM, H)bf16 @ (H, Dout)bf16 -> f32 accumulate, + bias (f32)
    y = jnp.dot(h.astype(jnp.bfloat16), w2_ref[...],
                preferred_element_type=jnp.float32) + b2_ref[...]
    o_ref[...] = y.astype(o_ref.dtype)


def _round_up(n, m):
    return ((n + m - 1) // m) * m


def pallas_mlp(x, w1, b1, w2, b2, *, tile_m=256):
    """x: (..., Din); w1: (Din, H); b1: (1, H); w2: (H, Dout); b2: (1, Dout)."""
    orig_shape = x.shape
    din = orig_shape[-1]
    hidden = w1.shape[1]
    dout = w2.shape[1]
    M = int(math.prod(orig_shape[:-1]))

    x2 = x.reshape(M, din).astype(jnp.float32)

    # Row-tile size: multiple of 8 (sublane), capped at tile_m; pad M to a multiple.
    tm = min(tile_m, _round_up(M, 8))
    Mp = _round_up(M, tm)
    if Mp != M:
        x2 = jnp.pad(x2, ((0, Mp - M), (0, 0)))
    grid_m = Mp // tm

    # Weights as bf16 (MXU inputs); biases stay f32.
    w1_bf = w1.astype(jnp.bfloat16)
    w2_bf = w2.astype(jnp.bfloat16)
    b1_f = b1.reshape(1, hidden).astype(jnp.float32)
    b2_f = b2.reshape(1, dout).astype(jnp.float32)

    cost = pl.CostEstimate(
        flops=2 * Mp * (din * hidden + hidden * dout),
        transcendentals=Mp * hidden,                       # one exp per GELU element
        bytes_accessed=(x2.size * 4 + Mp * dout * 4
                        + w1_bf.size * 2 + w2_bf.size * 2
                        + b1_f.size * 4 + b2_f.size * 4),
    )

    out = pl.pallas_call(
        _mlp_kernel,
        grid=(grid_m,),
        in_specs=[
            pl.BlockSpec((tm, din), lambda i: (i, 0)),        # token rows (tiled)
            pl.BlockSpec((din, hidden), lambda i: (0, 0)),    # w1 resident
            pl.BlockSpec((1, hidden), lambda i: (0, 0)),      # b1 resident
            pl.BlockSpec((hidden, dout), lambda i: (0, 0)),   # w2 resident
            pl.BlockSpec((1, dout), lambda i: (0, 0)),        # b2 resident
        ],
        out_specs=pl.BlockSpec((tm, dout), lambda i: (i, 0)),
        out_shape=jax.ShapeDtypeStruct((Mp, dout), jnp.float32),
        compiler_params=pltpu.CompilerParams(
            dimension_semantics=("parallel",),                # feeds 2 TCs on v7x
        ),
        cost_estimate=cost,
    )(x2, w1_bf, b1_f, w2_bf, b2_f)

    # TODO(synk): for very large hidden_features (w1/w2 no longer VMEM-resident)
    # add a second grid axis over the hidden dimension with an accumulator.
    if Mp != M:
        out = out[:M]
    return out.reshape(*orig_shape[:-1], dout)


# --------------------------------------------------------------------------
# plain-JAX reference (exact-GELU, f32) for the sanity check
# --------------------------------------------------------------------------
def reference_mlp(x, w1, b1, w2, b2):
    h = x @ w1 + b1.reshape(-1)
    h = jax.nn.gelu(h, approximate=False)
    return h @ w2 + b2.reshape(-1)


# --------------------------------------------------------------------------
if __name__ == "__main__":
    key = jax.random.PRNGKey(0)
    B, N = 2, 64                       # tokens
    in_features = 128
    hidden_features = 512              # mlp_ratio = 4 (transformer-block default)
    out_features = 128                 # out_features = in_features

    kx, k1, k2, k3, k4 = jax.random.split(key, 5)
    x = jax.random.normal(kx, (B, N, in_features), dtype=jnp.float32)

    # PyTorch nn.Linear default init: U(-1/sqrt(fan_in), 1/sqrt(fan_in))
    lim1 = 1.0 / math.sqrt(in_features)
    w1 = jax.random.uniform(k1, (in_features, hidden_features), jnp.float32, -lim1, lim1)
    b1 = jax.random.uniform(k2, (1, hidden_features), jnp.float32, -lim1, lim1)
    lim2 = 1.0 / math.sqrt(hidden_features)
    w2 = jax.random.uniform(k3, (hidden_features, out_features), jnp.float32, -lim2, lim2)
    b2 = jax.random.uniform(k4, (1, out_features), jnp.float32, -lim2, lim2)

    out = pallas_mlp(x, w1, b1, w2, b2)
    jax.block_until_ready(out)

    ref = reference_mlp(x, w1, b1, w2, b2)
    assert out.shape == (B, N, out_features), out.shape
    assert bool(jnp.all(jnp.isfinite(out)))
    # bf16 MXU inputs + f32 accumulation stay well inside this tolerance
    assert bool(jnp.allclose(out, ref, atol=2e-2, rtol=2e-2)), float(
        jnp.max(jnp.abs(out - ref)))

    print("KERNEL_OK")
</pallas_src>

<mosaic_0001>
module attributes {stable_mosaic.version = 11 : i64} {
  func.func @_mlp_kernel(%arg0: i32, %arg1: memref<128x128xf32, #tpu.memory_space<vmem>>, %arg2: memref<128x512xbf16, #tpu.memory_space<vmem>>, %arg3: memref<1x512xf32, #tpu.memory_space<vmem>>, %arg4: memref<512x128xbf16, #tpu.memory_space<vmem>>, %arg5: memref<1x128xf32, #tpu.memory_space<vmem>>, %arg6: memref<128x128xf32, #tpu.memory_space<vmem>>) attributes {dimension_semantics = [#tpu.dimension_semantics<parallel>], iteration_bounds = array<i64: 1>, scalar_prefetch = 0 : i64, scratch_operands = 0 : i64, tpu.core_type = #tpu.core_type<tc>, window_params = [{transform_indices = @transform_0, window_bounds = array<i64: 128, 128>}, {pipeline_mode = #tpu.pipeline_mode<synchronous>, transform_indices = @transform_1, window_bounds = array<i64: 128, 512>}, {pipeline_mode = #tpu.pipeline_mode<synchronous>, transform_indices = @transform_2, window_bounds = array<i64: 1, 512>}, {pipeline_mode = #tpu.pipeline_mode<synchronous>, transform_indices = @transform_3, window_bounds = array<i64: 512, 128>}, {pipeline_mode = #tpu.pipeline_mode<synchronous>, transform_indices = @transform_4, window_bounds = array<i64: 1, 128>}, {transform_indices = @transform_5, window_bounds = array<i64: 128, 128>}]} {
    %c0 = arith.constant 0 : index
    %c0_0 = arith.constant 0 : index
    %0 = vector.load %arg1[%c0, %c0_0] : memref<128x128xf32, #tpu.memory_space<vmem>>, vector<128x128xf32>
    %1 = arith.truncf %0 : vector<128x128xf32> to vector<128x128xbf16>
    %c0_1 = arith.constant 0 : index
    %c0_2 = arith.constant 0 : index
    %2 = vector.load %arg2[%c0_1, %c0_2] : memref<128x512xbf16, #tpu.memory_space<vmem>>, vector<128x512xbf16>
    %cst = arith.constant dense<0.000000e+00> : vector<128x512xf32>
    %3 = tpu.matmul %1, %2, %cst {dimension_numbers = #tpu.dot_dimension_numbers<[1], [0], [0], [1], [0, 0, 1, 1], [], []>} : vector<128x128xbf16>, vector<128x512xbf16>, vector<128x512xf32> -> vector<128x512xf32>
    %c0_3 = arith.constant 0 : index
    %c0_4 = arith.constant 0 : index
    %4 = vector.load %arg3[%c0_3, %c0_4] : memref<1x512xf32, #tpu.memory_space<vmem>>, vector<1x512xf32>
    %5 = vector.broadcast %4 : vector<1x512xf32> to vector<128x512xf32>
    %6 = arith.addf %3, %5 : vector<128x512xf32>
    %cst_5 = arith.constant 5.000000e-01 : f32
    %7 = vector.broadcast %cst_5 : f32 to vector<128x512xf32>
    %8 = arith.mulf %7, %6 : vector<128x512xf32>
    %cst_6 = arith.constant 0.707106769 : f32
    %9 = vector.broadcast %cst_6 : f32 to vector<128x512xf32>
    %10 = arith.mulf %6, %9 : vector<128x512xf32>
    %cst_7 = arith.constant 0.000000e+00 : f32
    %11 = vector.broadcast %cst_7 : f32 to vector<128x512xf32>
    %12 = arith.cmpf oge, %10, %11 : vector<128x512xf32>
    %cst_8 = arith.constant 1.000000e+00 : f32
    %cst_9 = arith.constant -1.000000e+00 : f32
    %13 = vector.broadcast %cst_8 : f32 to vector<128x512xf32>
    %14 = vector.broadcast %cst_9 : f32 to vector<128x512xf32>
    %15 = arith.select %12, %13, %14 : vector<128x512xi1>, vector<128x512xf32>
    %16 = math.absf %10 : vector<128x512xf32>
    %cst_10 = arith.constant 0.327591091 : f32
    %17 = vector.broadcast %cst_10 : f32 to vector<128x512xf32>
    %18 = arith.mulf %17, %16 : vector<128x512xf32>
    %cst_11 = arith.constant 1.000000e+00 : f32
    %19 = vector.broadcast %cst_11 : f32 to vector<128x512xf32>
    %20 = arith.addf %19, %18 : vector<128x512xf32>
    %cst_12 = arith.constant 1.000000e+00 : f32
    %21 = vector.broadcast %cst_12 : f32 to vector<128x512xf32>
    %22 = arith.divf %21, %20 : vector<128x512xf32>
    %cst_13 = arith.constant 1.06140542 : f32
    %23 = vector.broadcast %cst_13 : f32 to vector<128x512xf32>
    %24 = arith.mulf %23, %22 : vector<128x512xf32>
    %cst_14 = arith.constant -1.45315206 : f32
    %25 = vector.broadcast %cst_14 : f32 to vector<128x512xf32>
    %26 = arith.addf %24, %25 : vector<128x512xf32>
    %27 = arith.mulf %26, %22 : vector<128x512xf32>
    %cst_15 = arith.constant 1.42141378 : f32
    %28 = vector.broadcast %cst_15 : f32 to vector<128x512xf32>
    %29 = arith.addf %27, %28 : vector<128x512xf32>
    %30 = arith.mulf %29, %22 : vector<128x512xf32>
    %cst_16 = arith.constant -0.284496725 : f32
    %31 = vector.broadcast %cst_16 : f32 to vector<128x512xf32>
    %32 = arith.addf %30, %31 : vector<128x512xf32>
    %33 = arith.mulf %32, %22 : vector<128x512xf32>
    %cst_17 = arith.constant 0.254829586 : f32
    %34 = vector.broadcast %cst_17 : f32 to vector<128x512xf32>
    %35 = arith.addf %33, %34 : vector<128x512xf32>
    %36 = arith.mulf %35, %22 : vector<128x512xf32>
    %cst_18 = arith.constant 0.000000e+00 : f32
    %37 = vector.broadcast %cst_18 : f32 to vector<128x512xf32>
    %38 = arith.subf %37, %16 : vector<128x512xf32>
    %39 = arith.mulf %38, %16 : vector<128x512xf32>
    %40 = math.exp %39 : vector<128x512xf32>
    %41 = arith.mulf %36, %40 : vector<128x512xf32>
    %cst_19 = arith.constant 1.000000e+00 : f32
    %42 = vector.broadcast %cst_19 : f32 to vector<128x512xf32>
    %43 = arith.subf %42, %41 : vector<128x512xf32>
    %44 = arith.mulf %15, %43 : vector<128x512xf32>
    %cst_20 = arith.constant 1.000000e+00 : f32
    %45 = vector.broadcast %cst_20 : f32 to vector<128x512xf32>
    %46 = arith.addf %45, %44 : vector<128x512xf32>
    %47 = arith.mulf %8, %46 : vector<128x512xf32>
    %48 = arith.truncf %47 : vector<128x512xf32> to vector<128x512xbf16>
    %c0_21 = arith.constant 0 : index
    %c0_22 = arith.constant 0 : index
    %49 = vector.load %arg4[%c0_21, %c0_22] : memref<512x128xbf16, #tpu.memory_space<vmem>>, vector<512x128xbf16>
    %cst_23 = arith.constant dense<0.000000e+00> : vector<128x128xf32>
    %50 = tpu.matmul %48, %49, %cst_23 {dimension_numbers = #tpu.dot_dimension_numbers<[1], [0], [0], [1], [0, 0, 1, 1], [], []>} : vector<128x512xbf16>, vector<512x128xbf16>, vector<128x128xf32> -> vector<128x128xf32>
    %c0_24 = arith.constant 0 : index
    %c0_25 = arith.constant 0 : index
    %51 = vector.load %arg5[%c0_24, %c0_25] : memref<1x128xf32, #tpu.memory_space<vmem>>, vector<1x128xf32>
    %52 = vector.broadcast %51 : vector<1x128xf32> to vector<128x128xf32>
    %53 = arith.addf %50, %52 : vector<128x128xf32>
    %c0_26 = arith.constant 0 : index
    %c0_27 = arith.constant 0 : index
    %54 = vector.load %arg6[%c0_26, %c0_27] : memref<128x128xf32, #tpu.memory_space<vmem>>, vector<128x128xf32>
    tpu.vector_store %arg6[%c0_26, %c0_27], %53 {strides = array<i32>} : memref<128x128xf32, #tpu.memory_space<vmem>>, vector<128x128xf32>,
    return
  }
  func.func @transform_0(%arg0: i32) -> (i32, i32) {
    %c0_i32 = arith.constant 0 : i32
    %c0_i32_0 = arith.constant 0 : i32
    return %arg0, %c0_i32 : i32, i32
  }
  func.func @transform_1(%arg0: i32) -> (i32, i32) {
    %c0_i32 = arith.constant 0 : i32
    %c0_i32_0 = arith.constant 0 : i32
    %c0_i32_1 = arith.constant 0 : i32
    return %c0_i32, %c0_i32_0 : i32, i32
  }
  func.func @transform_2(%arg0: i32) -> (i32, i32) {
    %c0_i32 = arith.constant 0 : i32
    %c0_i32_0 = arith.constant 0 : i32
    %c0_i32_1 = arith.constant 0 : i32
    return %c0_i32, %c0_i32_0 : i32, i32
  }
  func.func @transform_3(%arg0: i32) -> (i32, i32) {
    %c0_i32 = arith.constant 0 : i32
    %c0_i32_0 = arith.constant 0 : i32
    %c0_i32_1 = arith.constant 0 : i32
    return %c0_i32, %c0_i32_0 : i32, i32
  }
  func.func @transform_4(%arg0: i32) -> (i32, i32) {
    %c0_i32 = arith.constant 0 : i32
    %c0_i32_0 = arith.constant 0 : i32
    %c0_i32_1 = arith.constant 0 : i32
    return %c0_i32, %c0_i32_0 : i32, i32
  }
  func.func @transform_5(%arg0: i32) -> (i32, i32) {
    %c0_i32 = arith.constant 0 : i32
    %c0_i32_0 = arith.constant 0 : i32
    return %arg0, %c0_i32 : i32, i32
  }
}

</mosaic_0001>

<bundles_post_ra>
// kernel: tpu_custom_call.1
= control target key start
LH: loop header
LB: loop body
LE: loop exit
PB: predicated region body
PF: predicated region fallthrough
CT: control target
= control target key end

     0   :  { %10 = vsyncpa [#allocation3], 0  ;;  %s5572_s0 = inlined_call_operand.hbm [shape: f32[128,128], index: 0, kind: input, shape index: {}]   ;;  %s5573_s1 = inlined_call_operand.hbm [shape: bf16[128,512], index: 1, kind: input, shape index: {}]   ;;  %s5574_s2 = inlined_call_operand.hbm [shape: f32[1,512], index: 2, kind: input, shape index: {}]   ;;  %s5575_s3 = inlined_call_operand.hbm [shape: bf16[512,128], index: 3, kind: input, shape index: {}]   ;;  %s5576_s4 = inlined_call_operand.vmem [shape: f32[1,128], index: 4, kind: input, shape index: {}]   ;;  %s5577_s5 = inlined_call_operand.hbm [shape: f32[128,128], index: 5, kind: output, shape index: {}]  }
   0x1   :  { %11 = vsyncpa [#allocation6], 0 }
   0x2   :  { %12 = vsyncpa [#allocation9], 0 }
   0x3   :  { %13 = vsyncpa [#allocation4], 0  ;;  %s3441_s18 = smov [#allocation5]  }
   0x4   :  { %s31_s19 = sshll.u32 %s3441_s18, 4  ;;  %s32_s19 = int_to_ptr.vmem [resolvable:$true] %s31_s19 }
   0x5   :  { %s3341_s20 = scalar_lea.vmem %s32_s19, 4096  ;;  %p3346_p1 = scmp.lt.s32.totalorder %s32_s19, %s32_s19 }
   0x6   :  { %p3342_p0 = scmp.ne.s32.totalorder %s32_s19, %s3341_s20  ;;  %p3347_p2 = scmp.lt.s32.totalorder %s3341_s20, %s3341_s20 }
   0x8   :  { %p3348_p3 = por %p3347_p2, %p3346_p1 }
   0xa   :  { %p3349_p4 = pnand %p3348_p3, %p3342_p0 }
   0xc   :  { %3352 = shalt.err (!%p3349_p4)
}
   0xd   :  { %s3442_s21 = smov 256   ;;  %s3443_s22 = smov 16  }
   0xe   :  { %37 = dma.hbm_to_vmem [thread:$0]  %s5573_s1, 4096, %s32_s19, [#allocation6], %s3442_s21, %s3442_s21, %s3443_s22  }
   0xf   :  { %s3444_s25 = smov [#allocation2]  }
  0x10   :  { %s19_s26 = sshll.u32 %s3444_s25, 4  ;;  %s20_s26 = int_to_ptr.vmem [resolvable:$true] %s19_s26 }
  0x11   :  { %s3361_s27 = scalar_lea.vmem %s20_s26, 2048  ;;  %p3366_p6 = scmp.lt.s32.totalorder %s20_s26, %s20_s26 }
  0x12   :  { %p3362_p5 = scmp.ne.s32.totalorder %s20_s26, %s3361_s27  ;;  %p3367_p7 = scmp.lt.s32.totalorder %s3361_s27, %s3361_s27 }
  0x14   :  { %p3368_p8 = por %p3367_p7, %p3366_p6 }
  0x16   :  { %p3369_p9 = pnand %p3368_p8, %p3362_p5 }
  0x18   :  { %3372 = shalt.err (!%p3369_p9)
}
  0x19   :  { %s3445_s28 = smov 128   ;;  %s3446_s29 = smov 8  }
  0x1a   :  { %25 = dma.hbm_to_vmem [thread:$0]  %s5572_s0, 2048, %s20_s26, [#allocation3], %s3445_s28, %s3445_s28, %s3446_s29  }
  0x1b   :  { %s3447_s1 = smov [#allocation7]   ;;  %s3448_s8 = smov [#allocation8]  }
  0x1c   :  { %s44_s7 = sshll.u32 %s3447_s1, 4  ;;  %s53_s9 = sshll.u32 %s3448_s8, 4  ;;  %s45_s7 = int_to_ptr.vmem [resolvable:$true] %s44_s7  ;;  %s54_s9 = int_to_ptr.vmem [resolvable:$true] %s53_s9 }
  0x1d   :  { %s3381_s10 = scalar_lea.vmem %s45_s7, 64  ;;  %p3386_p11 = scmp.lt.s32.totalorder %s45_s7, %s45_s7 }
  0x1e   :  { %p3382_p10 = scmp.ne.s32.totalorder %s45_s7, %s3381_s10  ;;  %p3387_p12 = scmp.lt.s32.totalorder %s3381_s10, %s3381_s10 }
  0x20   :  { %p3388_p13 = por %p3387_p12, %p3386_p11 }
  0x22   :  { %p3389_p0 = pnand %p3388_p13, %p3382_p10 }
  0x24   :  { %3392 = shalt.err (!%p3389_p0)
}
  0x25   :  { %47 = dma.hbm_to_vmem [thread:$0]  %s5574_s2, 64, %s45_s7, [#allocation6]  }
  0x26   :  { %s3401_s13 = scalar_lea.vmem %s54_s9, 4096  ;;  %p3406_p2 = scmp.lt.s32.totalorder %s54_s9, %s54_s9 }
  0x27   :  { %p3402_p1 = scmp.ne.s32.totalorder %s54_s9, %s3401_s13  ;;  %p3407_p3 = scmp.lt.s32.totalorder %s3401_s13, %s3401_s13 }
  0x29   :  { %p3408_p4 = por %p3407_p3, %p3406_p2 }
  0x2b   :  { %p3409_p5 = pnand %p3408_p4, %p3402_p1 }
  0x2d   :  { %3412 = shalt.err (!%p3409_p5)
}
  0x2e   :  { %s3449_s0 = smov 64   ;;  %s3450_s14 = smov 4  }
  0x2f   :  { %59 = dma.hbm_to_vmem [thread:$0]  %s5575_s3, 4096, %s54_s9, [#allocation9], %s3449_s0, %s3449_s0, %s3450_s14  }
  0x30   :  { %3433 = dma.done.wait [#allocation3], 2048  }
  0x31   :  { %3434 = vsyncadd [#allocation3], 4294965248 }
  0x32   :  { %3435 = dma.done.wait [#allocation6], 4160  }
  0x33   :  { %3436 = vsyncadd [#allocation6], 4294963136 }
  0x34   :  { %3437 = dma.done.wait [#allocation9], 4096  }
  0x35   :  { %3438 = vsyncadd [#allocation9], 4294963200  ;;  %v3451_v0 = vmov 0   ;;  %v2997_v1 = vld [vmem:[#allocation5 + $0xe4] ss:$16 sps:$4 sm:$0xff]   ;;  %v76_v34 = vld [vmem:[#allocation2 + $0x8] sm:$0xff] }
  0x36   :  { %345 = vmatprep.mubr.bf16.mxu0 %v3451_v0  ;;  %458 = vmatprep.mubr.bf16.mxu1 %v3451_v0  ;;  %v2999_v2 = vld [vmem:[#allocation5 + $0xec] ss:$16 sps:$4 sm:$0xff]   ;;  %v3001_v3 = vld [vmem:[#allocation5 + $0xe0] ss:$16 sps:$4 sm:$0xff]   ;;  %v3002_v4 = vld [vmem:[#allocation5 + $0xe8] ss:$16 sps:$4 sm:$0xff]  }
  0x37   :  { %313 = vmatprep.subr.bf16.mxu0 %v2997_v1  ;;  %426 = vmatprep.subr.bf16.mxu1 %v2999_v2  ;;  %v3003_v5 = vld [vmem:[#allocation5 + $0xc4] ss:$16 sps:$4 sm:$0xff]   ;;  %v3005_v6 = vld [vmem:[#allocation5 + $0xcc] ss:$16 sps:$4 sm:$0xff]   ;;  %v3007_v7 = vld [vmem:[#allocation5 + $0xc0] ss:$16 sps:$4 sm:$0xff]  }
  0x38   :  { %314 = vmatpush1.bf16.msra.mxu0 %v3001_v3  ;;  %427 = vmatpush1.bf16.msra.mxu1 %v3002_v4  ;;  %v3008_v8 = vld [vmem:[#allocation5 + $0xc8] ss:$16 sps:$4 sm:$0xff]   ;;  %v3009_v9 = vld [vmem:[#allocation5 + $0xa4] ss:$16 sps:$4 sm:$0xff]   ;;  %v3011_v10 = vld [vmem:[#allocation5 + $0xac] ss:$16 sps:$4 sm:$0xff]  }
  0x39   :  { %315 = vmatprep.subr.bf16.mxu0 %v3003_v5  ;;  %428 = vmatprep.subr.bf16.mxu1 %v3005_v6  ;;  %v3013_v11 = vld [vmem:[#allocation5 + $0xa0] ss:$16 sps:$4 sm:$0xff]   ;;  %v3014_v12 = vld [vmem:[#allocation5 + $0xa8] ss:$16 sps:$4 sm:$0xff]   ;;  %v3015_v13 = vld [vmem:[#allocation5 + $0x84] ss:$16 sps:$4 sm:$0xff]  }
  0x3a   :  { %v3017_v14 = vld [vmem:[#allocation5 + $0x8c] ss:$16 sps:$4 sm:$0xff]   ;;  %v3019_v15 = vld [vmem:[#allocation5 + $0x80] ss:$16 sps:$4 sm:$0xff]   ;;  %v3020_v16 = vld [vmem:[#allocation5 + $0x88] ss:$16 sps:$4 sm:$0xff]  }
  0x3b   :  { %v3021_v17 = vld [vmem:[#allocation5 + $0x64] ss:$16 sps:$4 sm:$0xff]   ;;  %v3023_v18 = vld [vmem:[#allocation5 + $0x6c] ss:$16 sps:$4 sm:$0xff]   ;;  %v3025_v19 = vld [vmem:[#allocation5 + $0x60] ss:$16 sps:$4 sm:$0xff]  }
  0x3c   :  { %316 = vmatpush1.bf16.msra.mxu0 %v3007_v7  ;;  %429 = vmatpush1.bf16.msra.mxu1 %v3008_v8  ;;  %v3026_v20 = vld [vmem:[#allocation5 + $0x68] ss:$16 sps:$4 sm:$0xff]   ;;  %v3027_v21 = vld [vmem:[#allocation5 + $0x44] ss:$16 sps:$4 sm:$0xff]   ;;  %v3029_v22 = vld [vmem:[#allocation5 + $0x4c] ss:$16 sps:$4 sm:$0xff]  }
  0x3d   :  { %317 = vmatprep.subr.bf16.mxu0 %v3009_v9  ;;  %430 = vmatprep.subr.bf16.mxu1 %v3011_v10  ;;  %v3031_v23 = vld [vmem:[#allocation5 + $0x40] ss:$16 sps:$4 sm:$0xff]   ;;  %v3032_v24 = vld [vmem:[#allocation5 + $0x48] ss:$16 sps:$4 sm:$0xff]   ;;  %v3033_v25 = vld [vmem:[#allocation5 + $0x24] ss:$16 sps:$4 sm:$0xff]  }
  0x3e   :  { %v3035_v26 = vld [vmem:[#allocation5 + $0x2c] ss:$16 sps:$4 sm:$0xff]   ;;  %v3037_v27 = vld [vmem:[#allocation5 + $0x20] ss:$16 sps:$4 sm:$0xff]   ;;  %v3038_v28 = vld [vmem:[#allocation5 + $0x28] ss:$16 sps:$4 sm:$0xff]  }
  0x3f   :  { %v3039_v29 = vld [vmem:[#allocation5 + $0x4] ss:$16 sps:$4 sm:$0xff]   ;;  %v3041_v30 = vld [vmem:[#allocation5 + $0xc] ss:$16 sps:$4 sm:$0xff]   ;;  %v3043_v31 = vld [vmem:[#allocation5] ss:$16 sps:$4 sm:$0xff]  }
  0x40   :  { %318 = vmatpush1.bf16.msra.mxu0 %v3013_v11  ;;  %431 = vmatpush1.bf16.msra.mxu1 %v3014_v12  ;;  %v3044_v32 = vld [vmem:[#allocation5 + $0x8] ss:$16 sps:$4 sm:$0xff]   ;;  %v75_v33 = vld [vmem:[#allocation2] sm:$0xff]  ;;  %v77_v39 = vld [vmem:[#allocation2 + $0x10] sm:$0xff] }
  0x41   :  { %319 = vmatprep.subr.bf16.mxu0 %v3015_v13  ;;  %432 = vmatprep.subr.bf16.mxu1 %v3017_v14  ;;  %v3045_v35 = vld [vmem:[#allocation8 + $0x78] sm:$0xff]   ;;  %v91_v37 = vpack.c.bf16 %v76_v34, %v75_v33  ;;  %v80_v43 = vld [vmem:[#allocation2 + $0x28] sm:$0xff]  ;;  %v81_v45 = vld [vmem:[#allocation2 + $0x30] sm:$0xff] }
  0x42   :  { %v3047_v36 = vld [vmem:[#allocation8 + $0xf8] sm:$0xff]   ;;  %v84_v49 = vld [vmem:[#allocation2 + $0x48] sm:$0xff]  ;;  %v85_v51 = vld [vmem:[#allocation2 + $0x50] sm:$0xff] }
  0x43   :  { %v3046_v38 = vld [vmem:[#allocation8 + $0x38] sm:$0xff]   ;;  %v88_v55 = vld [vmem:[#allocation2 + $0x68] sm:$0xff]  ;;  %v89_v57 = vld [vmem:[#allocation2 + $0x70] sm:$0xff] }
  0x44   :  { %320 = vmatpush1.bf16.msra.mxu0 %v3019_v15  ;;  %433 = vmatpush1.bf16.msra.mxu1 %v3020_v16  ;;  %v78_v40 = vld [vmem:[#allocation2 + $0x18] sm:$0xff]  ;;  %v79_v42 = vld [vmem:[#allocation2 + $0x20] sm:$0xff]  ;;  %v3053_v2 = vld [vmem:[#allocation8 + $0x68] sm:$0xff]  }
  0x45   :  { %321 = vmatprep.subr.bf16.mxu0 %v3021_v17  ;;  %434 = vmatprep.subr.bf16.mxu1 %v3023_v18  ;;  %v92_v41 = vpack.c.bf16 %v78_v40, %v77_v39  ;;  %v93_v44 = vpack.c.bf16 %v80_v43, %v79_v42  ;;  %v82_v46 = vld [vmem:[#allocation2 + $0x38] sm:$0xff]  ;;  %v83_v48 = vld [vmem:[#allocation2 + $0x40] sm:$0xff]  ;;  %v3055_v3 = vld [vmem:[#allocation8 + $0xe8] sm:$0xff]  }
  0x46   :  { %v94_v47 = vpack.c.bf16 %v82_v46, %v81_v45  ;;  %v95_v50 = vpack.c.bf16 %v84_v49, %v83_v48  ;;  %v86_v52 = vld [vmem:[#allocation2 + $0x58] sm:$0xff]  ;;  %v87_v54 = vld [vmem:[#allocation2 + $0x60] sm:$0xff]  ;;  %v3054_v4 = vld [vmem:[#allocation8 + $0x28] sm:$0xff]  }
  0x47   :  { %v96_v53 = vpack.c.bf16 %v86_v52, %v85_v51  ;;  %v97_v56 = vpack.c.bf16 %v88_v55, %v87_v54  ;;  %v90_v58 = vld [vmem:[#allocation2 + $0x78] sm:$0xff]  ;;  %v3056_v5 = vld [vmem:[#allocation8 + $0xa8] sm:$0xff]   ;;  %v131_v9 = vld [vmem:[#allocation7] sm:$0xf] }
  0x48   :  { %322 = vmatpush1.bf16.msra.mxu0 %v3025_v19  ;;  %435 = vmatpush1.bf16.msra.mxu1 %v3026_v20  ;;  %v98_v59 = vpack.c.bf16 %v90_v58, %v89_v57  ;;  %v3048_v60 = vld [vmem:[#allocation8 + $0xb8] sm:$0xff]   ;;  %v3049_v61 = vld [vmem:[#allocation8 + $0x70] sm:$0xff]  }
  0x49   :  { %323 = vmatprep.subr.bf16.mxu0 %v3027_v21  ;;  %436 = vmatprep.subr.bf16.mxu1 %v3029_v22  ;;  %v3051_v62 = vld [vmem:[#allocation8 + $0xf0] sm:$0xff]  }
  0x4a   :  { %v3050_v63 = vld [vmem:[#allocation8 + $0x30] sm:$0xff]  }
  0x4b   :  { %v3052_v1 = vld [vmem:[#allocation8 + $0xb0] sm:$0xff]  }
  0x4c   :  { %324 = vmatpush1.bf16.msra.mxu0 %v3031_v23  ;;  %437 = vmatpush1.bf16.msra.mxu1 %v3032_v24 }
  0x4d   :  { %325 = vmatprep.subr.bf16.mxu0 %v3033_v25  ;;  %438 = vmatprep.subr.bf16.mxu1 %v3035_v26 }
  0x50   :  { %326 = vmatpush1.bf16.msra.mxu0 %v3037_v27  ;;  %439 = vmatpush1.bf16.msra.mxu1 %v3038_v28 }
  0x51   :  { %327 = vmatprep.subr.bf16.mxu0 %v3039_v29  ;;  %440 = vmatprep.subr.bf16.mxu1 %v3041_v30 }
  0x54   :  { %328 = vmatpush1.bf16.msra.mxu0 %v3043_v31  ;;  %441 = vmatpush1.bf16.msra.mxu1 %v3044_v32 }
  0x55   :  { %2856 = vmatprep.subr.bf16.mxu0 %v3045_v35  ;;  %2920 = vmatprep.subr.bf16.mxu1 %v3047_v36 }
  0x57   :  { %346 = vmatmul.mubr.bf16.vlgmr.msra.gmra.mxu0 %v91_v37  ;;  %459 = vmatmul.mubr.bf16.vlgmr.msra.gmra.mxu1 %v91_v37 }
  0x58   :  { %355 = vmatprep.mubr.bf16.mxu0 %v3451_v0  ;;  %468 = vmatprep.mubr.bf16.mxu1 %v3451_v0 }
  0x59   :  { %2857 = vmatpush3.bf16.msra.mxu0 %v3046_v38  ;;  %2921 = vmatpush3.bf16.msra.mxu1 %v3048_v60 }
  0x5a   :  { %2858 = vmatprep.subr.bf16.mxu0 %v3049_v61  ;;  %2922 = vmatprep.subr.bf16.mxu1 %v3051_v62 }
  0x5d   :  { %2859 = vmatpush3.bf16.msra.mxu0 %v3050_v63  ;;  %2923 = vmatpush3.bf16.msra.mxu1 %v3052_v1 }
  0x5e   :  { %2860 = vmatprep.subr.bf16.mxu0 %v3053_v2  ;;  %2924 = vmatprep.subr.bf16.mxu1 %v3055_v3  ;;  %v3059_v2 = vld [vmem:[#allocation8 + $0xe0] sm:$0xff]  }
  0x5f   :  { %356 = vmatmul.mubr.bf16.gmra.mxu0 %v92_v41  ;;  %469 = vmatmul.mubr.bf16.gmra.mxu1 %v92_v41 }
  0x60   :  { %365 = vmatprep.mubr.bf16.mxu0 %v3451_v0  ;;  %478 = vmatprep.mubr.bf16.mxu1 %v3451_v0 }
  0x61   :  { %2861 = vmatpush3.bf16.msra.mxu0 %v3054_v4  ;;  %2925 = vmatpush3.bf16.msra.mxu1 %v3056_v5 }
  0x62   :  { %2926 = vmatprep.subr.bf16.mxu1 %v3059_v2 }
  0x67   :  { %366 = vmatmul.mubr.bf16.gmra.mxu0 %v93_v44  ;;  %479 = vmatmul.mubr.bf16.gmra.mxu1 %v93_v44 }
  0x68   :  { %375 = vmatprep.mubr.bf16.mxu0 %v3451_v0  ;;  %488 = vmatprep.mubr.bf16.mxu1 %v3451_v0 }
  0x6f   :  { %376 = vmatmul.mubr.bf16.gmra.mxu0 %v94_v47  ;;  %489 = vmatmul.mubr.bf16.gmra.mxu1 %v94_v47 }
  0x70   :  { %385 = vmatprep.mubr.bf16.mxu0 %v3451_v0  ;;  %498 = vmatprep.mubr.bf16.mxu1 %v3451_v0 }
  0x77   :  { %386 = vmatmul.mubr.bf16.gmra.mxu0 %v95_v50  ;;  %499 = vmatmul.mubr.bf16.gmra.mxu1 %v95_v50 }
  0x78   :  { %395 = vmatprep.mubr.bf16.mxu0 %v3451_v0  ;;  %508 = vmatprep.mubr.bf16.mxu1 %v3451_v0 }
  0x7f   :  { %396 = vmatmul.mubr.bf16.gmra.mxu0 %v96_v53  ;;  %509 = vmatmul.mubr.bf16.gmra.mxu1 %v96_v53  ;;  %v3057_v53 = vld [vmem:[#allocation8 + $0x60] sm:$0xff]  }
  0x80   :  { %405 = vmatprep.mubr.bf16.mxu0 %v3451_v0  ;;  %518 = vmatprep.mubr.bf16.mxu1 %v3451_v0 }
  0x81   :  { %2862 = vmatprep.subr.bf16.mxu0 %v3057_v53 }
  0x87   :  { %406 = vmatmul.mubr.bf16.gmra.mxu0 %v97_v56  ;;  %519 = vmatmul.mubr.bf16.gmra.mxu1 %v97_v56 }
  0x88   :  { %415 = vmatprep.mubr.bf16.mxu0 %v3451_v0  ;;  %528 = vmatprep.mubr.bf16.mxu1 %v3451_v0  ;;  %v133_v0 = vlaneseq }
  0x8a   :  { %v134_v6 = vshrl.u32 %v133_v0, 7 }
  0x8c   :  { %v135_v7 = vsub.s32 0, %v134_v6  ;;  %v143_v8 = vsub.s32 2, %v134_v6  ;;  %v139_v12 = vsub.s32 1, %v134_v6  ;;  %v147_v13 = vsub.s32 3, %v134_v6  ;;  %v3058_v6 = vld [vmem:[#allocation8 + $0x20] sm:$0xff]  }
  0x8d   :  { %2863 = vmatpush3.bf16.msra.mxu0 %v3058_v6 }
  0x8e   :  { %v3515_v10 = vrot.slane %v131_v9, %v135_v7  ;;  %v3517_v11 = vrot.slane %v131_v9, %v143_v8  ;;  %v3525_v18 = vrot.slane %v131_v9, %v139_v12  ;;  %v3527_v20 = vrot.slane %v131_v9, %v147_v13 }
  0x8f   :  { %416 = vmatmul.mubr.bf16.gmra.mxu0 %v98_v59  ;;  %529 = vmatmul.mubr.bf16.gmra.mxu1 %v98_v59 }
 0x117   :  { %v347_v14 = vpop.f32.mrf.mxu0  ;;  %v460_v15 = vpop.f32.mrf.mxu1 }
 0x118   :  { %v3520_v16 = vadd.f32 %v347_v14, %v3515_v10  ;;  %v3523_v17 = vadd.f32 %v460_v15, %v3517_v11 }
 0x119   :  { %v349_v19 = vpop.f32.mrf.mxu0  ;;  %v462_v21 = vpop.f32.mrf.mxu1 }
 0x11a   :  { %v3530_v22 = vmul.f32 0.70710677, %v3520_v16  ;;  %v3533_v23 = vmul.f32 0.70710677, %v3523_v17  ;;  %v3536_v24 = vadd.f32 %v349_v19, %v3525_v18  ;;  %v3539_v25 = vadd.f32 %v462_v21, %v3527_v20 }
 0x11b   :  { %v351_v29 = vpop.f32.mrf.mxu0  ;;  %v464_v31 = vpop.f32.mrf.mxu1 }
 0x11c   :  { %v3542_v26 = vand.u32 2147483647, %v3530_v22  ;;  %v3545_v27 = vand.u32 2147483647, %v3533_v23  ;;  %v3548_v28 = vmul.f32 0.70710677, %v3536_v24  ;;  %v3559_v35 = vadd.f32 %v351_v29, %v3515_v10 }
 0x11d   :  { %v3551_v30 = vmul.f32 0.70710677, %v3539_v25  ;;  %v3562_v36 = vadd.f32 %v464_v31, %v3517_v11  ;;  %v353_v37 = vpop.f32.mrf.mxu0  ;;  %v466_v47 = vpop.f32.mrf.mxu1  ;;  %vm667_vm0 = vcmp.ge.f32.partialorder %v3530_v22, 0.0  ;;  %vm669_vm1 = vcmp.ge.f32.partialorder %v3533_v23, 0.0 }
 0x11e   :  { %v859_v32 = vmul.f32 0.3275911, %v3542_v26  ;;  %v861_v33 = vmul.f32 0.3275911, %v3545_v27  ;;  %v3556_v34 = vand.u32 2147483647, %v3548_v28  ;;  %v3574_v42 = vadd.f32 %v353_v37, %v3525_v18 }
 0x11f   :  { %v3565_v38 = vand.u32 2147483647, %v3551_v30  ;;  %v3568_v39 = vmul.f32 0.70710677, %v3559_v35  ;;  %v3571_v41 = vmul.f32 0.70710677, %v3562_v36  ;;  %v3589_v52 = vadd.f32 %v466_v47, %v3527_v20  ;;  %v357_v56 = vpop.f32.mrf.mxu0 }
 0x120   :  { %v923_v40 = vadd.f32 1.0, %v859_v32  ;;  %v925_v43 = vadd.f32 1.0, %v861_v33  ;;  %v860_v44 = vmul.f32 0.3275911, %v3556_v34  ;;  %v3586_v50 = vmul.f32 0.70710677, %v3574_v42 }
 0x121   :  { %v3578_v45 = vand.u32 2147483647, %v3568_v39  ;;  %v862_v46 = vmul.f32 0.3275911, %v3565_v38  ;;  %v3582_v48 = vand.u32 2147483647, %v3571_v41  ;;  %v3599_v60 = vadd.f32 %v357_v56, %v3515_v10 }
 0x122   :  { %3077 = vrcp.f32 %v923_v40  ;;  %v924_v51 = vadd.f32 1.0, %v860_v44  ;;  %v3593_v58 = vand.u32 2147483647, %v3586_v50  ;;  %v3596_v59 = vmul.f32 0.70710677, %v3589_v52 }
 0x123   :  { %v863_v49 = vmul.f32 0.3275911, %v3578_v45  ;;  %3079 = vrcp.f32 %v925_v43  ;;  %v926_v54 = vadd.f32 1.0, %v862_v46  ;;  %v865_v55 = vmul.f32 0.3275911, %v3582_v48  ;;  %v3060_v43 = vld [vmem:[#allocation8 + $0xa0] sm:$0xff]  }
 0x124   :  { %3081 = vrcp.f32 %v924_v51  ;;  %v864_v62 = vmul.f32 0.3275911, %v3593_v58  ;;  %v3603_v63 = vand.u32 2147483647, %v3596_v59  ;;  %v3606_v1 = vmul.f32 0.70710677, %v3599_v60  ;;  %2927 = vmatpush3.bf16.msra.mxu1 %v3060_v43 }
 0x125   :  { %v927_v57 = vadd.f32 1.0, %v863_v49  ;;  %3083 = vrcp.f32 %v926_v54  ;;  %v929_v61 = vadd.f32 1.0, %v865_v55  ;;  %v1691_v8 = vsub.f32 0.0, %v3542_v26  ;;  %v470_v55 = vpop.f32.mrf.mxu1 }
 0x126   :  { %v928_v3 = vadd.f32 1.0, %v864_v62  ;;  %v866_v0 = vmul.f32 0.3275911, %v3603_v63  ;;  %v3612_v5 = vand.u32 2147483647, %v3606_v1  ;;  %v1693_v12 = vsub.f32 0.0, %v3545_v27 }
 0x127   :  { %3085 = vrcp.f32 %v927_v57  ;;  %v1755_v29 = vmul.f32 %v1691_v8, %v3542_v26  ;;  %v1692_v31 = vsub.f32 0.0, %v3556_v34  ;;  %v3630_v32 = vmul.f32 0.5, %v3520_v16 }
 0x128   :  { %3087 = vrcp.f32 %v929_v61  ;;  %v930_v14 = vadd.f32 1.0, %v866_v0  ;;  %v867_v15 = vmul.f32 0.3275911, %v3612_v5  ;;  %v3633_v37 = vmul.f32 0.5, %v3523_v17 }
 0x129   :  { %3089 = vrcp.f32 %v928_v3  ;;  %v1757_v40 = vmul.f32 %v1693_v12, %v3545_v27  ;;  %v5578_v23 = vmov -1.0   ;;  %v3646_v17 = vmul.f32 0.5, %v3536_v24 }
 0x12a   :  { %3091 = vrcp.f32 %v930_v14  ;;  %v931_v26 = vadd.f32 1.0, %v867_v15  ;;  %v3640_v47 = vsel %vm667_vm0, 1.0, %v5578_v23  ;;  %v3643_v16 = vsel %vm669_vm1, 1.0, %v5578_v23 }
 0x12b   :  { %v1819_v51 = vmul.f32 1.442695, %v1755_v29  ;;  %vm668_vm2 = vcmp.ge.f32.partialorder %v3548_v28, 0.0  ;;  %v1756_v53 = vmul.f32 %v1692_v31, %v3556_v34  ;;  %v1694_v54 = vsub.f32 0.0, %v3565_v38 }
 0x12c   :  { %v1823_v57 = vmul.f32 1.442695, %v1757_v40  ;;  %v3656_v61 = vmul.f32 0.5, %v3539_v25  ;;  %vm670_vm3 = vcmp.ge.f32.partialorder %v3551_v30, 0.0  ;;  %3093 = vrcp.f32 %v931_v26 }
 0x12d   :  { %v3662_v28 = vsel %vm668_vm2, 1.0, %v5578_v23  ;;  %v3666_v0 = vadd.f32 %v470_v55, %v3517_v11  ;;  %3095 = vpow2.f32 %v1819_v51  ;;  %v1821_v25 = vmul.f32 1.442695, %v1756_v53 }
 0x12e   :  { %v1758_v6 = vmul.f32 %v1694_v54, %v3565_v38  ;;  %v1695_v8 = vsub.f32 0.0, %v3578_v45  ;;  %3097 = vpow2.f32 %v1823_v57  ;;  %v3671_v30 = vsel %vm670_vm3, 1.0, %v5578_v23 }
 0x12f   :  { %v3608_v4 = vpop.eup %3077  ;;  %v3677_v29 = vmul.f32 0.5, %v3559_v35  ;;  %v3680_v31 = vmul.f32 0.5, %v3562_v36  ;;  %vm671_vm4 = vcmp.ge.f32.partialorder %v3568_v39, 0.0  ;;  %v3685_v40 = vmul.f32 0.70710677, %v3666_v0 }
 0x130   :  { %v3614_v7 = vpop.eup %3079  ;;  %v1115_v9 = vmul.f32 1.0614054, %v3608_v4  ;;  %3099 = vpow2.f32 %v1821_v25  ;;  %v1825_v43 = vmul.f32 1.442695, %v1758_v6  ;;  %vm673_vm5 = vcmp.ge.f32.partialorder %v3571_v41, 0.0 }
 0x131   :  { %v1117_v13 = vmul.f32 1.0614054, %v3614_v7  ;;  %v3621_v19 = vpop.eup %3081  ;;  %v3695_v51 = vsel %vm671_vm4, 1.0, %v5578_v23  ;;  %v3698_v53 = vmul.f32 0.5, %v3574_v42  ;;  %vm672_vm6 = vcmp.ge.f32.partialorder %v3586_v50, 0.0  ;;  %v359_v42 = vpop.f32.mrf.mxu0 }
 0x132   :  { %v3623_v21 = vpop.eup %3083  ;;  %v1179_v33 = vadd.f32 -1.4531521, %v1115_v9  ;;  %v1116_v22 = vmul.f32 1.0614054, %v3621_v19  ;;  %v3705_v41 = vand.u32 2147483647, %v3685_v40  ;;  %3101 = vpow2.f32 %v1825_v43 }
 0x133   :  { %v1181_v46 = vadd.f32 -1.4531521, %v1117_v13  ;;  %v1118_v27 = vmul.f32 1.0614054, %v3623_v21  ;;  %5594 = vst [vmem:[#allocation15_spill] sm:$0xff] %v3698_v53  ;;  %v3708_v57 = vsel %vm673_vm5, 1.0, %v5578_v23 }
 0x134   :  { %v3636_v44 = vpop.eup %3085  ;;  %v1243_v56 = vmul.f32 %v3608_v4, %v1179_v33  ;;  %v1180_v2 = vadd.f32 -1.4531521, %v1116_v22  ;;  %v1697_v22 = vsub.f32 0.0, %v3582_v48  ;;  %v3714_v50 = vsel %vm672_vm6, 1.0, %v5578_v23 }
 0x135   :  { %v3649_v49 = vpop.eup %3087  ;;  %v1119_v24 = vmul.f32 1.0614054, %v3636_v44  ;;  %v1245_v62 = vmul.f32 %v3614_v7, %v1181_v46  ;;  %v1182_v34 = vadd.f32 -1.4531521, %v1118_v27  ;;  %v1759_v46 = vmul.f32 %v1695_v8, %v3578_v45 }
 0x136   :  { %v1121_v3 = vmul.f32 1.0614054, %v3649_v49  ;;  %v1307_v9 = vadd.f32 1.4214138, %v1243_v56  ;;  %v3673_v13 = vpop.eup %3089  ;;  %v1244_v15 = vmul.f32 %v3621_v19, %v1180_v2  ;;  %v3726_v43 = vmul.f32 0.5, %v3589_v52 }
 0x137   :  { %v1183_v12 = vadd.f32 -1.4531521, %v1119_v24  ;;  %v1309_v14 = vadd.f32 1.4214138, %v1245_v62  ;;  %v1246_v38 = vmul.f32 %v3623_v21, %v1182_v34  ;;  %v1120_v36 = vmul.f32 1.0614054, %v3673_v13  ;;  %v3700_v45 = vpop.eup %3091 }
 0x138   :  { %v1185_v33 = vadd.f32 -1.4531521, %v1121_v3  ;;  %v1371_v35 = vmul.f32 %v3608_v4, %v1307_v9  ;;  %v1308_v27 = vadd.f32 1.4214138, %v1244_v15  ;;  %v1827_v56 = vmul.f32 1.442695, %v1759_v46 }
 0x139   :  { %v1247_v26 = vmul.f32 %v3636_v44, %v1183_v12  ;;  %v1373_v39 = vmul.f32 %v3614_v7, %v1309_v14  ;;  %v1310_v54 = vadd.f32 1.4214138, %v1246_v38  ;;  %v1761_v24 = vmul.f32 %v1697_v22, %v3582_v48  ;;  %v3717_v9 = vpop.eup %3093  ;;  %5595 = vst [vmem:[#allocation16_spill] sm:$0xff] %v3726_v43  ;;  %v361_v43 = vpop.f32.mrf.mxu0 }
 0x13a   :  { %v1249_v55 = vmul.f32 %v3649_v49, %v1185_v33  ;;  %v1696_v62 = vsub.f32 0.0, %v3593_v58  ;;  %v1435_v2 = vadd.f32 -0.28449672, %v1371_v35  ;;  %v1184_v3 = vadd.f32 -1.4531521, %v1120_v36  ;;  %v3728_v46 = vpop.eup %3095  ;;  %v472_v36 = vpop.f32.mrf.mxu1 }
 0x13b   :  { %v1311_v34 = vadd.f32 1.4214138, %v1247_v26  ;;  %v1437_v25 = vadd.f32 -0.28449672, %v1373_v39  ;;  %v1372_v6 = vmul.f32 %v3621_v19, %v1308_v27  ;;  %v1122_v8 = vmul.f32 1.0614054, %v3700_v45  ;;  %v3098_v39 = vpop.eup %3097 }
 0x13c   :  { %v1374_v12 = vmul.f32 %v3623_v21, %v1310_v54  ;;  %v1313_v48 = vadd.f32 1.4214138, %v1249_v55  ;;  %v869_v14 = vmul.f32 0.3275911, %v3705_v41  ;;  %v3722_v15 = vadd.f32 %v359_v42, %v3525_v18 }
 0x13d   :  { %3103 = vpow2.f32 %v1827_v56  ;;  %v1831_v38 = vmul.f32 1.442695, %v1761_v24  ;;  %v1760_v33 = vmul.f32 %v1696_v62, %v3593_v58  ;;  %v1499_v22 = vmul.f32 %v3608_v4, %v1435_v2 }
 0x13e   :  { %v1375_v35 = vmul.f32 %v3636_v44, %v1311_v34  ;;  %v1248_v26 = vmul.f32 %v3673_v13, %v1184_v3  ;;  %vm674_vm7 = vcmp.ge.f32.partialorder %v3596_v59, 0.0  ;;  %v1501_v27 = vmul.f32 %v3614_v7, %v1437_v25  ;;  %v3747_v3 = vpop.eup %3099 }
 0x13f   :  { %v1436_v54 = vadd.f32 -0.28449672, %v1372_v6  ;;  %v1186_v55 = vadd.f32 -1.4531521, %v1122_v8  ;;  %v1123_v58 = vmul.f32 1.0614054, %v3717_v9  ;;  %v1377_v56 = vmul.f32 %v3649_v49, %v1313_v48 }
 0x140   :  { %v1438_v52 = vadd.f32 -0.28449672, %v1374_v12  ;;  %v933_v24 = vadd.f32 1.0, %v869_v14  ;;  %v3738_v62 = vmul.f32 0.70710677, %v3722_v15  ;;  %v3741_v2 = vsel %vm674_vm7, 1.0, %v5578_v23 }
 0x141   :  { %v1829_v42 = vmul.f32 1.442695, %v1760_v33  ;;  %5596 = vst [vmem:[#allocation17_spill] sm:$0xff] %v3741_v2  ;;  %v1698_v59 = vsub.f32 0.0, %v3603_v63  ;;  %v3745_v34 = vadd.f32 %v472_v36, %v3527_v20  ;;  %v1563_v25 = vadd.f32 0.2548296, %v1499_v22 }
 0x142   :  { %v1439_v6 = vadd.f32 -0.28449672, %v1375_v35  ;;  %3105 = vpow2.f32 %v1831_v38  ;;  %v1312_v8 = vadd.f32 1.4214138, %v1248_v26  ;;  %v1565_v12 = vadd.f32 0.2548296, %v1501_v27 }
 0x143   :  { %5597 = vst [vmem:[#allocation18_spill] sm:$0xff] %v3745_v34  ;;  %v1500_v48 = vmul.f32 %v3621_v19, %v1436_v54  ;;  %v1250_v14 = vmul.f32 %v3700_v45, %v1186_v55  ;;  %v1187_v33 = vadd.f32 -1.4531521, %v1123_v58  ;;  %v1502_v23 = vmul.f32 %v3623_v21, %v1438_v52  ;;  %v3102_v55 = vpop.eup %3101 }
 0x144   :  { %v1441_v53 = vadd.f32 -0.28449672, %v1377_v56  ;;  %3107 = vrcp.f32 %v933_v24  ;;  %v3753_v36 = vand.u32 2147483647, %v3738_v62  ;;  %v1762_v2 = vmul.f32 %v1698_v59, %v3603_v63  ;;  %v474_v56 = vpop.f32.mrf.mxu1 }
 0x145   :  { %v3757_v22 = vmul.f32 0.5, %v3599_v60  ;;  %vm675_vm8 = vcmp.ge.f32.partialorder %v3606_v1, 0.0  ;;  %v3761_v38 = vmul.f32 0.70710677, %v3745_v34  ;;  %v1503_v35 = vmul.f32 %v3636_v44, %v1439_v6 }
 0x146   :  { %v1376_v26 = vmul.f32 %v3673_v13, %v1312_v8  ;;  %v1699_v27 = vsub.f32 0.0, %v3612_v5  ;;  %v3767_v54 = vadd.f32 %v361_v43, %v3515_v10  ;;  %v1627_v63 = vmul.f32 %v3608_v4, %v1563_v25  ;;  %v3061_v25 = vld [vmem:[#allocation8 + $0x58] sm:$0xff]  }
 0x147   :  { %5598 = vst [vmem:[#allocation19_spill] sm:$0xff] %v3757_v22  ;;  %5599 = vst [vmem:[#allocation20_spill] sm:$0xff] %v3761_v38  ;;  %v1629_v60 = vmul.f32 %v3614_v7, %v1565_v12  ;;  %v1314_v58 = vadd.f32 1.4214138, %v1250_v14  ;;  %v1251_v52 = vmul.f32 %v3717_v9, %v1187_v33  ;;  %v1564_v24 = vadd.f32 0.2548296, %v1500_v48  ;;  %2864 = vmatprep.subr.bf16.mxu0 %v3061_v25 }
 0x148   :  { %5600 = vst [vmem:[#allocation21_spill] sm:$0xff] %v3767_v54  ;;  %v1566_v59 = vadd.f32 0.2548296, %v1502_v23  ;;  %v1505_v6 = vmul.f32 %v3649_v49, %v1441_v53  ;;  %v868_v8 = vmul.f32 0.3275911, %v3753_v36  ;;  %3109 = vpow2.f32 %v1829_v42 }
 0x149   :  { %v5601_v22 = vmov -1.0   ;;  %v3780_v4 = vand.u32 2147483647, %v3761_v38  ;;  %v3783_v7 = vmul.f32 0.70710677, %v3767_v54  ;;  %v1763_v53 = vmul.f32 %v1699_v27, %v3612_v5 }
 0x14a   :  { %v3777_v43 = vsel %vm675_vm8, 1.0, %v5601_v22  ;;  %v3104_v12 = vpop.eup %3103  ;;  %v1567_v48 = vadd.f32 0.2548296, %v1503_v35  ;;  %v1440_v23 = vadd.f32 -0.28449672, %v1376_v26  ;;  %v3787_v14 = vadd.f32 %v474_v56, %v3517_v11  ;;  %v363_v26 = vpop.f32.mrf.mxu0 }
 0x14b   :  { %5602 = vst [vmem:[#allocation22_spill] sm:$0xff] %v3777_v43  ;;  %v1378_v42 = vmul.f32 %v3700_v45, %v1314_v58  ;;  %v1833_v1 = vmul.f32 1.442695, %v1762_v2  ;;  %v1315_v33 = vadd.f32 1.4214138, %v1251_v52  ;;  %v3791_v43 = vmul.f32 0.5, %v3666_v0 }
 0x14c   :  { %v1947_v54 = vmul.f32 %v3728_v46, %v1627_v63  ;;  %v1949_v38 = vmul.f32 %v3098_v39, %v1629_v60  ;;  %v1628_v34 = vmul.f32 %v3621_v19, %v1564_v24  ;;  %v1569_v35 = vadd.f32 0.2548296, %v1505_v6  ;;  %v476_v6 = vpop.f32.mrf.mxu1 }
 0x14d   :  { %v1630_v5 = vmul.f32 %v3623_v21, %v1566_v59  ;;  %v932_v27 = vadd.f32 1.0, %v868_v8  ;;  %v870_v56 = vmul.f32 0.3275911, %v3780_v4  ;;  %v3798_v58 = vand.u32 2147483647, %v3783_v7 }
 0x14e   :  { %v1631_v2 = vmul.f32 %v3636_v44, %v1567_v48  ;;  %v1504_v0 = vmul.f32 %v3673_v13, %v1440_v23  ;;  %v1835_v52 = vmul.f32 1.442695, %v1763_v53  ;;  %v3803_v46 = vmul.f32 0.70710677, %v3787_v14 }
 0x14f   :  { %v3106_v39 = vpop.eup %3105  ;;  %v1442_v19 = vadd.f32 -0.28449672, %v1378_v42  ;;  %3111 = vpow2.f32 %v1833_v1  ;;  %v1379_v63 = vmul.f32 %v3717_v9, %v1315_v33  ;;  %v3807_v21 = vadd.f32 %v363_v26, %v3525_v18  ;;  %v3063_v26 = vld [vmem:[#allocation8 + $0xd8] sm:$0xff]  }
 0x150   :  { %v2011_v60 = vsub.f32 1.0, %v1947_v54  ;;  %v2013_v24 = vsub.f32 1.0, %v1949_v38  ;;  %v1948_v59 = vmul.f32 %v3747_v3, %v1628_v34  ;;  %v1633_v44 = vmul.f32 %v3649_v49, %v1569_v35  ;;  %v367_v35 = vpop.f32.mrf.mxu0  ;;  %2928 = vmatprep.subr.bf16.mxu1 %v3063_v26 }
 0x151   :  { %v3811_v8 = vpop.eup %3107  ;;  %v1950_v25 = vmul.f32 %v3102_v55, %v1630_v5  ;;  %vm677_vm9 = vcmp.ge.f32.partialorder %v3685_v40, 0.0  ;;  %3113 = vrcp.f32 %v932_v27  ;;  %v934_v48 = vadd.f32 1.0, %v870_v56 }
 0x152   :  { %v871_v23 = vmul.f32 0.3275911, %v3798_v58  ;;  %v1951_v53 = vmul.f32 %v3104_v12, %v1631_v2  ;;  %v1568_v42 = vadd.f32 0.2548296, %v1504_v0  ;;  %3115 = vpow2.f32 %v1835_v52 }
 0x153   :  { %v3816_v54 = vand.u32 2147483647, %v3803_v46  ;;  %v1506_v34 = vmul.f32 %v3700_v45, %v1442_v19  ;;  %v1443_v3 = vadd.f32 -0.28449672, %v1379_v63  ;;  %v3820_v49 = vmul.f32 0.70710677, %v3807_v21 }
 0x154   :  { %v3823_v38 = vadd.f32 %v476_v6, %v3527_v20  ;;  %v2075_v55 = vmul.f32 %v2011_v60, %v3640_v47  ;;  %v2012_v1 = vsub.f32 1.0, %v1948_v59  ;;  %v1953_v33 = vmul.f32 %v3106_v39, %v1633_v44 }
 0x155   :  { %v1125_v12 = vmul.f32 1.0614054, %v3811_v8  ;;  %v2077_v5 = vmul.f32 %v2013_v24, %v3643_v16  ;;  %v2014_v27 = vsub.f32 1.0, %v1950_v25  ;;  %3117 = vrcp.f32 %v934_v48  ;;  %v3110_v2 = vpop.eup %3109  ;;  %v3062_v24 = vld [vmem:[#allocation8 + $0x18] sm:$0xff]  }
 0x156   :  { %v935_v56 = vadd.f32 1.0, %v871_v23  ;;  %v1632_v0 = vmul.f32 %v3673_v13, %v1568_v42  ;;  %v873_v52 = vmul.f32 0.3275911, %v3816_v54  ;;  %v3831_v19 = vand.u32 2147483647, %v3820_v49  ;;  %2865 = vmatpush3.bf16.msra.mxu0 %v3062_v24 }
 0x157   :  { %v3834_v47 = vmul.f32 0.70710677, %v3823_v38  ;;  %v2015_v39 = vsub.f32 1.0, %v1951_v53  ;;  %v1570_v63 = vadd.f32 0.2548296, %v1506_v34  ;;  %v1507_v60 = vmul.f32 %v3717_v9, %v1443_v3 }
 0x158   :  { %v3838_v16 = vadd.f32 %v367_v35, %v3515_v10  ;;  %v2139_v59 = vadd.f32 1.0, %v2075_v55  ;;  %v2076_v13 = vmul.f32 %v2012_v1, %v3662_v28  ;;  %v2017_v44 = vsub.f32 1.0, %v1953_v33 }
 0x159   :  { %v1189_v6 = vadd.f32 -1.4531521, %v1125_v12  ;;  %v2141_v25 = vadd.f32 1.0, %v2077_v5  ;;  %v2078_v48 = vmul.f32 %v2014_v27, %v3671_v30  ;;  %v1701_v23 = vsub.f32 0.0, %v3705_v41 }
 0x15a   :  { %3119 = vrcp.f32 %v935_v56  ;;  %v1952_v53 = vmul.f32 %v3110_v2, %v1632_v0  ;;  %v937_v42 = vadd.f32 1.0, %v873_v52  ;;  %v872_v34 = vmul.f32 0.3275911, %v3831_v19  ;;  %v480_v2 = vpop.f32.mrf.mxu1 }
 0x15b   :  { %v3845_v3 = vand.u32 2147483647, %v3834_v47  ;;  %v2079_v55 = vmul.f32 %v2015_v39, %v3695_v51  ;;  %v1634_v28 = vmul.f32 %v3700_v45, %v1570_v63  ;;  %v1571_v1 = vadd.f32 0.2548296, %v1507_v60 }
 0x15c   :  { %v3850_v33 = vmul.f32 0.70710677, %v3838_v16  ;;  %v3112_v30 = vpop.eup %3111  ;;  %v2140_v12 = vadd.f32 1.0, %v2076_v13  ;;  %v2081_v35 = vmul.f32 %v2017_v44, %v3708_v57  ;;  %v3856_v26 = vsel %vm677_vm9, 1.0, %v5601_v22 }
 0x15d   :  { %v1253_v5 = vmul.f32 %v3811_v8, %v1189_v6  ;;  %v3860_v27 = vmul.f32 %v2139_v59, %v3630_v32  ;;  %v3863_v51 = vmul.f32 %v2141_v25, %v3633_v37  ;;  %v2142_v45 = vadd.f32 1.0, %v2078_v48  ;;  %v3064_v37 = vld [vmem:[#allocation8 + $0x98] sm:$0xff]  }
 0x15e   :  { %v1765_v56 = vmul.f32 %v1701_v23, %v3705_v41  ;;  %v3866_v0 = vpop.eup %3113  ;;  %v2016_v57 = vsub.f32 1.0, %v1952_v53  ;;  %3121 = vrcp.f32 %v937_v42  ;;  %v936_v52 = vadd.f32 1.0, %v872_v34  ;;  %2929 = vmatpush3.bf16.msra.mxu1 %v3064_v37 }
 0x15f   :  { %5603 = vst [vmem:[#allocation23_spill] sm:$0xff] %v3860_v27  ;;  %5604 = vst [vmem:[#allocation24_spill] sm:$0xff] %v3863_v51  ;;  %v874_v40 = vmul.f32 0.3275911, %v3845_v3  ;;  %v3116_v39 = vpop.eup %3115  ;;  %v2143_v63 = vadd.f32 1.0, %v2079_v55  ;;  %v1954_v60 = vmul.f32 %v3112_v30, %v1634_v28  ;;  %v1635_v32 = vmul.f32 %v3717_v9, %v1571_v1 }
 0x160   :  { %v3871_v24 = vand.u32 2147483647, %v3850_v33  ;;  %v3874_v59 = vmul.f32 %v2140_v12, %v3646_v17  ;;  %v2145_v41 = vadd.f32 1.0, %v2081_v35  ;;  %v1317_v13 = vadd.f32 1.4214138, %v1253_v5 }
 0x161   :  { %v3877_v44 = vadd.f32 %v480_v2, %v3517_v11  ;;  %v3880_v6 = vmul.f32 %v2142_v45, %v3656_v61  ;;  %v1839_v25 = vmul.f32 1.442695, %v1765_v56  ;;  %vm676_vm10 = vcmp.ge.f32.partialorder %v3738_v62, 0.0  ;;  %v5609_v2 = vld [vmem:[#allocation17_spill] sm:$0xff] }
 0x162   :  { %5605 = vst [vmem:[#allocation25_spill] sm:$0xff] %v3874_v59  ;;  %v1124_v9 = vmul.f32 1.0614054, %v3866_v0  ;;  %v3884_v48 = vpop.eup %3117  ;;  %v2080_v23 = vmul.f32 %v2016_v57, %v3714_v50  ;;  %v1700_v17 = vsub.f32 0.0, %v3753_v36  ;;  %3123 = vrcp.f32 %v936_v52 }
 0x163   :  { %5606 = vst [vmem:[#allocation26_spill] sm:$0xff] %v3880_v6  ;;  %v938_v53 = vadd.f32 1.0, %v874_v40  ;;  %v3889_v42 = vmul.f32 %v2143_v63, %v3677_v29  ;;  %v2018_v34 = vsub.f32 1.0, %v1954_v60  ;;  %v1955_v61 = vmul.f32 %v3116_v39, %v1635_v32  ;;  %v369_v40 = vpop.f32.mrf.mxu0  ;;  %v5610_v60 = vld [vmem:[#allocation18_spill] sm:$0xff] }
 0x164   :  { %v875_v55 = vmul.f32 0.3275911, %v3871_v24  ;;  %v3893_v28 = vmul.f32 %v2145_v41, %v3680_v31  ;;  %v1381_v1 = vmul.f32 %v3811_v8, %v1317_v13  ;;  %v3897_v30 = vmul.f32 0.5, %v3722_v15  ;;  %v5611_v41 = vld [vmem:[#allocation20_spill] sm:$0xff] }
 0x165   :  { %5607 = vst [vmem:[#allocation27_spill] sm:$0xff] %v3889_v42  ;;  %v3900_v50 = vmul.f32 0.70710677, %v3877_v44  ;;  %3125 = vpow2.f32 %v1839_v25  ;;  %v3905_v29 = vsel %vm676_vm10, 1.0, %v5601_v22  ;;  %v1188_v12 = vadd.f32 -1.4531521, %v1124_v9 }
 0x166   :  { %5608 = vst [vmem:[#allocation28_spill] sm:$0xff] %v3893_v28  ;;  %v1126_v35 = vmul.f32 1.0614054, %v3884_v48  ;;  %v2144_v31 = vadd.f32 1.0, %v2080_v23  ;;  %v1764_v45 = vmul.f32 %v1700_v17, %v3753_v36  ;;  %v1702_v15 = vsub.f32 0.0, %v3780_v4  ;;  %v5612_v9 = vld [vmem:[#allocation15_spill] sm:$0xff] }
 0x167   :  { %v3908_v5 = vpop.eup %3119  ;;  %3127 = vrcp.f32 %v938_v53  ;;  %v2082_v57 = vmul.f32 %v2018_v34, %v5609_v2  ;;  %v2019_v52 = vsub.f32 1.0, %v1955_v61  ;;  %v939_v62 = vadd.f32 1.0, %v875_v55 }
 0x168   :  { %v1445_v63 = vadd.f32 -0.28449672, %v1381_v1  ;;  %v3918_v32 = vmul.f32 0.5, %v5610_v60  ;;  %v3921_v36 = vand.u32 2147483647, %v3900_v50  ;;  %v1252_v37 = vmul.f32 %v3866_v0, %v1188_v12  ;;  %v5614_v1 = vld [vmem:[#allocation22_spill] sm:$0xff] }
 0x169   :  { %vm678_vm11 = vcmp.ge.f32.partialorder %v5611_v41, 0.0  ;;  %v1190_v13 = vadd.f32 -1.4531521, %v1126_v35  ;;  %v1127_v25 = vmul.f32 1.0614054, %v3908_v5  ;;  %v3927_v23 = vmul.f32 %v2144_v31, %v5612_v9  ;;  %v5615_v31 = vld [vmem:[#allocation21_spill] sm:$0xff] }
 0x16a   :  { %v1837_v17 = vmul.f32 1.442695, %v1764_v45  ;;  %v1766_v53 = vmul.f32 %v1702_v15, %v3780_v4  ;;  %v3931_v34 = vadd.f32 %v369_v40, %v3525_v18  ;;  %v2146_v55 = vadd.f32 1.0, %v2082_v57  ;;  %v5616_v9 = vld [vmem:[#allocation16_spill] sm:$0xff] }
 0x16b   :  { %5613 = vst [vmem:[#allocation17_spill] sm:$0xff] %v3927_v23  ;;  %v3933_v61 = vpop.eup %3121  ;;  %v2083_v2 = vmul.f32 %v2019_v52, %v5614_v1  ;;  %v1703_v12 = vsub.f32 0.0, %v3798_v58  ;;  %3129 = vrcp.f32 %v939_v62  ;;  %v1509_v35 = vmul.f32 %v3811_v8, %v1445_v63 }
 0x16c   :  { %v3939_v60 = vsel %vm678_vm11, 1.0, %v5601_v22  ;;  %v3942_v45 = vmul.f32 0.5, %v5615_v31  ;;  %v877_v4 = vmul.f32 0.3275911, %v3921_v36  ;;  %v1316_v15 = vadd.f32 1.4214138, %v1252_v37 }
 0x16d   :  { %v1254_v40 = vmul.f32 %v3884_v48, %v1190_v13  ;;  %vm679_vm12 = vcmp.ge.f32.partialorder %v3783_v7, 0.0  ;;  %v1191_v57 = vadd.f32 -1.4531521, %v1127_v25  ;;  %3131 = vpow2.f32 %v1837_v17 }
 0x16e   :  { %v1841_v52 = vmul.f32 1.442695, %v1766_v53  ;;  %v1129_v62 = vmul.f32 1.0614054, %v3933_v61  ;;  %v3949_v63 = vmul.f32 0.70710677, %v3931_v34  ;;  %v3954_v1 = vmul.f32 %v2146_v55, %v5616_v9  ;;  %v482_v9 = vpop.f32.mrf.mxu1 }
 0x16f   :  { %v3951_v41 = vpop.eup %3123  ;;  %v2147_v31 = vadd.f32 1.0, %v2083_v2  ;;  %v1767_v37 = vmul.f32 %v1703_v12, %v3798_v58  ;;  %v1705_v13 = vsub.f32 0.0, %v3816_v54  ;;  %v1573_v39 = vadd.f32 0.2548296, %v1509_v35 }
 0x170   :  { %5617 = vst [vmem:[#allocation18_spill] sm:$0xff] %v3954_v1  ;;  %v3959_v7 = vsel %vm679_vm12, 1.0, %v5601_v22  ;;  %vm681_vm13 = vcmp.ge.f32.partialorder %v3803_v46, 0.0  ;;  %v941_v25 = vadd.f32 1.0, %v877_v4  ;;  %v1380_v17 = vmul.f32 %v3866_v0, %v1316_v15  ;;  %v5618_v46 = vld [vmem:[#allocation19_spill] sm:$0xff] }
 0x171   :  { %v1318_v53 = vadd.f32 1.4214138, %v1254_v40  ;;  %v1255_v56 = vmul.f32 %v3908_v5, %v1191_v57  ;;  %v3965_v55 = vmul.f32 0.5, %v3787_v14  ;;  %3133 = vpow2.f32 %v1841_v52 }
 0x172   :  { %v3126_v2 = vpop.eup %3125  ;;  %v1193_v58 = vadd.f32 -1.4531521, %v1129_v62  ;;  %v1128_v12 = vmul.f32 1.0614054, %v3951_v41  ;;  %v3969_v35 = vand.u32 2147483647, %v3949_v63  ;;  %v3974_v4 = vmul.f32 %v2147_v31, %v5618_v46 }
 0x173   :  { %v1843_v15 = vmul.f32 1.442695, %v1767_v37  ;;  %v3977_v40 = vsel %vm681_vm13, 1.0, %v5601_v22  ;;  %v1769_v14 = vmul.f32 %v1705_v13, %v3816_v54  ;;  %v1637_v57 = vmul.f32 %v3811_v8, %v1573_v39 }
 0x174   :  { %v3971_v51 = vpop.eup %3127  ;;  %5619 = vst [vmem:[#allocation20_spill] sm:$0xff] %v3974_v4  ;;  %vm680_vm14 = vcmp.ge.f32.partialorder %v3820_v49, 0.0  ;;  %v1704_v52 = vsub.f32 0.0, %v3831_v19  ;;  %3135 = vrcp.f32 %v941_v25  ;;  %v1444_v62 = vadd.f32 -0.28449672, %v1380_v17 }
 0x175   :  { %v1382_v28 = vmul.f32 %v3884_v48, %v1318_v53  ;;  %v1319_v1 = vadd.f32 1.4214138, %v1255_v56  ;;  %v3985_v31 = vadd.f32 %v482_v9, %v3527_v20  ;;  %v1257_v37 = vmul.f32 %v3933_v61, %v1193_v58 }
 0x176   :  { %v1192_v46 = vadd.f32 -1.4531521, %v1128_v12  ;;  %v1130_v4 = vmul.f32 1.0614054, %v3971_v51  ;;  %v876_v54 = vmul.f32 0.3275911, %v3969_v35  ;;  %3137 = vpow2.f32 %v1843_v15  ;;  %v371_v12 = vpop.f32.mrf.mxu0 }
 0x177   :  { %v1847_v8 = vmul.f32 1.442695, %v1769_v14  ;;  %v3991_v39 = vmul.f32 0.5, %v3807_v21  ;;  %v3994_v13 = vmul.f32 0.5, %v3823_v38  ;;  %v1957_v56 = vmul.f32 %v3126_v2, %v1637_v57  ;;  %v3065_v14 = vld [vmem:[#allocation8 + $0x50] sm:$0xff]  }
 0x178   :  { %v3996_v25 = vpop.eup %3129  ;;  %v4001_v17 = vsel %vm680_vm14, 1.0, %v5601_v22  ;;  %v1768_v53 = vmul.f32 %v1704_v52, %v3831_v19  ;;  %v1706_v58 = vsub.f32 0.0, %v3845_v3  ;;  %v1508_v9 = vmul.f32 %v3866_v0, %v1444_v62  ;;  %2866 = vmatprep.subr.bf16.mxu0 %v3065_v14 }
 0x179   :  { %5620 = vst [vmem:[#allocation15_spill] sm:$0xff] %v3991_v39  ;;  %5621 = vst [vmem:[#allocation22_spill] sm:$0xff] %v3994_v13  ;;  %v1446_v21 = vadd.f32 -0.28449672, %v1382_v28  ;;  %v1383_v15 = vmul.f32 %v3908_v5, %v1319_v1  ;;  %v4008_v38 = vmul.f32 0.70710677, %v3985_v31  ;;  %v1256_v57 = vmul.f32 %v3951_v41, %v1192_v46 }
 0x17a   :  { %v1321_v2 = vadd.f32 1.4214138, %v1257_v37  ;;  %v1194_v49 = vadd.f32 -1.4531521, %v1130_v4  ;;  %v940_v6 = vadd.f32 1.0, %v876_v54  ;;  %v3132_v27 = vpop.eup %3131  ;;  %3139 = vpow2.f32 %v1847_v8 }
 0x17b   :  { %vm682_vm15 = vcmp.ge.f32.partialorder %v3834_v47, 0.0  ;;  %v1131_v19 = vmul.f32 1.0614054, %v3996_v25  ;;  %v4014_v52 = vadd.f32 %v371_v12, %v3515_v10  ;;  %v2021_v28 = vsub.f32 1.0, %v1957_v56  ;;  %v484_v47 = vpop.f32.mrf.mxu1 }
 0x17c   :  { %v1845_v1 = vmul.f32 1.442695, %v1768_v53  ;;  %v1770_v62 = vmul.f32 %v1706_v58, %v3845_v3  ;;  %vm683_vm0 = vcmp.ge.f32.partialorder %v3850_v33, 0.0  ;;  %v1572_v37 = vadd.f32 0.2548296, %v1508_v9 }
 0x17d   :  { %v1510_v4 = vmul.f32 %v3884_v48, %v1446_v21  ;;  %v1447_v46 = vadd.f32 -0.28449672, %v1383_v15  ;;  %v4020_v54 = vand.u32 2147483647, %v4008_v38  ;;  %v1385_v8 = vmul.f32 %v3933_v61, %v1321_v2 }
 0x17e   :  { %v1320_v42 = vadd.f32 1.4214138, %v1256_v57  ;;  %v1258_v12 = vmul.f32 %v3971_v51, %v1194_v49  ;;  %3141 = vrcp.f32 %v940_v6  ;;  %v3134_v14 = vpop.eup %3133  ;;  %v4027_v3 = vsel %vm682_vm15, 1.0, %v5601_v22 }
 0x17f   :  { %v4030_v56 = vmul.f32 0.5, %v3838_v16  ;;  %v1195_v53 = vadd.f32 -1.4531521, %v1131_v19  ;;  %v4033_v58 = vmul.f32 0.70710677, %v4014_v52  ;;  %v2085_v9 = vmul.f32 %v2021_v28, %v3856_v26 }
 0x180   :  { %3143 = vpow2.f32 %v1845_v1  ;;  %v4039_v6 = vsel %vm683_vm0, 1.0, %v5601_v22  ;;  %v1707_v21 = vsub.f32 0.0, %v3871_v24  ;;  %v1574_v2 = vadd.f32 0.2548296, %v1510_v4 }
 0x181   :  { %5622 = vst [vmem:[#allocation21_spill] sm:$0xff] %v4030_v56  ;;  %5623 = vst [vmem:[#allocation16_spill] sm:$0xff] %v4039_v6  ;;  %v4042_v15 = vpop.eup %3135  ;;  %v1511_v16 = vmul.f32 %v3908_v5, %v1447_v46  ;;  %v1849_v57 = vmul.f32 1.442695, %v1770_v62  ;;  %v878_v49 = vmul.f32 0.3275911, %v4020_v54  ;;  %v1636_v19 = vmul.f32 %v3866_v0, %v1572_v37 }
 0x182   :  { %v1449_v26 = vadd.f32 -0.28449672, %v1385_v8  ;;  %v1384_v28 = vmul.f32 %v3951_v41, %v1320_v42  ;;  %v1322_v1 = vadd.f32 1.4214138, %v1258_v12  ;;  %v1259_v33 = vmul.f32 %v3996_v25, %v1195_v53  ;;  %v3067_v37 = vld [vmem:[#allocation8 + $0xd0] sm:$0xff]   ;;  %v373_v53 = vpop.f32.mrf.mxu0 }
 0x183   :  { %v4050_v23 = vmul.f32 0.5, %v3877_v44  ;;  %v4053_v59 = vand.u32 2147483647, %v4033_v58  ;;  %v4056_v4 = vadd.f32 %v484_v47, %v3517_v11  ;;  %v3138_v62 = vpop.eup %3137  ;;  %v2149_v46 = vadd.f32 1.0, %v2085_v9  ;;  %2930 = vmatprep.subr.bf16.mxu1 %v3067_v37 }
 0x184   :  { %v1771_v56 = vmul.f32 %v1707_v21, %v3871_v24  ;;  %v1133_v0 = vmul.f32 1.0614054, %v4042_v15  ;;  %v1709_v42 = vsub.f32 0.0, %v3921_v36  ;;  %v1638_v8 = vmul.f32 %v3884_v48, %v1574_v2 }
 0x185   :  { %5624 = vst [vmem:[#allocation19_spill] sm:$0xff] %v4050_v23  ;;  %v1575_v12 = vadd.f32 0.2548296, %v1511_v16  ;;  %vm685_vm1 = vcmp.ge.f32.partialorder %v3900_v50, 0.0  ;;  %v942_v44 = vadd.f32 1.0, %v878_v49  ;;  %v3066_v23 = vld [vmem:[#allocation8 + $0x10] sm:$0xff]   ;;  %v1956_v13 = vmul.f32 %v3132_v27, %v1636_v19 }
 0x186   :  { %v1513_v47 = vmul.f32 %v3933_v61, %v1449_v26  ;;  %v1448_v6 = vadd.f32 -0.28449672, %v1384_v28  ;;  %v1386_v9 = vmul.f32 %v3971_v51, %v1322_v1  ;;  %3145 = vpow2.f32 %v1849_v57  ;;  %2867 = vmatpush3.bf16.msra.mxu0 %v3066_v23  ;;  %v486_v28 = vpop.f32.mrf.mxu1  ;;  %v377_v23 = vpop.f32.mrf.mxu0 }
 0x187   :  { %v1323_v24 = vadd.f32 1.4214138, %v1259_v33  ;;  %v879_v21 = vmul.f32 0.3275911, %v4053_v59  ;;  %v4067_v39 = vmul.f32 0.70710677, %v4056_v4  ;;  %v3140_v48 = vpop.eup %3139  ;;  %v4070_v2 = vmul.f32 %v2149_v46, %v3791_v43 }
 0x188   :  { %v1197_v16 = vadd.f32 -1.4531521, %v1133_v0  ;;  %v1773_v27 = vmul.f32 %v1709_v42, %v3921_v36  ;;  %v4074_v49 = vadd.f32 %v373_v53, %v3525_v18  ;;  %v1958_v19 = vmul.f32 %v3134_v14, %v1638_v8 }
 0x189   :  { %5625 = vst [vmem:[#allocation29_spill] sm:$0xff] %v4070_v2  ;;  %v1639_v57 = vmul.f32 %v3908_v5, %v1575_v12  ;;  %v1851_v26 = vmul.f32 1.442695, %v1771_v56  ;;  %3147 = vrcp.f32 %v942_v44  ;;  %v2020_v1 = vsub.f32 1.0, %v1956_v13 }
 0x18a   :  { %v1577_v33 = vadd.f32 0.2548296, %v1513_v47  ;;  %v1450_v37 = vadd.f32 -0.28449672, %v1386_v9  ;;  %v4080_v43 = vsel %vm685_vm1, 1.0, %v5601_v22  ;;  %v1512_v36 = vmul.f32 %v3951_v41, %v1448_v6 }
 0x18b   :  { %v4082_v46 = vpop.eup %3141  ;;  %v1387_v14 = vmul.f32 %v3996_v25, %v1323_v24  ;;  %v943_v0 = vadd.f32 1.0, %v879_v21  ;;  %v4087_v5 = vand.u32 2147483647, %v4067_v39  ;;  %v1261_v13 = vmul.f32 %v4042_v15, %v1197_v16  ;;  %v3068_v21 = vld [vmem:[#allocation8 + $0x90] sm:$0xff]  }
 0x18c   :  { %v1855_v56 = vmul.f32 1.442695, %v1773_v27  ;;  %v4091_v42 = vmul.f32 0.70710677, %v4074_v49  ;;  %v4094_v50 = vadd.f32 %v486_v28, %v3527_v20  ;;  %v2022_v12 = vsub.f32 1.0, %v1958_v19  ;;  %2931 = vmatpush3.bf16.msra.mxu1 %v3068_v21 }
 0x18d   :  { %v3144_v8 = vpop.eup %3143  ;;  %v1959_v44 = vmul.f32 %v3138_v62, %v1639_v57  ;;  %3149 = vpow2.f32 %v1851_v26  ;;  %v4097_v6 = vadd.f32 %v377_v23, %v3515_v10  ;;  %v2084_v53 = vmul.f32 %v2020_v1, %v3905_v29 }
 0x18e   :  { %v1641_v47 = vmul.f32 %v3933_v61, %v1577_v33  ;;  %v1514_v9 = vmul.f32 %v3971_v51, %v1450_v37  ;;  %v1132_v24 = vmul.f32 1.0614054, %v4082_v46  ;;  %v1576_v16 = vadd.f32 0.2548296, %v1512_v36 }
 0x18f   :  { %v1451_v27 = vadd.f32 -0.28449672, %v1387_v14  ;;  %3151 = vrcp.f32 %v943_v0  ;;  %v881_v28 = vmul.f32 0.3275911, %v4087_v5  ;;  %v1325_v19 = vadd.f32 1.4214138, %v1261_v13 }
 0x190   :  { %3153 = vpow2.f32 %v1855_v56  ;;  %v4105_v62 = vand.u32 2147483647, %v4091_v42  ;;  %v4108_v57 = vmul.f32 0.70710677, %v4094_v50  ;;  %v2086_v29 = vmul.f32 %v2022_v12, %v3939_v60 }
 0x191   :  { %v2023_v61 = vsub.f32 1.0, %v1959_v44  ;;  %v4112_v26 = vmul.f32 0.5, %v3931_v34  ;;  %v4115_v1 = vmul.f32 0.70710677, %v4097_v6  ;;  %v2148_v33 = vadd.f32 1.0, %v2084_v53 }
 0x192   :  { %v1578_v37 = vadd.f32 0.2548296, %v1514_v9  ;;  %v1196_v23 = vadd.f32 -1.4531521, %v1132_v24  ;;  %v1708_v36 = vsub.f32 0.0, %v3969_v35  ;;  %v1961_v14 = vmul.f32 %v3140_v48, %v1641_v47 }
 0x193   :  { %v1640_v0 = vmul.f32 %v3951_v41, %v1576_v16  ;;  %v1515_v13 = vmul.f32 %v3996_v25, %v1451_v27  ;;  %v945_v56 = vadd.f32 1.0, %v881_v28  ;;  %v3146_v21 = vpop.eup %3145  ;;  %v1389_v60 = vmul.f32 %v4042_v15, %v1325_v19 }
 0x194   :  { %v4122_v34 = vmul.f32 0.5, %v3985_v31  ;;  %v880_v12 = vmul.f32 0.3275911, %v4105_v62  ;;  %v4126_v44 = vand.u32 2147483647, %v4108_v57  ;;  %v2150_v53 = vadd.f32 1.0, %v2086_v29 }
 0x195   :  { %v2087_v9 = vmul.f32 %v2023_v61, %v3959_v7  ;;  %vm684_vm2 = vcmp.ge.f32.partialorder %v3949_v63, 0.0  ;;  %v4131_v41 = vand.u32 2147483647, %v4115_v1  ;;  %v4136_v47 = vmul.f32 %v2148_v33, %v3897_v30  ;;  %v490_v7 = vpop.f32.mrf.mxu1 }
 0x196   :  { %v4133_v48 = vpop.eup %3147  ;;  %v1642_v31 = vmul.f32 %v3971_v51, %v1578_v37  ;;  %v1260_v24 = vmul.f32 %v4082_v46, %v1196_v23  ;;  %v1772_v16 = vmul.f32 %v1708_v36, %v3969_v35  ;;  %v2025_v27 = vsub.f32 1.0, %v1961_v14  ;;  %v379_v14 = vpop.f32.mrf.mxu0 }
 0x197   :  { %5626 = vst [vmem:[#allocation30_spill] sm:$0xff] %v4136_v47  ;;  %v1960_v28 = vmul.f32 %v3144_v8, %v1640_v0  ;;  %v1579_v19 = vadd.f32 0.2548296, %v1515_v13  ;;  %3155 = vrcp.f32 %v945_v56  ;;  %v1453_v63 = vadd.f32 -0.28449672, %v1389_v60 }
 0x198   :  { %v4142_v29 = vsel %vm684_vm2, 1.0, %v5601_v22  ;;  %v944_v61 = vadd.f32 1.0, %v880_v12  ;;  %v882_v2 = vmul.f32 0.3275911, %v4126_v44  ;;  %v4146_v30 = vmul.f32 %v2150_v53, %v3918_v32 }
 0x199   :  { %v2151_v51 = vadd.f32 1.0, %v2087_v9  ;;  %v1134_v33 = vmul.f32 1.0614054, %v4133_v48  ;;  %v883_v35 = vmul.f32 0.3275911, %v4131_v41  ;;  %v1962_v8 = vmul.f32 %v3146_v21, %v1642_v31 }
 0x19a   :  { %5627 = vst [vmem:[#allocation31_spill] sm:$0xff] %v4146_v30  ;;  %v3150_v37 = vpop.eup %3149  ;;  %v1324_v23 = vadd.f32 1.4214138, %v1260_v24  ;;  %vm686_vm3 = vcmp.ge.f32.partialorder %v4008_v38, 0.0  ;;  %v4152_v36 = vadd.f32 %v490_v7, %v3517_v11  ;;  %v2089_v0 = vmul.f32 %v2025_v27, %v3977_v40 }
 0x19b   :  { %v2024_v13 = vsub.f32 1.0, %v1960_v28  ;;  %v1643_v32 = vmul.f32 %v3996_v25, %v1579_v19  ;;  %v1853_v56 = vmul.f32 1.442695, %v1772_v16  ;;  %v1517_v12 = vmul.f32 %v4042_v15, %v1453_v63 }
 0x19c   :  { %v4156_v60 = vpop.eup %3151  ;;  %v1710_v53 = vsub.f32 0.0, %v4020_v54  ;;  %3157 = vrcp.f32 %v944_v61  ;;  %v946_v21 = vadd.f32 1.0, %v882_v2  ;;  %v4161_v38 = vsel %vm686_vm3, 1.0, %v5601_v22 }
 0x19d   :  { %v3154_v9 = vpop.eup %3153  ;;  %v1198_v31 = vadd.f32 -1.4531521, %v1134_v33  ;;  %v947_v24 = vadd.f32 1.0, %v883_v35  ;;  %v4164_v40 = vadd.f32 %v379_v14, %v3525_v18  ;;  %v4167_v25 = vmul.f32 %v2151_v51, %v3942_v45 }
 0x19e   :  { %v2026_v16 = vsub.f32 1.0, %v1962_v8  ;;  %v1388_v27 = vmul.f32 %v4082_v46, %v1324_v23  ;;  %v4171_v28 = vmul.f32 0.70710677, %v4152_v36  ;;  %v2088_v2 = vmul.f32 %v2024_v13, %v4001_v17  ;;  %v492_v13 = vpop.f32.mrf.mxu1 }
 0x19f   :  { %5628 = vst [vmem:[#allocation32_spill] sm:$0xff] %v4167_v25  ;;  %v1963_v19 = vmul.f32 %v3150_v37, %v1643_v32  ;;  %3159 = vpow2.f32 %v1853_v56  ;;  %v1135_v7 = vmul.f32 1.0614054, %v4156_v60  ;;  %v2153_v63 = vadd.f32 1.0, %v2089_v0 }
 0x1a0   :  { %v1581_v61 = vadd.f32 0.2548296, %v1517_v12  ;;  %v1774_v33 = vmul.f32 %v1710_v53, %v4020_v54  ;;  %3161 = vrcp.f32 %v946_v21  ;;  %v1262_v45 = vmul.f32 %v4133_v48, %v1198_v31 }
 0x1a1   :  { %v1711_v51 = vsub.f32 0.0, %v4053_v59  ;;  %3163 = vrcp.f32 %v947_v24  ;;  %v4179_v35 = vmul.f32 0.70710677, %v4164_v40  ;;  %v2090_v8 = vmul.f32 %v2026_v16, %v4027_v3 }
 0x1a2   :  { %v1452_v17 = vadd.f32 -0.28449672, %v1388_v27  ;;  %vm687_vm4 = vcmp.ge.f32.partialorder %v4033_v58, 0.0  ;;  %v4184_v37 = vand.u32 2147483647, %v4171_v28  ;;  %v2152_v23 = vadd.f32 1.0, %v2088_v2 }
 0x1a3   :  { %v2027_v14 = vsub.f32 1.0, %v1963_v19  ;;  %v4187_v54 = vmul.f32 0.5, %v4014_v52  ;;  %v1199_v0 = vadd.f32 -1.4531521, %v1135_v7  ;;  %v4192_v56 = vmul.f32 %v2153_v63, %v3965_v55  ;;  %v5632_v19 = vld [vmem:[#allocation16_spill] sm:$0xff] }
 0x1a4   :  { %v4189_v32 = vpop.eup %3155  ;;  %v1645_v3 = vmul.f32 %v4042_v15, %v1581_v61  ;;  %v1857_v12 = vmul.f32 1.442695, %v1774_v33  ;;  %v1713_v58 = vsub.f32 0.0, %v4087_v5  ;;  %v1326_v53 = vadd.f32 1.4214138, %v1262_v45  ;;  %v5630_v15 = vld [vmem:[#allocation15_spill] sm:$0xff] }
 0x1a5   :  { %5629 = vst [vmem:[#allocation33_spill] sm:$0xff] %v4192_v56  ;;  %v4197_v21 = vsel %vm687_vm4, 1.0, %v5601_v22  ;;  %v1775_v31 = vmul.f32 %v1711_v51, %v4053_v59  ;;  %v4201_v52 = vand.u32 2147483647, %v4179_v35  ;;  %v2154_v24 = vadd.f32 1.0, %v2090_v8 }
 0x1a6   :  { %v1516_v16 = vmul.f32 %v4082_v46, %v1452_v17  ;;  %v885_v55 = vmul.f32 0.3275911, %v4184_v37  ;;  %v4206_v27 = vadd.f32 %v492_v13, %v3527_v20  ;;  %v4209_v2 = vmul.f32 %v2152_v23, %v5630_v15 }
 0x1a7   :  { %v2091_v7 = vmul.f32 %v2027_v14, %v5632_v19  ;;  %v1263_v63 = vmul.f32 %v4156_v60, %v1199_v0  ;;  %v1137_v59 = vmul.f32 1.0614054, %v4189_v32  ;;  %v1965_v61 = vmul.f32 %v3154_v9, %v1645_v3  ;;  %v5633_v14 = vld [vmem:[#allocation22_spill] sm:$0xff] }
 0x1a8   :  { %5631 = vst [vmem:[#allocation15_spill] sm:$0xff] %v4209_v2  ;;  %3165 = vpow2.f32 %v1857_v12  ;;  %vm689_vm5 = vcmp.ge.f32.partialorder %v4067_v39, 0.0  ;;  %v1777_v33 = vmul.f32 %v1713_v58, %v4087_v5  ;;  %v1390_v51 = vmul.f32 %v4133_v48, %v1326_v53  ;;  %v3069_v39 = vld [vmem:[#allocation8 + $0x48] sm:$0xff]  }
 0x1a9   :  { %v4216_v45 = vpop.eup %3157  ;;  %v1859_v8 = vmul.f32 1.442695, %v1775_v31  ;;  %v4220_v17 = vmul.f32 0.5, %v4056_v4  ;;  %v884_v23 = vmul.f32 0.3275911, %v4201_v52  ;;  %v4224_v0 = vmul.f32 %v2154_v24, %v5633_v14  ;;  %v381_v31 = vpop.f32.mrf.mxu0  ;;  %2868 = vmatprep.subr.bf16.mxu0 %v3069_v39 }
 0x1aa   :  { %v1580_v13 = vadd.f32 0.2548296, %v1516_v16  ;;  %v949_v9 = vadd.f32 1.0, %v885_v55  ;;  %v4227_v3 = vmul.f32 0.70710677, %v4206_v27  ;;  %v2155_v5 = vadd.f32 1.0, %v2091_v7 }
 0x1ab   :  { %5634 = vst [vmem:[#allocation16_spill] sm:$0xff] %v4224_v0  ;;  %v1327_v12 = vadd.f32 1.4214138, %v1263_v63  ;;  %v4230_v58 = vsel %vm689_vm5, 1.0, %v5601_v22  ;;  %v1201_v53 = vadd.f32 -1.4531521, %v1137_v59  ;;  %3167 = vpow2.f32 %v1859_v8 }
 0x1ac   :  { %v3160_v4 = vpop.eup %3159  ;;  %v2029_v15 = vsub.f32 1.0, %v1965_v61  ;;  %v1863_v19 = vmul.f32 1.442695, %v1777_v33  ;;  %v4233_v56 = vmul.f32 0.5, %v4074_v49  ;;  %v1136_v24 = vmul.f32 1.0614054, %v4216_v45 }
 0x1ad   :  { %v4236_v16 = vpop.eup %3161  ;;  %v1454_v55 = vadd.f32 -0.28449672, %v1390_v51  ;;  %vm688_vm6 = vcmp.ge.f32.partialorder %v4091_v42, 0.0  ;;  %v948_v7 = vadd.f32 1.0, %v884_v23  ;;  %v1644_v59 = vmul.f32 %v4082_v46, %v1580_v13  ;;  %v5635_v33 = vld [vmem:[#allocation21_spill] sm:$0xff] }
 0x1ae   :  { %v4239_v63 = vpop.eup %3163  ;;  %3169 = vrcp.f32 %v949_v9  ;;  %v4243_v61 = vand.u32 2147483647, %v4227_v3  ;;  %v4246_v49 = vadd.f32 %v381_v31, %v3515_v10  ;;  %v4249_v14 = vmul.f32 %v2155_v5, %v5635_v33 }
 0x1af   :  { %v1391_v51 = vmul.f32 %v4156_v60, %v1327_v12  ;;  %v1265_v8 = vmul.f32 %v4189_v32, %v1201_v53  ;;  %v1712_v23 = vsub.f32 0.0, %v4105_v62  ;;  %v2093_v39 = vmul.f32 %v2029_v15, %v4080_v43 }
 0x1b0   :  { %5636 = vst [vmem:[#allocation22_spill] sm:$0xff] %v4249_v14  ;;  %3171 = vpow2.f32 %v1863_v19  ;;  %v1200_v46 = vadd.f32 -1.4531521, %v1136_v24  ;;  %v1138_v13 = vmul.f32 1.0614054, %v4236_v16  ;;  %v1518_v9 = vmul.f32 %v4133_v48, %v1454_v55 }
 0x1b1   :  { %v4260_v31 = vsel %vm688_vm6, 1.0, %v5601_v22  ;;  %v1139_v5 = vmul.f32 1.0614054, %v4239_v63  ;;  %3173 = vrcp.f32 %v948_v7  ;;  %v1964_v12 = vmul.f32 %v3160_v4, %v1644_v59  ;;  %v494_v7 = vpop.f32.mrf.mxu1 }
 0x1b2   :  { %v1714_v53 = vsub.f32 0.0, %v4126_v44  ;;  %v886_v33 = vmul.f32 0.3275911, %v4243_v61  ;;  %v4266_v43 = vmul.f32 0.70710677, %v4246_v49  ;;  %v1776_v24 = vmul.f32 %v1712_v23, %v4105_v62 }
 0x1b3   :  { %v1455_v15 = vadd.f32 -0.28449672, %v1391_v51  ;;  %v1329_v19 = vadd.f32 1.4214138, %v1265_v8  ;;  %v4270_v55 = vmul.f32 0.5, %v4094_v50  ;;  %v2157_v42 = vadd.f32 1.0, %v2093_v39 }
 0x1b4   :  { %v1264_v14 = vmul.f32 %v4216_v45, %v1200_v46  ;;  %v1202_v25 = vadd.f32 -1.4531521, %v1138_v13  ;;  %v4274_v4 = vmul.f32 0.5, %v4097_v6  ;;  %v1582_v0 = vadd.f32 0.2548296, %v1518_v9  ;;  %v3071_v39 = vld [vmem:[#allocation8 + $0xc8] sm:$0xff]  }
 0x1b5   :  { %v3166_v59 = vpop.eup %3165  ;;  %vm690_vm7 = vcmp.ge.f32.partialorder %v4108_v57, 0.0  ;;  %v1203_v30 = vadd.f32 -1.4531521, %v1139_v5  ;;  %v1715_v51 = vsub.f32 0.0, %v4131_v41  ;;  %v2028_v8 = vsub.f32 1.0, %v1964_v12  ;;  %v3070_v57 = vld [vmem:[#allocation8 + $0x8] sm:$0xff]   ;;  %2932 = vmatprep.subr.bf16.mxu1 %v3071_v39 }
 0x1b6   :  { %v1778_v62 = vmul.f32 %v1714_v53, %v4126_v44  ;;  %v950_v50 = vadd.f32 1.0, %v886_v33  ;;  %v4280_v23 = vand.u32 2147483647, %v4266_v43  ;;  %v1519_v46 = vmul.f32 %v4156_v60, %v1455_v15  ;;  %v5637_v5 = vld [vmem:[#allocation19_spill] sm:$0xff]  ;;  %2869 = vmatpush3.bf16.msra.mxu0 %v3070_v57 }
 0x1b7   :  { %v1393_v6 = vmul.f32 %v4189_v32, %v1329_v19  ;;  %v1861_v13 = vmul.f32 1.442695, %v1776_v24  ;;  %v4285_v9 = vadd.f32 %v494_v7, %v3517_v11  ;;  %v4288_v2 = vmul.f32 %v2157_v42, %v5637_v5  ;;  %v383_v24 = vpop.f32.mrf.mxu0 }
 0x1b8   :  { %v1328_v12 = vadd.f32 1.4214138, %v1264_v14  ;;  %v4291_v44 = vsel %vm690_vm7, 1.0, %v5601_v22  ;;  %v1266_v53 = vmul.f32 %v4236_v16, %v1202_v25  ;;  %v1646_v33 = vmul.f32 %v4133_v48, %v1582_v0  ;;  %v3168_v7 = vpop.eup %3167 }
 0x1b9   :  { %5638 = vst [vmem:[#allocation21_spill] sm:$0xff] %v4288_v2  ;;  %vm691_vm8 = vcmp.ge.f32.partialorder %v4115_v1, 0.0  ;;  %v1267_v15 = vmul.f32 %v4239_v63, %v1203_v30  ;;  %v1779_v19 = vmul.f32 %v1715_v51, %v4131_v41  ;;  %v2092_v42 = vmul.f32 %v2028_v8, %v4142_v29 }
 0x1ba   :  { %v1865_v14 = vmul.f32 1.442695, %v1778_v62  ;;  %3175 = vrcp.f32 %v950_v50  ;;  %v887_v5 = vmul.f32 0.3275911, %v4280_v23  ;;  %v1583_v25 = vadd.f32 0.2548296, %v1519_v46 }
 0x1bb   :  { %v4300_v2 = vpop.eup %3169  ;;  %v1457_v39 = vadd.f32 -0.28449672, %v1393_v6  ;;  %3177 = vpow2.f32 %v1861_v13  ;;  %v4303_v48 = vmul.f32 0.70710677, %v4285_v9  ;;  %v1392_v30 = vmul.f32 %v4216_v45, %v1328_v12 }
 0x1bc   :  { %v1330_v41 = vadd.f32 1.4214138, %v1266_v53  ;;  %v4309_v0 = vsel %vm691_vm8, 1.0, %v5601_v22  ;;  %v4312_v29 = vadd.f32 %v383_v24, %v3525_v18  ;;  %v1966_v8 = vmul.f32 %v3166_v59, %v1646_v33 }
 0x1bd   :  { %v4314_v51 = vpop.eup %3171  ;;  %v1331_v62 = vadd.f32 1.4214138, %v1267_v15  ;;  %v1867_v50 = vmul.f32 1.442695, %v1779_v19  ;;  %v4317_v46 = vmul.f32 0.5, %v4152_v36  ;;  %v2156_v13 = vadd.f32 1.0, %v2092_v42 }
 0x1be   :  { %v4319_v6 = vpop.eup %3173  ;;  %v1141_v57 = vmul.f32 1.0614054, %v4300_v2  ;;  %v1717_v1 = vsub.f32 0.0, %v4184_v37  ;;  %v951_v12 = vadd.f32 1.0, %v887_v5  ;;  %v1647_v53 = vmul.f32 %v4156_v60, %v1583_v25  ;;  %v496_v5 = vpop.f32.mrf.mxu1 }
 0x1bf   :  { %v1521_v24 = vmul.f32 %v4189_v32, %v1457_v39  ;;  %3179 = vpow2.f32 %v1865_v14  ;;  %v4326_v59 = vand.u32 2147483647, %v4303_v48  ;;  %v1456_v33 = vadd.f32 -0.28449672, %v1392_v30 }
 0x1c0   :  { %v1394_v36 = vmul.f32 %v4236_v16, %v1330_v41  ;;  %vm693_vm9 = vcmp.ge.f32.partialorder %v4171_v28, 0.0  ;;  %v4331_v15 = vmul.f32 0.70710677, %v4312_v29  ;;  %v2030_v19 = vsub.f32 1.0, %v1966_v8 }
 0x1c1   :  { %v1395_v42 = vmul.f32 %v4239_v63, %v1331_v62  ;;  %3181 = vpow2.f32 %v1867_v50  ;;  %v1140_v60 = vmul.f32 1.0614054, %v4319_v6  ;;  %v4336_v14 = vmul.f32 %v2156_v13, %v4112_v26  ;;  %v3072_v13 = vld [vmem:[#allocation8 + $0x88] sm:$0xff]  }
 0x1c2   :  { %v1205_v25 = vadd.f32 -1.4531521, %v1141_v57  ;;  %v1781_v39 = vmul.f32 %v1717_v1, %v4184_v37  ;;  %3183 = vrcp.f32 %v951_v12  ;;  %v1967_v30 = vmul.f32 %v3168_v7, %v1647_v53  ;;  %2933 = vmatpush3.bf16.msra.mxu1 %v3072_v13 }
 0x1c3   :  { %5639 = vst [vmem:[#allocation19_spill] sm:$0xff] %v4336_v14  ;;  %v1585_v41 = vadd.f32 0.2548296, %v1521_v24  ;;  %v4340_v28 = vsel %vm693_vm9, 1.0, %v5601_v22  ;;  %v889_v8 = vmul.f32 0.3275911, %v4326_v59  ;;  %v1520_v62 = vmul.f32 %v4216_v45, %v1456_v33 }
 0x1c4   :  { %v1458_v50 = vadd.f32 -0.28449672, %v1394_v36  ;;  %v4345_v47 = vand.u32 2147483647, %v4331_v15  ;;  %v4348_v26 = vadd.f32 %v496_v5, %v3527_v20  ;;  %v2094_v37 = vmul.f32 %v2030_v19, %v4161_v38  ;;  %v387_v19 = vpop.f32.mrf.mxu0 }
 0x1c5   :  { %v1459_v57 = vadd.f32 -0.28449672, %v1395_v42  ;;  %v1204_v7 = vadd.f32 -1.4531521, %v1140_v60  ;;  %v1716_v1 = vsub.f32 0.0, %v4201_v52  ;;  %v1269_v12 = vmul.f32 %v4300_v2, %v1205_v25 }
 0x1c6   :  { %v1871_v53 = vmul.f32 1.442695, %v1781_v39  ;;  %v4354_v24 = vmul.f32 0.5, %v4164_v40  ;;  %v4357_v33 = vmul.f32 0.5, %v4206_v27  ;;  %v2031_v5 = vsub.f32 1.0, %v1967_v30 }
 0x1c7   :  { %v4359_v36 = vpop.eup %3175  ;;  %v1649_v14 = vmul.f32 %v4189_v32, %v1585_v41  ;;  %vm692_vm10 = vcmp.ge.f32.partialorder %v4179_v35, 0.0  ;;  %v953_v38 = vadd.f32 1.0, %v889_v8  ;;  %v1584_v60 = vadd.f32 0.2548296, %v1520_v62 }
 0x1c8   :  { %5640 = vst [vmem:[#allocation34_spill] sm:$0xff] %v4354_v24  ;;  %5641 = vst [vmem:[#allocation35_spill] sm:$0xff] %v4357_v33  ;;  %v3178_v42 = vpop.eup %3177  ;;  %v1522_v25 = vmul.f32 %v4236_v16, %v1458_v50  ;;  %v888_v40 = vmul.f32 0.3275911, %v4345_v47  ;;  %v4366_v39 = vmul.f32 0.70710677, %v4348_v26  ;;  %v1523_v13 = vmul.f32 %v4239_v63, %v1459_v57 }
 0x1c9   :  { %v2158_v27 = vadd.f32 1.0, %v2094_v37  ;;  %v1268_v30 = vmul.f32 %v4319_v6, %v1204_v7  ;;  %v1780_v32 = vmul.f32 %v1716_v1, %v4201_v52  ;;  %v1333_v41 = vadd.f32 1.4214138, %v1269_v12 }
 0x1ca   :  { %3185 = vpow2.f32 %v1871_v53  ;;  %v1142_v8 = vmul.f32 1.0614054, %v4359_v36  ;;  %v4373_v62 = vadd.f32 %v387_v19, %v3515_v10  ;;  %v2095_v50 = vmul.f32 %v2031_v5, %v4197_v21  ;;  %v500_v53 = vpop.f32.mrf.mxu1 }
 0x1cb   :  { %v1969_v33 = vmul.f32 %v4314_v51, %v1649_v14  ;;  %v4380_v37 = vsel %vm692_vm10, 1.0, %v5601_v22  ;;  %3187 = vrcp.f32 %v953_v38  ;;  %v1648_v52 = vmul.f32 %v4216_v45, %v1584_v60 }
 0x1cc   :  { %v3180_v57 = vpop.eup %3179  ;;  %v1586_v7 = vadd.f32 0.2548296, %v1522_v25  ;;  %v952_v1 = vadd.f32 1.0, %v888_v40  ;;  %v4384_v12 = vand.u32 2147483647, %v4366_v39  ;;  %v4387_v19 = vmul.f32 %v2158_v27, %v4122_v34 }
 0x1cd   :  { %v1587_v21 = vadd.f32 0.2548296, %v1523_v13  ;;  %v1332_v51 = vadd.f32 1.4214138, %v1268_v30  ;;  %v1869_v14 = vmul.f32 1.442695, %v1780_v32  ;;  %v1397_v35 = vmul.f32 %v4300_v2, %v1333_v41 }
 0x1ce   :  { %5642 = vst [vmem:[#allocation36_spill] sm:$0xff] %v4387_v19  ;;  %v3182_v5 = vpop.eup %3181  ;;  %vm694_vm11 = vcmp.ge.f32.partialorder %v4227_v3, 0.0  ;;  %v1206_v38 = vadd.f32 -1.4531521, %v1142_v8  ;;  %v4392_v45 = vmul.f32 0.70710677, %v4373_v62  ;;  %v4398_v34 = vadd.f32 %v500_v53, %v3517_v11 }
 0x1cf   :  { %v4394_v60 = vpop.eup %3183  ;;  %v2159_v25 = vadd.f32 1.0, %v2095_v50  ;;  %v2033_v40 = vsub.f32 1.0, %v1969_v33  ;;  %v1718_v24 = vsub.f32 0.0, %v4243_v61  ;;  %v1968_v27 = vmul.f32 %v3178_v42, %v1648_v52 }
 0x1d0   :  { %v1650_v13 = vmul.f32 %v4236_v16, %v1586_v7  ;;  %3189 = vrcp.f32 %v952_v1  ;;  %v890_v30 = vmul.f32 0.3275911, %v4384_v12  ;;  %v1651_v3 = vmul.f32 %v4239_v63, %v1587_v21 }
 0x1d1   :  { %v1396_v32 = vmul.f32 %v4319_v6, %v1332_v51  ;;  %3191 = vpow2.f32 %v1869_v14  ;;  %v4405_v41 = vsel %vm694_vm11, 1.0, %v5601_v22  ;;  %v1461_v33 = vadd.f32 -0.28449672, %v1397_v35  ;;  %v389_v14 = vpop.f32.mrf.mxu0 }
 0x1d2   :  { %v1270_v8 = vmul.f32 %v4359_v36, %v1206_v38  ;;  %v1143_v50 = vmul.f32 1.0614054, %v4394_v60  ;;  %v4410_v42 = vand.u32 2147483647, %v4392_v45  ;;  %v4413_v16 = vmul.f32 %v2159_v25, %v4187_v54  ;;  %v502_v25 = vpop.f32.mrf.mxu1 }
 0x1d3   :  { %v2097_v52 = vmul.f32 %v2033_v40, %v4230_v58  ;;  %v1782_v63 = vmul.f32 %v1718_v24, %v4243_v61  ;;  %v4418_v7 = vmul.f32 0.70710677, %v4398_v34  ;;  %v2032_v1 = vsub.f32 1.0, %v1968_v27 }
 0x1d4   :  { %5643 = vst [vmem:[#allocation37_spill] sm:$0xff] %v4413_v16  ;;  %v1970_v53 = vmul.f32 %v3180_v57, %v1650_v13  ;;  %v1719_v21 = vsub.f32 0.0, %v4280_v23  ;;  %v954_v51 = vadd.f32 1.0, %v890_v30  ;;  %v1971_v35 = vmul.f32 %v3182_v5, %v1651_v3 }
 0x1d5   :  { %v1460_v38 = vadd.f32 -0.28449672, %v1396_v32  ;;  %v4422_v19 = vmul.f32 0.5, %v4246_v49  ;;  %vm695_vm12 = vcmp.ge.f32.partialorder %v4266_v43, 0.0  ;;  %v1525_v54 = vmul.f32 %v4300_v2, %v1461_v33 }
 0x1d6   :  { %v1334_v58 = vadd.f32 1.4214138, %v1270_v8  ;;  %v1207_v61 = vadd.f32 -1.4531521, %v1143_v50  ;;  %v891_v24 = vmul.f32 0.3275911, %v4410_v42  ;;  %v4431_v5 = vadd.f32 %v389_v14, %v3525_v18 }
 0x1d7   :  { %5644 = vst [vmem:[#allocation38_spill] sm:$0xff] %v4422_v19  ;;  %v3186_v40 = vpop.eup %3185  ;;  %v2161_v57 = vadd.f32 1.0, %v2097_v52  ;;  %v1873_v27 = vmul.f32 1.442695, %v1782_v63  ;;  %v4428_v13 = vand.u32 2147483647, %v4418_v7  ;;  %v2096_v30 = vmul.f32 %v2032_v1, %v4260_v31 }
 0x1d8   :  { %v4433_v49 = vpop.eup %3187  ;;  %v2034_v3 = vsub.f32 1.0, %v1970_v53  ;;  %v1783_v32 = vmul.f32 %v1719_v21, %v4280_v23  ;;  %3193 = vrcp.f32 %v954_v51  ;;  %v2035_v33 = vsub.f32 1.0, %v1971_v35 }
 0x1d9   :  { %v1524_v8 = vmul.f32 %v4319_v6, %v1460_v38  ;;  %v4441_v50 = vsel %vm695_vm12, 1.0, %v5601_v22  ;;  %v4444_v52 = vadd.f32 %v502_v25, %v3527_v20  ;;  %v1589_v63 = vadd.f32 0.2548296, %v1525_v54  ;;  %v3073_v54 = vld [vmem:[#allocation8 + $0x40] sm:$0xff]  }
 0x1da   :  { %v1398_v14 = vmul.f32 %v4359_v36, %v1334_v58  ;;  %v1271_v31 = vmul.f32 %v4394_v60, %v1207_v61  ;;  %v955_v1 = vadd.f32 1.0, %v891_v24  ;;  %3195 = vpow2.f32 %v1873_v27  ;;  %2870 = vmatprep.subr.bf16.mxu0 %v3073_v54 }
 0x1db   :  { %v1145_v23 = vmul.f32 1.0614054, %v4433_v49  ;;  %v893_v53 = vmul.f32 0.3275911, %v4428_v13  ;;  %v4451_v21 = vmul.f32 0.70710677, %v4431_v5  ;;  %v4454_v43 = vmul.f32 %v2161_v57, %v4220_v17 }
 0x1dc   :  { %v2160_v51 = vadd.f32 1.0, %v2096_v30  ;;  %v2098_v35 = vmul.f32 %v2034_v3, %v4291_v44  ;;  %v1875_v38 = vmul.f32 1.442695, %v1783_v32  ;;  %v2099_v61 = vmul.f32 %v2035_v33, %v4309_v0 }
 0x1dd   :  { %5645 = vst [vmem:[#allocation39_spill] sm:$0xff] %v4454_v43  ;;  %v4457_v58 = vpop.eup %3189  ;;  %v1588_v24 = vadd.f32 0.2548296, %v1524_v8  ;;  %v1721_v25 = vsub.f32 0.0, %v4326_v59  ;;  %v4462_v27 = vmul.f32 0.70710677, %v4444_v52  ;;  %v1653_v19 = vmul.f32 %v4300_v2, %v1589_v63 }
 0x1de   :  { %v3192_v16 = vpop.eup %3191  ;;  %v1462_v17 = vadd.f32 -0.28449672, %v1398_v14  ;;  %v1335_v57 = vadd.f32 1.4214138, %v1271_v31  ;;  %3197 = vrcp.f32 %v955_v1  ;;  %v4466_v44 = vmul.f32 0.5, %v4285_v9  ;;  %v391_v14 = vpop.f32.mrf.mxu0 }
 0x1df   :  { %v1209_v30 = vadd.f32 -1.4531521, %v1145_v23  ;;  %v957_v3 = vadd.f32 1.0, %v893_v53  ;;  %v4469_v0 = vand.u32 2147483647, %v4451_v21  ;;  %v4472_v32 = vmul.f32 %v2160_v51, %v4233_v56 }
 0x1e0   :  { %vm697_vm13 = vcmp.ge.f32.partialorder %v4303_v48, 0.0  ;;  %v1144_v33 = vmul.f32 1.0614054, %v4457_v58  ;;  %v4477_v2 = vand.u32 2147483647, %v4462_v27  ;;  %v2162_v8 = vadd.f32 1.0, %v2098_v35 }
 0x1e1   :  { %5646 = vst [vmem:[#allocation40_spill] sm:$0xff] %v4472_v32  ;;  %v1652_v63 = vmul.f32 %v4319_v6, %v1588_v24  ;;  %3199 = vpow2.f32 %v1875_v38  ;;  %v1785_v9 = vmul.f32 %v1721_v25, %v4326_v59  ;;  %v2163_v31 = vadd.f32 1.0, %v2099_v61 }
 0x1e2   :  { %v1973_v1 = vmul.f32 %v3186_v40, %v1653_v19  ;;  %v1526_v23 = vmul.f32 %v4359_v36, %v1462_v17  ;;  %vm696_vm14 = vcmp.ge.f32.partialorder %v4331_v15, 0.0  ;;  %v1399_v56 = vmul.f32 %v4394_v60, %v1335_v57 }
 0x1e3   :  { %v1273_v53 = vmul.f32 %v4433_v49, %v1209_v30  ;;  %3201 = vrcp.f32 %v957_v3  ;;  %v892_v51 = vmul.f32 0.3275911, %v4469_v0  ;;  %v4489_v6 = vsel %vm697_vm13, 1.0, %v5601_v22  ;;  %v3075_v30 = vld [vmem:[#allocation8 + $0xc0] sm:$0xff]  }
 0x1e4   :  { %v1208_v59 = vadd.f32 -1.4531521, %v1144_v33  ;;  %v894_v35 = vmul.f32 0.3275911, %v4477_v2  ;;  %v4493_v19 = vadd.f32 %v391_v14, %v3515_v10  ;;  %v1972_v38 = vmul.f32 %v3192_v16, %v1652_v63  ;;  %v3074_v63 = vld [vmem:[#allocation8] sm:$0xff]   ;;  %2934 = vmatprep.subr.bf16.mxu1 %v3075_v30 }
 0x1e5   :  { %v4495_v40 = vpop.eup %3193  ;;  %v1879_v54 = vmul.f32 1.442695, %v1785_v9  ;;  %v4498_v61 = vmul.f32 0.5, %v4312_v29  ;;  %v1720_v24 = vsub.f32 0.0, %v4345_v47  ;;  %v4502_v25 = vmul.f32 %v2162_v8, %v4270_v55  ;;  %2871 = vmatpush3.bf16.msra.mxu0 %v3074_v63 }
 0x1e6   :  { %v2037_v48 = vsub.f32 1.0, %v1973_v1  ;;  %v1590_v17 = vadd.f32 0.2548296, %v1526_v23  ;;  %v4507_v57 = vsel %vm696_vm14, 1.0, %v5601_v22  ;;  %v4510_v3 = vmul.f32 %v2163_v31, %v4274_v4 }
 0x1e7   :  { %5647 = vst [vmem:[#allocation41_spill] sm:$0xff] %v4502_v25  ;;  %v1463_v16 = vadd.f32 -0.28449672, %v1399_v56  ;;  %v1337_v33 = vadd.f32 1.4214138, %v1273_v53  ;;  %v956_v29 = vadd.f32 1.0, %v892_v51  ;;  %v3196_v9 = vpop.eup %3195  ;;  %v1272_v14 = vmul.f32 %v4457_v58, %v1208_v59  ;;  %v504_v51 = vpop.f32.mrf.mxu1 }
 0x1e8   :  { %5648 = vst [vmem:[#allocation42_spill] sm:$0xff] %v4510_v3  ;;  %v1146_v55 = vmul.f32 1.0614054, %v4495_v40  ;;  %v958_v8 = vadd.f32 1.0, %v894_v35  ;;  %v4515_v1 = vmul.f32 0.70710677, %v4493_v19  ;;  %3203 = vpow2.f32 %v1879_v54 }
 0x1e9   :  { %v2036_v15 = vsub.f32 1.0, %v1972_v38  ;;  %v1784_v23 = vmul.f32 %v1720_v24, %v4345_v47  ;;  %v4519_v4 = vmul.f32 0.5, %v4348_v26  ;;  %v2101_v31 = vmul.f32 %v2037_v48, %v4340_v28 }
 0x1ea   :  { %v1654_v56 = vmul.f32 %v4359_v36, %v1590_v17  ;;  %vm698_vm15 = vcmp.ge.f32.partialorder %v4366_v39, 0.0  ;;  %v1722_v53 = vsub.f32 0.0, %v4384_v12  ;;  %v1527_v35 = vmul.f32 %v4394_v60, %v1463_v16 }
 0x1eb   :  { %v4525_v59 = vpop.eup %3197  ;;  %v1401_v38 = vmul.f32 %v4433_v49, %v1337_v33  ;;  %v1723_v47 = vsub.f32 0.0, %v4410_v42  ;;  %3205 = vrcp.f32 %v956_v29  ;;  %v1336_v26 = vadd.f32 1.4214138, %v1272_v14  ;;  %v393_v14 = vpop.f32.mrf.mxu0 }
 0x1ec   :  { %v1210_v54 = vadd.f32 -1.4531521, %v1146_v55  ;;  %3207 = vrcp.f32 %v958_v8  ;;  %v4531_v28 = vand.u32 2147483647, %v4515_v1  ;;  %v2100_v36 = vmul.f32 %v2036_v15, %v4380_v37 }
 0x1ed   :  { %v1877_v24 = vmul.f32 1.442695, %v1784_v23  ;;  %v4535_v48 = vmul.f32 0.5, %v4373_v62  ;;  %v4538_v17 = vadd.f32 %v504_v51, %v3517_v11  ;;  %v2165_v16 = vadd.f32 1.0, %v2101_v31  ;;  %v397_v32 = vpop.f32.mrf.mxu0 }
 0x1ee   :  { %v3200_v30 = vpop.eup %3199  ;;  %v1974_v33 = vmul.f32 %v3196_v9, %v1654_v56  ;;  %v1786_v29 = vmul.f32 %v1722_v53, %v4384_v12  ;;  %v1147_v63 = vmul.f32 1.0614054, %v4525_v59  ;;  %v1591_v55 = vadd.f32 0.2548296, %v1527_v35 }
 0x1ef   :  { %5649 = vst [vmem:[#allocation43_spill] sm:$0xff] %v4535_v48  ;;  %v4545_v37 = vsel %vm698_vm15, 1.0, %v5601_v22  ;;  %vm699_vm0 = vcmp.ge.f32.partialorder %v4392_v45, 0.0  ;;  %v1787_v62 = vmul.f32 %v1723_v47, %v4410_v42  ;;  %v1465_v15 = vadd.f32 -0.28449672, %v1401_v38 }
 0x1f0   :  { %v4549_v8 = vpop.eup %3201  ;;  %v1400_v9 = vmul.f32 %v4457_v58, %v1336_v26  ;;  %v1274_v12 = vmul.f32 %v4495_v40, %v1210_v54  ;;  %v895_v23 = vmul.f32 0.3275911, %v4531_v28  ;;  %v2164_v31 = vadd.f32 1.0, %v2100_v36 }
 0x1f1   :  { %3209 = vpow2.f32 %v1877_v24  ;;  %v4555_v56 = vmul.f32 0.70710677, %v4538_v17  ;;  %v4558_v39 = vadd.f32 %v393_v14, %v3525_v18  ;;  %v4561_v53 = vmul.f32 %v2165_v16, %v4317_v46  ;;  %v506_v46 = vpop.f32.mrf.mxu1  ;;  %v5651_v16 = vld [vmem:[#allocation34_spill] sm:$0xff] }
 0x1f2   :  { %v2038_v42 = vsub.f32 1.0, %v1974_v33  ;;  %v1881_v51 = vmul.f32 1.442695, %v1786_v29  ;;  %v1211_v35 = vadd.f32 -1.4531521, %v1147_v63  ;;  %v1655_v38 = vmul.f32 %v4394_v60, %v1591_v55  ;;  %v3076_v63 = vld [vmem:[#allocation8 + $0x80] sm:$0xff]  }
 0x1f3   :  { %5650 = vst [vmem:[#allocation44_spill] sm:$0xff] %v4561_v53  ;;  %v4567_v47 = vsel %vm699_vm0, 1.0, %v5601_v22  ;;  %v1883_v26 = vmul.f32 1.442695, %v1787_v62  ;;  %v1149_v54 = vmul.f32 1.0614054, %v4549_v8  ;;  %v1529_v36 = vmul.f32 %v4433_v49, %v1465_v15  ;;  %2935 = vmatpush3.bf16.msra.mxu1 %v3076_v63 }
 0x1f4   :  { %v1464_v24 = vadd.f32 -0.28449672, %v1400_v9  ;;  %v1338_v14 = vadd.f32 1.4214138, %v1274_v12  ;;  %v959_v3 = vadd.f32 1.0, %v895_v23  ;;  %v4572_v33 = vmul.f32 %v2164_v31, %v5651_v16 }
 0x1f5   :  { %v4575_v29 = vmul.f32 0.5, %v4398_v34  ;;  %v4578_v60 = vand.u32 2147483647, %v4555_v56  ;;  %v4581_v45 = vmul.f32 0.70710677, %v4558_v39  ;;  %v3204_v55 = vpop.eup %3203  ;;  %v2102_v62 = vmul.f32 %v2038_v42, %v4405_v41 }
 0x1f6   :  { %5652 = vst [vmem:[#allocation34_spill] sm:$0xff] %v4572_v33  ;;  %3211 = vpow2.f32 %v1881_v51  ;;  %v1275_v15 = vmul.f32 %v4525_v59, %v1211_v35  ;;  %v4586_v9 = vmul.f32 0.5, %v4431_v5  ;;  %vm701_vm1 = vcmp.ge.f32.partialorder %v4418_v7, 0.0 }
 0x1f7   :  { %5653 = vst [vmem:[#allocation45_spill] sm:$0xff] %v4575_v29  ;;  %v1213_v34 = vadd.f32 -1.4531521, %v1149_v54  ;;  %v1725_v12 = vsub.f32 0.0, %v4428_v13  ;;  %v4591_v23 = vadd.f32 %v506_v46, %v3527_v20  ;;  %v1975_v16 = vmul.f32 %v3200_v30, %v1655_v38 }
 0x1f8   :  { %5654 = vst [vmem:[#allocation46_spill] sm:$0xff] %v4586_v9  ;;  %v4593_v31 = vpop.eup %3205  ;;  %v1593_v53 = vadd.f32 0.2548296, %v1529_v36  ;;  %v1402_v41 = vmul.f32 %v4495_v40, %v1338_v14  ;;  %3213 = vrcp.f32 %v959_v3  ;;  %v1528_v5 = vmul.f32 %v4457_v58, %v1464_v24 }
 0x1f9   :  { %5655 = vst [vmem:[#allocation47_spill] sm:$0xff] %v4591_v23  ;;  %v4596_v42 = vpop.eup %3207  ;;  %3215 = vpow2.f32 %v1883_v26  ;;  %v897_v51 = vmul.f32 0.3275911, %v4578_v60  ;;  %v4601_v35 = vand.u32 2147483647, %v4581_v45  ;;  %v2166_v54 = vadd.f32 1.0, %v2102_v62 }
 0x1fa   :  { %v1339_v46 = vadd.f32 1.4214138, %v1275_v15  ;;  %vm700_vm2 = vcmp.ge.f32.partialorder %v4451_v21, 0.0  ;;  %v1724_v30 = vsub.f32 0.0, %v4469_v0  ;;  %v1277_v38 = vmul.f32 %v4549_v8, %v1213_v34 }
 0x1fb   :  { %v1789_v3 = vmul.f32 %v1725_v12, %v4428_v13  ;;  %v1148_v36 = vmul.f32 1.0614054, %v4593_v31  ;;  %v4609_v24 = vmul.f32 0.70710677, %v4591_v23  ;;  %v2039_v26 = vsub.f32 1.0, %v1975_v16 }
 0x1fc   :  { %v1657_v14 = vmul.f32 %v4433_v49, %v1593_v53  ;;  %v1466_v63 = vadd.f32 -0.28449672, %v1402_v41  ;;  %v1150_v62 = vmul.f32 1.0614054, %v4596_v42  ;;  %v1592_v15 = vadd.f32 0.2548296, %v1528_v5 }
 0x1fd   :  { %v4616_v43 = vsel %vm701_vm1, 1.0, %v5601_v22  ;;  %v961_v34 = vadd.f32 1.0, %v897_v51  ;;  %v896_v13 = vmul.f32 0.3275911, %v4601_v35  ;;  %v1403_v33 = vmul.f32 %v4525_v59, %v1339_v46  ;;  %v5657_v41 = vld [vmem:[#allocation35_spill] sm:$0xff] }
 0x1fe   :  { %v3210_v12 = vpop.eup %3209  ;;  %v4623_v16 = vsel %vm700_vm2, 1.0, %v5601_v22  ;;  %v1788_v49 = vmul.f32 %v1724_v30, %v4469_v0  ;;  %v4627_v53 = vand.u32 2147483647, %v4609_v24  ;;  %v4630_v7 = vmul.f32 %v2166_v54, %v5657_v41 }
 0x1ff   :  { %5656 = vst [vmem:[#allocation48_spill] sm:$0xff] %v4623_v16  ;;  %v1341_v5 = vadd.f32 1.4214138, %v1277_v38  ;;  %v1887_v51 = vmul.f32 1.442695, %v1789_v3  ;;  %v2103_v9 = vmul.f32 %v2039_v26, %v4441_v50  ;;  %v1977_v46 = vmul.f32 %v3204_v55, %v1657_v14  ;;  %v510_v14 = vpop.f32.mrf.mxu1 }
 0x200   :  { %5658 = vst [vmem:[#allocation35_spill] sm:$0xff] %v4630_v7  ;;  %v1212_v25 = vadd.f32 -1.4531521, %v1148_v36  ;;  %v1530_v29 = vmul.f32 %v4495_v40, %v1466_v63  ;;  %v1214_v21 = vadd.f32 -1.4531521, %v1150_v62  ;;  %v1656_v16 = vmul.f32 %v4457_v58, %v1592_v15 }
 0x201   :  { %v1726_v0 = vsub.f32 0.0, %v4477_v2  ;;  %3217 = vrcp.f32 %v961_v34  ;;  %v960_v30 = vadd.f32 1.0, %v896_v13  ;;  %v1467_v23 = vadd.f32 -0.28449672, %v1403_v33 }
 0x202   :  { %v1885_v48 = vmul.f32 1.442695, %v1788_v49  ;;  %v898_v54 = vmul.f32 0.3275911, %v4627_v53  ;;  %v4638_v38 = vadd.f32 %v397_v32, %v3515_v10  ;;  %v1405_v50 = vmul.f32 %v4549_v8, %v1341_v5 }
 0x203   :  { %v3212_v3 = vpop.eup %3211  ;;  %3219 = vpow2.f32 %v1887_v51  ;;  %v1276_v55 = vmul.f32 %v4593_v31, %v1212_v25  ;;  %v4643_v36 = vmul.f32 0.5, %v4444_v52  ;;  %v2167_v58 = vadd.f32 1.0, %v2103_v9 }
 0x204   :  { %v1594_v26 = vadd.f32 0.2548296, %v1530_v29  ;;  %vm702_vm3 = vcmp.ge.f32.partialorder %v4462_v27, 0.0  ;;  %v1278_v33 = vmul.f32 %v4596_v42, %v1214_v21  ;;  %v2041_v32 = vsub.f32 1.0, %v1977_v46  ;;  %v399_v21 = vpop.f32.mrf.mxu0 }
 0x205   :  { %v4647_v63 = vpop.eup %3213  ;;  %v1976_v62 = vmul.f32 %v3210_v12, %v1656_v16  ;;  %v1790_v15 = vmul.f32 %v1726_v0, %v4477_v2  ;;  %3221 = vrcp.f32 %v960_v30  ;;  %v1531_v25 = vmul.f32 %v4525_v59, %v1467_v23  ;;  %v5659_v12 = vld [vmem:[#allocation38_spill] sm:$0xff] }
 0x206   :  { %v3216_v34 = vpop.eup %3215  ;;  %3223 = vpow2.f32 %v1885_v48  ;;  %v962_v52 = vadd.f32 1.0, %v898_v54  ;;  %v4652_v9 = vmul.f32 0.70710677, %v4638_v38  ;;  %v1469_v29 = vadd.f32 -0.28449672, %v1405_v50 }
 0x207   :  { %v1340_v27 = vadd.f32 1.4214138, %v1276_v55  ;;  %v4655_v13 = vsel %vm702_vm3, 1.0, %v5601_v22  ;;  %v4658_v49 = vadd.f32 %v510_v14, %v3517_v11  ;;  %v4661_v16 = vmul.f32 %v2167_v58, %v5659_v12 }
 0x208   :  { %v1658_v2 = vmul.f32 %v4495_v40, %v1594_v26  ;;  %v1342_v41 = vadd.f32 1.4214138, %v1278_v33  ;;  %v1151_v48 = vmul.f32 1.0614054, %v4647_v63  ;;  %v2105_v23 = vmul.f32 %v2041_v32, %v4489_v6 }
 0x209   :  { %5660 = vst [vmem:[#allocation38_spill] sm:$0xff] %v4661_v16  ;;  %v2040_v5 = vsub.f32 1.0, %v1976_v62  ;;  %v1889_v51 = vmul.f32 1.442695, %v1790_v15  ;;  %v4667_v46 = vmul.f32 0.5, %v4493_v19  ;;  %vm703_vm4 = vcmp.ge.f32.partialorder %v4515_v1, 0.0 }
 0x20a   :  { %v1595_v0 = vadd.f32 0.2548296, %v1531_v25  ;;  %3225 = vrcp.f32 %v962_v52  ;;  %v4671_v30 = vand.u32 2147483647, %v4652_v9  ;;  %v1533_v40 = vmul.f32 %v4549_v8, %v1469_v29 }
 0x20b   :  { %v1404_v54 = vmul.f32 %v4593_v31, %v1340_v27  ;;  %v1727_v50 = vsub.f32 0.0, %v4531_v28  ;;  %v4677_v6 = vmul.f32 0.70710677, %v4658_v49  ;;  %v1978_v55 = vmul.f32 %v3212_v3, %v1658_v2  ;;  %v512_v27 = vpop.f32.mrf.mxu1 }
 0x20c   :  { %v1406_v19 = vmul.f32 %v4596_v42, %v1342_v41  ;;  %v1215_v58 = vadd.f32 -1.4531521, %v1151_v48  ;;  %v4681_v26 = vadd.f32 %v399_v21, %v3525_v18  ;;  %v2169_v1 = vadd.f32 1.0, %v2105_v23 }
 0x20d   :  { %v2104_v33 = vmul.f32 %v2040_v5, %v4507_v57  ;;  %v4685_v14 = vsel %vm703_vm4, 1.0, %v5601_v22  ;;  %v4688_v32 = vmul.f32 0.5, %v4538_v17  ;;  %v1659_v15 = vmul.f32 %v4525_v59, %v1595_v0 }
 0x20e   :  { %v4690_v62 = vpop.eup %3217  ;;  %3227 = vpow2.f32 %v1889_v51  ;;  %vm705_vm5 = vcmp.ge.f32.partialorder %v4555_v56, 0.0  ;;  %v899_v3 = vmul.f32 0.3275911, %v4671_v30  ;;  %v1597_v25 = vadd.f32 0.2548296, %v1533_v40 }
 0x20f   :  { %v1468_v52 = vadd.f32 -0.28449672, %v1404_v54  ;;  %v1791_v29 = vmul.f32 %v1727_v50, %v4531_v28  ;;  %v4697_v57 = vand.u32 2147483647, %v4677_v6  ;;  %v2042_v17 = vsub.f32 1.0, %v1978_v55 }
 0x210   :  { %v3220_v12 = vpop.eup %3219  ;;  %v1470_v2 = vadd.f32 -0.28449672, %v1406_v19  ;;  %v1279_v41 = vmul.f32 %v4647_v63, %v1215_v58  ;;  %v4701_v59 = vmul.f32 0.70710677, %v4681_v26  ;;  %v4704_v48 = vmul.f32 %v2169_v1, %v4466_v44 }
 0x211   :  { %v2168_v23 = vadd.f32 1.0, %v2104_v33  ;;  %v1153_v5 = vmul.f32 1.0614054, %v4690_v62  ;;  %v1729_v28 = vsub.f32 0.0, %v4578_v60  ;;  %v1979_v21 = vmul.f32 %v3216_v34, %v1659_v15 }
 0x212   :  { %5661 = vst [vmem:[#allocation49_spill] sm:$0xff] %v4704_v48  ;;  %v4708_v51 = vpop.eup %3221  ;;  %v4713_v0 = vsel %vm705_vm5, 1.0, %v5601_v22  ;;  %v963_v40 = vadd.f32 1.0, %v899_v3  ;;  %v4716_v54 = vadd.f32 %v512_v27, %v3527_v20  ;;  %v1661_v44 = vmul.f32 %v4549_v8, %v1597_v25 }
 0x213   :  { %v3224_v50 = vpop.eup %3223  ;;  %v1532_v55 = vmul.f32 %v4593_v31, %v1468_v52  ;;  %v901_v19 = vmul.f32 0.3275911, %v4697_v57  ;;  %v4722_v58 = vand.u32 2147483647, %v4701_v59  ;;  %v2106_v34 = vmul.f32 %v2042_v17, %v4545_v37  ;;  %v401_v37 = vpop.f32.mrf.mxu0 }
 0x214   :  { %v1534_v56 = vmul.f32 %v4596_v42, %v1470_v2  ;;  %v1343_v1 = vadd.f32 1.4214138, %v1279_v41  ;;  %v1891_v33 = vmul.f32 1.442695, %v1791_v29  ;;  %v4727_v15 = vmul.f32 %v2168_v23, %v4498_v61 }
 0x215   :  { %v1217_v3 = vadd.f32 -1.4531521, %v1153_v5  ;;  %v1793_v27 = vmul.f32 %v1729_v28, %v4578_v60  ;;  %v1152_v8 = vmul.f32 1.0614054, %v4708_v51  ;;  %v2043_v25 = vsub.f32 1.0, %v1979_v21 }
 0x216   :  { %5662 = vst [vmem:[#allocation50_spill] sm:$0xff] %v4727_v15  ;;  %v4732_v52 = vmul.f32 0.5, %v4558_v39  ;;  %3229 = vrcp.f32 %v963_v40  ;;  %v4735_v48 = vmul.f32 0.70710677, %v4716_v54  ;;  %v1981_v29 = vmul.f32 %v3220_v12, %v1661_v44 }
 0x217   :  { %v4737_v17 = vpop.eup %3225  ;;  %v1596_v2 = vadd.f32 0.2548296, %v1532_v55  ;;  %v965_v61 = vadd.f32 1.0, %v901_v19  ;;  %v900_v41 = vmul.f32 0.3275911, %v4722_v58  ;;  %v2170_v23 = vadd.f32 1.0, %v2106_v34 }
 0x218   :  { %v1598_v60 = vadd.f32 0.2548296, %v1534_v56  ;;  %v1407_v5 = vmul.f32 %v4647_v63, %v1343_v1  ;;  %3231 = vpow2.f32 %v1891_v33  ;;  %v1281_v39 = vmul.f32 %v4690_v62, %v1217_v3 }
 0x219   :  { %v1895_v28 = vmul.f32 1.442695, %v1793_v27  ;;  %v1216_v21 = vadd.f32 -1.4531521, %v1152_v8  ;;  %v4743_v40 = vadd.f32 %v401_v37, %v3515_v10  ;;  %v2107_v16 = vmul.f32 %v2043_v25, %v4567_v47  ;;  %v514_v37 = vpop.f32.mrf.mxu1 }
 0x21a   :  { %v1728_v12 = vsub.f32 0.0, %v4601_v35  ;;  %v1154_v44 = vmul.f32 1.0614054, %v4737_v17  ;;  %v4749_v55 = vand.u32 2147483647, %v4735_v48  ;;  %v2045_v34 = vsub.f32 1.0, %v1981_v29 }
 0x21b   :  { %v3228_v19 = vpop.eup %3227  ;;  %v1660_v56 = vmul.f32 %v4593_v31, %v1596_v2  ;;  %3233 = vrcp.f32 %v965_v61  ;;  %v964_v1 = vadd.f32 1.0, %v900_v41  ;;  %v4753_v33 = vmul.f32 %v2170_v23, %v4519_v4 }
 0x21c   :  { %v1662_v3 = vmul.f32 %v4596_v42, %v1598_v60  ;;  %v1471_v27 = vadd.f32 -0.28449672, %v1407_v5  ;;  %vm704_vm6 = vcmp.ge.f32.partialorder %v4581_v45, 0.0  ;;  %v1345_v47 = vadd.f32 1.4214138, %v1281_v39  ;;  %v5664_v39 = vld [vmem:[#allocation43_spill] sm:$0xff] }
 0x21d   :  { %5663 = vst [vmem:[#allocation51_spill] sm:$0xff] %v4753_v33  ;;  %3235 = vpow2.f32 %v1895_v28  ;;  %v1280_v8 = vmul.f32 %v4708_v51, %v1216_v21  ;;  %v4759_v25 = vmul.f32 0.70710677, %v4743_v40  ;;  %v2171_v29 = vadd.f32 1.0, %v2107_v16  ;;  %v5666_v21 = vld [vmem:[#allocation47_spill] sm:$0xff] }
 0x21e   :  { %v1792_v31 = vmul.f32 %v1728_v12, %v4601_v35  ;;  %v1218_v2 = vadd.f32 -1.4531521, %v1154_v44  ;;  %v902_v4 = vmul.f32 0.3275911, %v4749_v55  ;;  %v2109_v61 = vmul.f32 %v2045_v34, %v4616_v43 }
 0x21f   :  { %v1980_v42 = vmul.f32 %v3224_v50, %v1660_v56  ;;  %vm706_vm7 = vcmp.ge.f32.partialorder %v4609_v24, 0.0  ;;  %3237 = vrcp.f32 %v964_v1  ;;  %v1982_v41 = vmul.f32 %v3228_v19, %v1662_v3 }
 0x220   :  { %v1535_v23 = vmul.f32 %v4647_v63, %v1471_v27  ;;  %v1730_v60 = vsub.f32 0.0, %v4627_v53  ;;  %v4768_v5 = vadd.f32 %v514_v37, %v3517_v11  ;;  %v1409_v16 = vmul.f32 %v4690_v62, %v1345_v47  ;;  %v403_v27 = vpop.f32.mrf.mxu0 }
 0x221   :  { %v4774_v35 = vsel %vm704_vm6, 1.0, %v5601_v22  ;;  %v1344_v43 = vadd.f32 1.4214138, %v1280_v8  ;;  %v4777_v50 = vand.u32 2147483647, %v4759_v25  ;;  %v4780_v28 = vmul.f32 %v2171_v29, %v5664_v39 }
 0x222   :  { %v4783_v12 = vmul.f32 0.5, %v5666_v21  ;;  %v1282_v44 = vmul.f32 %v4737_v17, %v1218_v2  ;;  %v966_v19 = vadd.f32 1.0, %v902_v4  ;;  %v2173_v56 = vadd.f32 1.0, %v2109_v61  ;;  %v5669_v21 = vld [vmem:[#allocation45_spill] sm:$0xff] }
 0x223   :  { %5665 = vst [vmem:[#allocation43_spill] sm:$0xff] %v4780_v28  ;;  %v4786_v34 = vpop.eup %3229  ;;  %v2044_v1 = vsub.f32 1.0, %v1980_v42  ;;  %v1893_v45 = vmul.f32 1.442695, %v1792_v31  ;;  %v4791_v3 = vsel %vm706_vm7, 1.0, %v5601_v22  ;;  %v2046_v47 = vsub.f32 1.0, %v1982_v41 }
 0x224   :  { %v1599_v8 = vadd.f32 0.2548296, %v1535_v23  ;;  %v1794_v37 = vmul.f32 %v1730_v60, %v4627_v53  ;;  %v4795_v29 = vmul.f32 0.70710677, %v4768_v5  ;;  %v1473_v4 = vadd.f32 -0.28449672, %v1409_v16 }
 0x225   :  { %v3232_v2 = vpop.eup %3231  ;;  %v1408_v39 = vmul.f32 %v4708_v51, %v1344_v43  ;;  %v1731_v61 = vsub.f32 0.0, %v4671_v30  ;;  %v903_v31 = vmul.f32 0.3275911, %v4777_v50  ;;  %v1346_v42 = vadd.f32 1.4214138, %v1282_v44  ;;  %v5667_v23 = vld [vmem:[#allocation48_spill] sm:$0xff] }
 0x226   :  { %v1155_v24 = vmul.f32 1.0614054, %v4786_v34  ;;  %3239 = vrcp.f32 %v966_v19  ;;  %v4802_v41 = vadd.f32 %v403_v27, %v3525_v18  ;;  %v2108_v53 = vmul.f32 %v2044_v1, %v5667_v23 }
 0x227   :  { %3241 = vpow2.f32 %v1893_v45  ;;  %v4806_v60 = vmul.f32 0.5, %v4638_v38  ;;  %v4809_v16 = vand.u32 2147483647, %v4795_v29  ;;  %v4814_v28 = vmul.f32 %v2173_v56, %v5669_v21  ;;  %v516_v21 = vpop.f32.mrf.mxu1 }
 0x228   :  { %v4811_v43 = vpop.eup %3233  ;;  %v2110_v44 = vmul.f32 %v2046_v47, %v4655_v13  ;;  %v1663_v19 = vmul.f32 %v4647_v63, %v1599_v8  ;;  %vm707_vm8 = vcmp.ge.f32.partialorder %v4652_v9, 0.0  ;;  %v1537_v1 = vmul.f32 %v4690_v62, %v1473_v4 }
 0x229   :  { %5668 = vst [vmem:[#allocation47_spill] sm:$0xff] %v4806_v60  ;;  %5670 = vst [vmem:[#allocation48_spill] sm:$0xff] %v4814_v28  ;;  %v1897_v45 = vmul.f32 1.442695, %v1794_v37  ;;  %v1795_v38 = vmul.f32 %v1731_v61, %v4671_v30  ;;  %v967_v27 = vadd.f32 1.0, %v903_v31  ;;  %v1410_v7 = vmul.f32 %v4737_v17, %v1346_v42  ;;  %v5671_v60 = vld [vmem:[#allocation46_spill] sm:$0xff] }
 0x22a   :  { %v3236_v23 = vpop.eup %3235  ;;  %v1472_v33 = vadd.f32 -0.28449672, %v1408_v39  ;;  %v1219_v15 = vadd.f32 -1.4531521, %v1155_v24  ;;  %v4823_v56 = vmul.f32 0.70710677, %v4802_v41  ;;  %v1983_v37 = vmul.f32 %v3232_v2, %v1663_v19 }
 0x22b   :  { %v2172_v13 = vadd.f32 1.0, %v2108_v53  ;;  %v4826_v63 = vsel %vm707_vm8, 1.0, %v5601_v22  ;;  %v1157_v9 = vmul.f32 1.0614054, %v4811_v43  ;;  %v905_v47 = vmul.f32 0.3275911, %v4809_v16 }
 0x22c   :  { %v4830_v8 = vpop.eup %3237  ;;  %v2174_v30 = vadd.f32 1.0, %v2110_v44  ;;  %vm709_vm9 = vcmp.ge.f32.partialorder %v4677_v6, 0.0  ;;  %v1733_v4 = vsub.f32 0.0, %v4697_v57  ;;  %v1601_v39 = vadd.f32 0.2548296, %v1537_v1 }
 0x22d   :  { %v1899_v61 = vmul.f32 1.442695, %v1795_v38  ;;  %3243 = vrcp.f32 %v967_v27  ;;  %v4835_v31 = vadd.f32 %v516_v21, %v3527_v20  ;;  %v1536_v42 = vmul.f32 %v4708_v51, %v1472_v33 }
 0x22e   :  { %v1474_v24 = vadd.f32 -0.28449672, %v1410_v7  ;;  %v1283_v53 = vmul.f32 %v4786_v34, %v1219_v15  ;;  %v4840_v28 = vand.u32 2147483647, %v4823_v56  ;;  %3245 = vpow2.f32 %v1897_v45 }
 0x22f   :  { %v1221_v2 = vadd.f32 -1.4531521, %v1157_v9  ;;  %v1156_v44 = vmul.f32 1.0614054, %v4830_v8  ;;  %v969_v19 = vadd.f32 1.0, %v905_v47  ;;  %v4844_v1 = vmul.f32 %v2172_v13, %v5671_v60  ;;  %v407_v60 = vpop.f32.mrf.mxu0 }
 0x230   :  { %v2047_v38 = vsub.f32 1.0, %v1983_v37  ;;  %v4847_v27 = vmul.f32 0.5, %v4658_v49  ;;  %v1797_v33 = vmul.f32 %v1733_v4, %v4697_v57  ;;  %v4851_v7 = vmul.f32 %v2174_v30, %v4643_v36 }
 0x231   :  { %5672 = vst [vmem:[#allocation45_spill] sm:$0xff] %v4844_v1  ;;  %v1665_v15 = vmul.f32 %v4690_v62, %v1601_v39  ;;  %v4857_v45 = vsel %vm709_vm9, 1.0, %v5601_v22  ;;  %v4860_v21 = vmul.f32 0.70710677, %v4835_v31  ;;  %v1600_v13 = vadd.f32 0.2548296, %v1536_v42 }
 0x232   :  { %5673 = vst [vmem:[#allocation46_spill] sm:$0xff] %v4851_v7  ;;  %v1347_v9 = vadd.f32 1.4214138, %v1283_v53  ;;  %3247 = vpow2.f32 %v1899_v61  ;;  %v904_v49 = vmul.f32 0.3275911, %v4840_v28  ;;  %v1538_v36 = vmul.f32 %v4737_v17, %v1474_v24 }
 0x233   :  { %v4863_v57 = vpop.eup %3239  ;;  %v1285_v62 = vmul.f32 %v4811_v43, %v1221_v2  ;;  %v1220_v47 = vadd.f32 -1.4531521, %v1156_v44  ;;  %3249 = vrcp.f32 %v969_v19  ;;  %v2111_v30 = vmul.f32 %v2047_v38, %v4685_v14 }
 0x234   :  { %v3242_v6 = vpop.eup %3241  ;;  %v1903_v37 = vmul.f32 1.442695, %v1797_v33  ;;  %v1732_v4 = vsub.f32 0.0, %v4722_v58  ;;  %v4870_v39 = vadd.f32 %v407_v60, %v3515_v10  ;;  %v1985_v61 = vmul.f32 %v3236_v23, %v1665_v15 }
 0x235   :  { %v4873_v42 = vmul.f32 0.5, %v4681_v26  ;;  %vm708_vm10 = vcmp.ge.f32.partialorder %v4701_v59, 0.0  ;;  %v4877_v24 = vand.u32 2147483647, %v4860_v21  ;;  %v1664_v53 = vmul.f32 %v4708_v51, %v1600_v13 }
 0x236   :  { %v1411_v2 = vmul.f32 %v4786_v34, %v1347_v9  ;;  %v1158_v14 = vmul.f32 1.0614054, %v4863_v57  ;;  %v968_v44 = vadd.f32 1.0, %v904_v49  ;;  %v1602_v19 = vadd.f32 0.2548296, %v1538_v36 }
 0x237   :  { %v1349_v38 = vadd.f32 1.4214138, %v1285_v62  ;;  %v1284_v33 = vmul.f32 %v4830_v8, %v1220_v47  ;;  %v906_v23 = vmul.f32 0.3275911, %v4877_v24  ;;  %v2175_v26 = vadd.f32 1.0, %v2111_v30 }
 0x238   :  { %3251 = vpow2.f32 %v1903_v37  ;;  %v1796_v59 = vmul.f32 %v1732_v4, %v4722_v58  ;;  %v4886_v15 = vmul.f32 0.70710677, %v4870_v39  ;;  %v2049_v60 = vsub.f32 1.0, %v1985_v61 }
 0x239   :  { %v4889_v51 = vsel %vm708_vm10, 1.0, %v5601_v22  ;;  %v4892_v13 = vmul.f32 0.5, %v4716_v54  ;;  %v1734_v9 = vsub.f32 0.0, %v4749_v55  ;;  %v1984_v36 = vmul.f32 %v3242_v6, %v1664_v53 }
 0x23a   :  { %v4895_v49 = vpop.eup %3243  ;;  %v1475_v62 = vadd.f32 -0.28449672, %v1411_v2  ;;  %v1222_v47 = vadd.f32 -1.4531521, %v1158_v14  ;;  %3253 = vrcp.f32 %v968_v44  ;;  %v1666_v58 = vmul.f32 %v4737_v17, %v1602_v19  ;;  %v520_v2 = vpop.f32.mrf.mxu1 }
 0x23b   :  { %5674 = vst [vmem:[#allocation52_spill] sm:$0xff] %v4892_v13  ;;  %v1413_v30 = vmul.f32 %v4811_v43, %v1349_v38  ;;  %v1348_v37 = vadd.f32 1.4214138, %v1284_v33  ;;  %v970_v4 = vadd.f32 1.0, %v906_v23  ;;  %v3246_v61 = vpop.eup %3245  ;;  %v4900_v7 = vmul.f32 %v2175_v26, %v4667_v46 }
 0x23c   :  { %v1901_v54 = vmul.f32 1.442695, %v1796_v59  ;;  %v4903_v1 = vmul.f32 0.5, %v4743_v40  ;;  %v4906_v13 = vand.u32 2147483647, %v4886_v15  ;;  %v2113_v6 = vmul.f32 %v2049_v60, %v4713_v0 }
 0x23d   :  { %5675 = vst [vmem:[#allocation53_spill] sm:$0xff] %v4900_v7  ;;  %vm710_vm11 = vcmp.ge.f32.partialorder %v4735_v48, 0.0  ;;  %v1798_v17 = vmul.f32 %v1734_v9, %v4749_v55  ;;  %v1159_v53 = vmul.f32 1.0614054, %v4895_v49  ;;  %v2048_v14 = vsub.f32 1.0, %v1984_v36  ;;  %v409_v36 = vpop.f32.mrf.mxu0 }
 0x23e   :  { %v1539_v46 = vmul.f32 %v4786_v34, %v1475_v62  ;;  %v1286_v44 = vmul.f32 %v4863_v57, %v1222_v47  ;;  %v1735_v40 = vsub.f32 0.0, %v4777_v50  ;;  %v1986_v38 = vmul.f32 %v3246_v61, %v1666_v58 }
 0x23f   :  { %v3248_v19 = vpop.eup %3247  ;;  %v1477_v33 = vadd.f32 -0.28449672, %v1413_v30  ;;  %v1412_v23 = vmul.f32 %v4830_v8, %v1348_v37  ;;  %3255 = vrcp.f32 %v970_v4  ;;  %v4919_v48 = vsel %vm710_vm11, 1.0, %v5601_v22 }
 0x240   :  { %v4916_v0 = vpop.eup %3249  ;;  %3257 = vpow2.f32 %v1901_v54  ;;  %v907_v55 = vmul.f32 0.3275911, %v4906_v13  ;;  %v4923_v26 = vadd.f32 %v520_v2, %v3517_v11  ;;  %v2177_v59 = vadd.f32 1.0, %v2113_v6 }
 0x241   :  { %v1905_v60 = vmul.f32 1.442695, %v1798_v17  ;;  %vm711_vm12 = vcmp.ge.f32.partialorder %v4759_v25, 0.0  ;;  %v1223_v9 = vadd.f32 -1.4531521, %v1159_v53  ;;  %v2112_v62 = vmul.f32 %v2048_v14, %v4774_v35 }
 0x242   :  { %v1603_v47 = vadd.f32 0.2548296, %v1539_v46  ;;  %v1350_v58 = vadd.f32 1.4214138, %v1286_v44  ;;  %v1799_v30 = vmul.f32 %v1735_v40, %v4777_v50  ;;  %v2050_v37 = vsub.f32 1.0, %v1986_v38  ;;  %v522_v46 = vpop.f32.mrf.mxu1 }
 0x243   :  { %v1541_v4 = vmul.f32 %v4811_v43, %v1477_v33  ;;  %v1476_v61 = vadd.f32 -0.28449672, %v1412_v23  ;;  %v1161_v54 = vmul.f32 1.0614054, %v4916_v0  ;;  %v4931_v2 = vsel %vm711_vm12, 1.0, %v5601_v22 }
 0x244   :  { %v971_v6 = vadd.f32 1.0, %v907_v55  ;;  %v4934_v25 = vmul.f32 0.70710677, %v4923_v26  ;;  %v4937_v17 = vadd.f32 %v409_v36, %v3525_v18  ;;  %v4940_v53 = vmul.f32 %v2177_v59, %v4688_v32 }
 0x245   :  { %v3252_v35 = vpop.eup %3251  ;;  %3259 = vpow2.f32 %v1905_v60  ;;  %v1287_v50 = vmul.f32 %v4895_v49, %v1223_v9  ;;  %v1737_v14 = vsub.f32 0.0, %v4809_v16  ;;  %v2176_v44 = vadd.f32 1.0, %v2112_v62 }
 0x246   :  { %5676 = vst [vmem:[#allocation54_spill] sm:$0xff] %v4940_v53  ;;  %v1667_v40 = vmul.f32 %v4786_v34, %v1603_v47  ;;  %v1414_v38 = vmul.f32 %v4863_v57, %v1350_v58  ;;  %v1907_v33 = vmul.f32 1.442695, %v1799_v30  ;;  %v2114_v55 = vmul.f32 %v2050_v37, %v4791_v3 }
 0x247   :  { %v4946_v23 = vpop.eup %3253  ;;  %v1605_v36 = vadd.f32 0.2548296, %v1541_v4  ;;  %v1540_v32 = vmul.f32 %v4830_v8, %v1476_v61  ;;  %v1225_v59 = vadd.f32 -1.4531521, %v1161_v54  ;;  %3261 = vrcp.f32 %v971_v6 }
 0x248   :  { %v4951_v60 = vand.u32 2147483647, %v4934_v25  ;;  %v4954_v9 = vmul.f32 0.70710677, %v4937_v17  ;;  %v4957_v34 = vadd.f32 %v522_v46, %v3527_v20  ;;  %v1351_v62 = vadd.f32 1.4214138, %v1287_v50 }
 0x249   :  { %v4960_v47 = vmul.f32 0.5, %v4768_v5  ;;  %vm713_vm13 = vcmp.ge.f32.partialorder %v4795_v29, 0.0  ;;  %v1801_v3 = vmul.f32 %v1737_v14, %v4809_v16  ;;  %v4965_v58 = vmul.f32 %v2176_v44, %v4732_v52 }
 0x24a   :  { %v1987_v30 = vmul.f32 %v3248_v19, %v1667_v40  ;;  %v1478_v37 = vadd.f32 -0.28449672, %v1414_v38  ;;  %v1160_v4 = vmul.f32 1.0614054, %v4946_v23  ;;  %v2178_v61 = vadd.f32 1.0, %v2114_v55 }
 0x24b   :  { %5677 = vst [vmem:[#allocation55_spill] sm:$0xff] %v4965_v58  ;;  %v1669_v54 = vmul.f32 %v4811_v43, %v1605_v36  ;;  %v1604_v6 = vadd.f32 0.2548296, %v1540_v32  ;;  %v1289_v50 = vmul.f32 %v4916_v0, %v1225_v59  ;;  %3263 = vpow2.f32 %v1907_v33  ;;  %v411_v32 = vpop.f32.mrf.mxu0 }
 0x24c   :  { %v4970_v46 = vpop.eup %3255  ;;  %v909_v5 = vmul.f32 0.3275911, %v4951_v60  ;;  %v4974_v16 = vand.u32 2147483647, %v4954_v9  ;;  %v4977_v52 = vmul.f32 0.70710677, %v4957_v34  ;;  %v1415_v14 = vmul.f32 %v4895_v49, %v1351_v62 }
 0x24d   :  { %v3258_v19 = vpop.eup %3257  ;;  %v4983_v43 = vsel %vm713_vm13, 1.0, %v5601_v22  ;;  %v1911_v44 = vmul.f32 1.442695, %v1801_v3  ;;  %v4986_v40 = vmul.f32 0.5, %v4802_v41  ;;  %v2051_v38 = vsub.f32 1.0, %v1987_v30 }
 0x24e   :  { %v1542_v33 = vmul.f32 %v4863_v57, %v1478_v37  ;;  %v1224_v55 = vadd.f32 -1.4531521, %v1160_v4  ;;  %v4990_v36 = vand.u32 2147483647, %v4977_v52  ;;  %v1989_v59 = vmul.f32 %v3252_v35, %v1669_v54 }
 0x24f   :  { %5678 = vst [vmem:[#allocation56_spill] sm:$0xff] %v4986_v40  ;;  %v1353_v53 = vadd.f32 1.4214138, %v1289_v50  ;;  %v1736_v62 = vsub.f32 0.0, %v4840_v28  ;;  %v1162_v29 = vmul.f32 1.0614054, %v4970_v46  ;;  %v4995_v7 = vmul.f32 %v2178_v61, %v4783_v12 }
 0x250   :  { %v1668_v41 = vmul.f32 %v4830_v8, %v1604_v6  ;;  %v973_v3 = vadd.f32 1.0, %v909_v5  ;;  %v908_v30 = vmul.f32 0.3275911, %v4974_v16  ;;  %v1479_v37 = vadd.f32 -0.28449672, %v1415_v14 }
 0x251   :  { %5679 = vst [vmem:[#allocation57_spill] sm:$0xff] %v4995_v7  ;;  %vm712_vm14 = vcmp.ge.f32.partialorder %v4823_v56, 0.0  ;;  %v910_v4 = vmul.f32 0.3275911, %v4990_v36  ;;  %v5002_v35 = vadd.f32 %v411_v32, %v3515_v10  ;;  %v2115_v50 = vmul.f32 %v2051_v38, %v4826_v63  ;;  %v524_v56 = vpop.f32.mrf.mxu1 }
 0x252   :  { %v3260_v54 = vpop.eup %3259  ;;  %v1606_v58 = vadd.f32 0.2548296, %v1542_v33  ;;  %3265 = vpow2.f32 %v1911_v44  ;;  %v1288_v12 = vmul.f32 %v4946_v23, %v1224_v55  ;;  %v2053_v61 = vsub.f32 1.0, %v1989_v59 }
 0x253   :  { %v1417_v8 = vmul.f32 %v4916_v0, %v1353_v53  ;;  %v1800_v6 = vmul.f32 %v1736_v62, %v4840_v28  ;;  %v1226_v5 = vadd.f32 -1.4531521, %v1162_v29  ;;  %v1988_v14 = vmul.f32 %v3258_v19, %v1668_v41 }
 0x254   :  { %3267 = vrcp.f32 %v973_v3  ;;  %v972_v7 = vadd.f32 1.0, %v908_v30  ;;  %v5009_v40 = vmul.f32 0.70710677, %v5002_v35  ;;  %v5011_v32 = vpop.eup %3261  ;;  %v1543_v63 = vmul.f32 %v4895_v49, %v1479_v37 }
 0x255   :  { %v5017_v44 = vsel %vm712_vm14, 1.0, %v5601_v22  ;;  %v5020_v53 = vmul.f32 0.5, %v4835_v31  ;;  %v974_v28 = vadd.f32 1.0, %v910_v4  ;;  %v2179_v38 = vadd.f32 1.0, %v2115_v50 }
 0x256   :  { %v1670_v19 = vmul.f32 %v4863_v57, %v1606_v58  ;;  %v1352_v33 = vadd.f32 1.4214138, %v1288_v12  ;;  %v5024_v55 = vand.u32 2147483647, %v5009_v40  ;;  %v1481_v59 = vadd.f32 -0.28449672, %v1417_v8 }
 0x257   :  { %v1909_v62 = vmul.f32 1.442695, %v1800_v6  ;;  %v1290_v29 = vmul.f32 %v4970_v46, %v1226_v5  ;;  %v1738_v41 = vsub.f32 0.0, %v4877_v24  ;;  %v2117_v3 = vmul.f32 %v2053_v61, %v4857_v45  ;;  %v5680_v45 = vld [vmem:[#allocation47_spill] sm:$0xff] }
 0x258   :  { %v2052_v30 = vsub.f32 1.0, %v1988_v14  ;;  %v1163_v31 = vmul.f32 1.0614054, %v5011_v32  ;;  %3269 = vrcp.f32 %v972_v7  ;;  %v3264_v37 = vpop.eup %3263  ;;  %v1607_v4 = vadd.f32 0.2548296, %v1543_v63 }
 0x259   :  { %vm714_vm15 = vcmp.ge.f32.partialorder %v4860_v21, 0.0  ;;  %v1739_v57 = vsub.f32 0.0, %v4906_v13  ;;  %3271 = vrcp.f32 %v974_v28  ;;  %v1990_v58 = vmul.f32 %v3260_v54, %v1670_v19  ;;  %v413_v28 = vpop.f32.mrf.mxu0 }
 0x25a   :  { %v1416_v50 = vmul.f32 %v4946_v23, %v1352_v33  ;;  %v911_v12 = vmul.f32 0.3275911, %v5024_v55  ;;  %v5035_v8 = vadd.f32 %v524_v56, %v3517_v11  ;;  %v5038_v61 = vmul.f32 %v2179_v38, %v5680_v45  ;;  %v526_v45 = vpop.f32.mrf.mxu1 }
 0x25b   :  { %v1545_v7 = vmul.f32 %v4916_v0, %v1481_v59  ;;  %v1354_v6 = vadd.f32 1.4214138, %v1290_v29  ;;  %v1802_v5 = vmul.f32 %v1738_v41, %v4877_v24  ;;  %v2181_v14 = vadd.f32 1.0, %v2117_v3 }
 0x25c   :  { %5681 = vst [vmem:[#allocation47_spill] sm:$0xff] %v5038_v61  ;;  %v2116_v63 = vmul.f32 %v2052_v30, %v4889_v51  ;;  %3273 = vpow2.f32 %v1909_v62  ;;  %v1227_v54 = vadd.f32 -1.4531521, %v1163_v31  ;;  %v1671_v19 = vmul.f32 %v4895_v49, %v1607_v4 }
 0x25d   :  { %v5047_v33 = vsel %vm714_vm15, 1.0, %v5601_v22  ;;  %vm715_vm0 = vcmp.ge.f32.partialorder %v4886_v15, 0.0  ;;  %v1803_v38 = vmul.f32 %v1739_v57, %v4906_v13  ;;  %v2054_v59 = vsub.f32 1.0, %v1990_v58 }
 0x25e   :  { %v1480_v29 = vadd.f32 -0.28449672, %v1416_v50  ;;  %v975_v24 = vadd.f32 1.0, %v911_v12  ;;  %v5052_v41 = vmul.f32 0.70710677, %v5035_v8  ;;  %v1418_v56 = vmul.f32 %v4970_v46, %v1354_v6 }
 0x25f   :  { %v3266_v51 = vpop.eup %3265  ;;  %v1609_v62 = vadd.f32 0.2548296, %v1545_v7  ;;  %v1913_v49 = vmul.f32 1.442695, %v1802_v5  ;;  %v5056_v3 = vadd.f32 %v413_v28, %v3525_v18  ;;  %v5059_v21 = vmul.f32 %v2181_v14, %v4847_v27 }
 0x260   :  { %v2180_v30 = vadd.f32 1.0, %v2116_v63  ;;  %v5062_v13 = vmul.f32 0.5, %v4870_v39  ;;  %v1291_v31 = vmul.f32 %v5011_v32, %v1227_v54  ;;  %v1991_v57 = vmul.f32 %v3264_v37, %v1671_v19 }
 0x261   :  { %5682 = vst [vmem:[#allocation58_spill] sm:$0xff] %v5059_v21  ;;  %v5065_v4 = vpop.eup %3267  ;;  %v5070_v58 = vsel %vm715_vm0, 1.0, %v5601_v22  ;;  %v1915_v50 = vmul.f32 1.442695, %v1803_v38  ;;  %vm717_vm1 = vcmp.ge.f32.partialorder %v4934_v25, 0.0  ;;  %v2118_v27 = vmul.f32 %v2054_v59, %v4919_v48 }
 0x262   :  { %5683 = vst [vmem:[#allocation59_spill] sm:$0xff] %v5062_v13  ;;  %v1544_v12 = vmul.f32 %v4946_v23, %v1480_v29  ;;  %3275 = vrcp.f32 %v975_v24  ;;  %v5076_v39 = vand.u32 2147483647, %v5052_v41  ;;  %v1673_v7 = vmul.f32 %v4916_v0, %v1609_v62 }
 0x263   :  { %v1482_v37 = vadd.f32 -0.28449672, %v1418_v56  ;;  %3277 = vpow2.f32 %v1913_v49  ;;  %v5080_v15 = vmul.f32 0.70710677, %v5056_v3  ;;  %v5083_v6 = vmul.f32 %v2180_v30, %v4873_v42 }
 0x264   :  { %v1355_v5 = vadd.f32 1.4214138, %v1291_v31  ;;  %v5086_v48 = vmul.f32 0.5, %v4923_v26  ;;  %v1165_v14 = vmul.f32 1.0614054, %v5065_v4  ;;  %v2055_v54 = vsub.f32 1.0, %v1991_v57 }
 0x265   :  { %5684 = vst [vmem:[#allocation60_spill] sm:$0xff] %v5083_v6  ;;  %v5089_v63 = vpop.eup %3269  ;;  %3279 = vpow2.f32 %v1915_v50  ;;  %v5094_v0 = vsel %vm717_vm1, 1.0, %v5601_v22  ;;  %v5097_v28 = vadd.f32 %v526_v45, %v3527_v20  ;;  %v2182_v19 = vadd.f32 1.0, %v2118_v27  ;;  %v5686_v27 = vld [vmem:[#allocation52_spill] sm:$0xff] }
 0x266   :  { %5685 = vst [vmem:[#allocation61_spill] sm:$0xff] %v5086_v48  ;;  %v5099_v42 = vpop.eup %3271  ;;  %v1608_v38 = vadd.f32 0.2548296, %v1544_v12  ;;  %v1741_v26 = vsub.f32 0.0, %v4951_v60  ;;  %v913_v59 = vmul.f32 0.3275911, %v5076_v39  ;;  %v1993_v29 = vmul.f32 %v3266_v51, %v1673_v7 }
 0x267   :  { %v1546_v24 = vmul.f32 %v4970_v46, %v1482_v37  ;;  %v5105_v62 = vmul.f32 0.5, %v4937_v17  ;;  %v5108_v25 = vand.u32 2147483647, %v5080_v15  ;;  %v1419_v56 = vmul.f32 %v5011_v32, %v1355_v5 }
 0x268   :  { %v1229_v49 = vadd.f32 -1.4531521, %v1165_v14  ;;  %v1164_v30 = vmul.f32 1.0614054, %v5089_v63  ;;  %v1740_v31 = vsub.f32 0.0, %v4974_v16  ;;  %v2119_v50 = vmul.f32 %v2055_v54, %v4931_v2 }
 0x269   :  { %v3274_v57 = vpop.eup %3273  ;;  %vm716_vm2 = vcmp.ge.f32.partialorder %v4954_v9, 0.0  ;;  %v1166_v51 = vmul.f32 1.0614054, %v5099_v42  ;;  %v5117_v17 = vmul.f32 0.70710677, %v5097_v28  ;;  %v5120_v12 = vmul.f32 %v2182_v19, %v5686_v27  ;;  %v417_v27 = vpop.f32.mrf.mxu0 }
 0x26a   :  { %v1672_v45 = vmul.f32 %v4946_v23, %v1608_v38  ;;  %v1805_v7 = vmul.f32 %v1741_v26, %v4951_v60  ;;  %v977_v37 = vadd.f32 1.0, %v913_v59  ;;  %v2057_v5 = vsub.f32 1.0, %v1993_v29 }
 0x26b   :  { %v1610_v14 = vadd.f32 0.2548296, %v1546_v24  ;;  %v1742_v48 = vsub.f32 0.0, %v4990_v36  ;;  %v912_v2 = vmul.f32 0.3275911, %v5108_v25  ;;  %v1293_v13 = vmul.f32 %v5065_v4, %v1229_v49 }
 0x26c   :  { %v1483_v54 = vadd.f32 -0.28449672, %v1419_v56  ;;  %v1228_v21 = vadd.f32 -1.4531521, %v1164_v30  ;;  %v1804_v61 = vmul.f32 %v1740_v31, %v4974_v16  ;;  %v2183_v6 = vadd.f32 1.0, %v2119_v50 }
 0x26d   :  { %v5131_v23 = vsel %vm716_vm2, 1.0, %v5601_v22  ;;  %v1230_v60 = vadd.f32 -1.4531521, %v1166_v51  ;;  %v5134_v19 = vand.u32 2147483647, %v5117_v17  ;;  %v1992_v38 = vmul.f32 %v3274_v57, %v1672_v45 }
 0x26e   :  { %v1919_v26 = vmul.f32 1.442695, %v1805_v7  ;;  %vm718_vm3 = vcmp.ge.f32.partialorder %v4977_v52, 0.0  ;;  %3281 = vrcp.f32 %v977_v37  ;;  %v2121_v29 = vmul.f32 %v2057_v5, %v4983_v43 }
 0x26f   :  { %v5137_v59 = vpop.eup %3275  ;;  %v1674_v16 = vmul.f32 %v4970_v46, %v1610_v14  ;;  %v1806_v24 = vmul.f32 %v1742_v48, %v4990_v36  ;;  %v976_v9 = vadd.f32 1.0, %v912_v2  ;;  %v1547_v49 = vmul.f32 %v5011_v32, %v1483_v54  ;;  %v419_v14 = vpop.f32.mrf.mxu0 }
 0x270   :  { %v3278_v56 = vpop.eup %3277  ;;  %v1357_v30 = vadd.f32 1.4214138, %v1293_v13  ;;  %v1292_v31 = vmul.f32 %v5089_v63, %v1228_v21  ;;  %v1917_v57 = vmul.f32 1.442695, %v1804_v61  ;;  %v5145_v50 = vmul.f32 %v2183_v6, %v4903_v1 }
 0x271   :  { %v5148_v51 = vmul.f32 0.5, %v4957_v34  ;;  %v1294_v43 = vmul.f32 %v5099_v42, %v1230_v60  ;;  %v914_v46 = vmul.f32 0.3275911, %v5134_v19  ;;  %v2056_v48 = vsub.f32 1.0, %v1992_v38 }
 0x272   :  { %5687 = vst [vmem:[#allocation52_spill] sm:$0xff] %v5145_v50  ;;  %v3280_v36 = vpop.eup %3279  ;;  %3283 = vpow2.f32 %v1919_v26  ;;  %v5155_v13 = vsel %vm718_vm3, 1.0, %v5601_v22  ;;  %v1167_v61 = vmul.f32 1.0614054, %v5137_v59  ;;  %v2185_v1 = vadd.f32 1.0, %v2121_v29  ;;  %v530_v26 = vpop.f32.mrf.mxu1 }
 0x273   :  { %v1994_v21 = vmul.f32 %v3278_v56, %v1674_v16  ;;  %v1921_v6 = vmul.f32 1.442695, %v1806_v24  ;;  %3285 = vrcp.f32 %v976_v9  ;;  %v1611_v34 = vadd.f32 0.2548296, %v1547_v49 }
 0x274   :  { %v1421_v45 = vmul.f32 %v5065_v4, %v1357_v30  ;;  %v1356_v7 = vadd.f32 1.4214138, %v1292_v31  ;;  %3287 = vpow2.f32 %v1917_v57  ;;  %v1358_v37 = vadd.f32 1.4214138, %v1294_v43  ;;  %v532_v43 = vpop.f32.mrf.mxu1 }
 0x275   :  { %v5160_v5 = vmul.f32 0.5, %v5002_v35  ;;  %vm719_vm4 = vcmp.ge.f32.partialorder %v5009_v40, 0.0  ;;  %v978_v52 = vadd.f32 1.0, %v914_v46  ;;  %v2120_v2 = vmul.f32 %v2056_v48, %v5017_v44 }
 0x276   :  { %v1231_v54 = vadd.f32 -1.4531521, %v1167_v61  ;;  %v1743_v60 = vsub.f32 0.0, %v5024_v55  ;;  %v5166_v38 = vadd.f32 %v417_v27, %v3515_v10  ;;  %v5169_v29 = vmul.f32 %v2185_v1, %v4960_v47 }
 0x277   :  { %5688 = vst [vmem:[#allocation62_spill] sm:$0xff] %v5160_v5  ;;  %v2058_v16 = vsub.f32 1.0, %v1994_v21  ;;  %3289 = vpow2.f32 %v1921_v6  ;;  %v5172_v35 = vmul.f32 0.5, %v5035_v8  ;;  %v1675_v24 = vmul.f32 %v5011_v32, %v1611_v34 }
 0x278   :  { %5689 = vst [vmem:[#allocation63_spill] sm:$0xff] %v5166_v38  ;;  %5690 = vst [vmem:[#allocation64_spill] sm:$0xff] %v5169_v29  ;;  %v1485_v9 = vadd.f32 -0.28449672, %v1421_v45  ;;  %v1420_v44 = vmul.f32 %v5089_v63, %v1356_v7  ;;  %v5177_v56 = vadd.f32 %v419_v14, %v3525_v18  ;;  %v1422_v49 = vmul.f32 %v5099_v42, %v1358_v37 }
 0x279   :  { %5691 = vst [vmem:[#allocation65_spill] sm:$0xff] %v5172_v35  ;;  %v5183_v47 = vsel %vm719_vm4, 1.0, %v5601_v22  ;;  %v1745_v30 = vsub.f32 0.0, %v5076_v39  ;;  %3291 = vrcp.f32 %v978_v52  ;;  %v2184_v8 = vadd.f32 1.0, %v2120_v2 }
 0x27a   :  { %v1295_v31 = vmul.f32 %v5137_v59, %v1231_v54  ;;  %v1807_v32 = vmul.f32 %v1743_v60, %v5024_v55  ;;  %v5189_v57 = vmul.f32 0.70710677, %v5166_v38  ;;  %v2122_v27 = vmul.f32 %v2058_v16, %v5047_v33 }
 0x27b   :  { %v5191_v46 = vpop.eup %3281  ;;  %vm721_vm5 = vcmp.ge.f32.partialorder %v5052_v41, 0.0  ;;  %v5196_v40 = vmul.f32 0.5, %v5056_v3  ;;  %v5199_v48 = vadd.f32 %v530_v26, %v3517_v11  ;;  %v1995_v61 = vmul.f32 %v3280_v36, %v1675_v24  ;;  %v5694_v3 = vld [vmem:[#allocation56_spill] sm:$0xff] }
 0x27c   :  { %v1549_v1 = vmul.f32 %v5065_v4, %v1485_v9  ;;  %v1484_v55 = vadd.f32 -0.28449672, %v1420_v44  ;;  %v5203_v21 = vmul.f32 0.70710677, %v5177_v56  ;;  %v1486_v6 = vadd.f32 -0.28449672, %v1422_v49 }
 0x27d   :  { %5692 = vst [vmem:[#allocation66_spill] sm:$0xff] %v5199_v48  ;;  %v1809_v34 = vmul.f32 %v1745_v30, %v5076_v39  ;;  %vm720_vm6 = vcmp.ge.f32.partialorder %v5080_v15, 0.0  ;;  %v5208_v33 = vadd.f32 %v532_v43, %v3527_v20  ;;  %v5211_v45 = vmul.f32 %v2184_v8, %v5694_v3 }
 0x27e   :  { %v1359_v7 = vadd.f32 1.4214138, %v1295_v31  ;;  %v1169_v36 = vmul.f32 1.0614054, %v5191_v46  ;;  %v5215_v37 = vand.u32 2147483647, %v5189_v57  ;;  %v1548_v24 = vmul.f32 %v5089_v63, %v1484_v55  ;;  %v421_v55 = vpop.f32.mrf.mxu0 }
 0x27f   :  { %5693 = vst [vmem:[#allocation67_spill] sm:$0xff] %v5208_v33  ;;  %v3284_v52 = vpop.eup %3283  ;;  %v2186_v14 = vadd.f32 1.0, %v2122_v27  ;;  %v1923_v2 = vmul.f32 1.442695, %v1807_v32  ;;  %v5220_v39 = vsel %vm721_vm5, 1.0, %v5601_v22  ;;  %v2059_v26 = vsub.f32 1.0, %v1995_v61 }
 0x280   :  { %v5223_v54 = vmul.f32 0.70710677, %v5199_v48  ;;  %v5225_v60 = vpop.eup %3285  ;;  %v1613_v16 = vadd.f32 0.2548296, %v1549_v1  ;;  %v5229_v9 = vand.u32 2147483647, %v5203_v21  ;;  %v1550_v49 = vmul.f32 %v5099_v42, %v1486_v6 }
 0x281   :  { %v3288_v44 = vpop.eup %3287  ;;  %v1927_v30 = vmul.f32 1.442695, %v1809_v34  ;;  %v5235_v41 = vsel %vm720_vm6, 1.0, %v5601_v22  ;;  %v5238_v8 = vmul.f32 0.70710677, %v5208_v33  ;;  %v1423_v31 = vmul.f32 %v5137_v59, %v1359_v7 }
 0x282   :  { %v1233_v32 = vadd.f32 -1.4531521, %v1169_v36  ;;  %v915_v43 = vmul.f32 0.3275911, %v5215_v37  ;;  %v916_v27 = vmul.f32 0.3275911, %v5229_v9  ;;  %3293 = vpow2.f32 %v1923_v2 }
 0x283   :  { %v1168_v61 = vmul.f32 1.0614054, %v5225_v60  ;;  %v5245_v1 = vand.u32 2147483647, %v5223_v54  ;;  %v5248_v15 = vand.u32 2147483647, %v5238_v8  ;;  %v1677_v34 = vmul.f32 %v5065_v4, %v1613_v16 }
 0x284   :  { %v3290_v6 = vpop.eup %3289  ;;  %v1612_v3 = vadd.f32 0.2548296, %v1548_v24  ;;  %v1744_v7 = vsub.f32 0.0, %v5108_v25  ;;  %v980_v36 = vadd.f32 1.0, %v916_v27  ;;  %v5253_v48 = vmul.f32 %v2186_v14, %v5020_v53  ;;  %v534_v14 = vpop.f32.mrf.mxu1 }
 0x285   :  { %v2123_v2 = vmul.f32 %v2059_v26, %v5070_v58  ;;  %v1614_v38 = vadd.f32 0.2548296, %v1550_v49  ;;  %v918_v35 = vmul.f32 0.3275911, %v5248_v15  ;;  %v1487_v33 = vadd.f32 -0.28449672, %v1423_v31 }
 0x286   :  { %v5257_v5 = vpop.eup %3291  ;;  %v979_v29 = vadd.f32 1.0, %v915_v43  ;;  %3295 = vrcp.f32 %v980_v36  ;;  %v5260_v50 = vadd.f32 %v421_v55, %v3515_v10  ;;  %v1297_v4 = vmul.f32 %v5191_v46, %v1233_v32 }
 0x287   :  { %v1232_v16 = vadd.f32 -1.4531521, %v1168_v61  ;;  %v917_v24 = vmul.f32 0.3275911, %v5245_v1  ;;  %v982_v53 = vadd.f32 1.0, %v918_v35  ;;  %v1997_v27 = vmul.f32 %v3284_v52, %v1677_v34 }
 0x288   :  { %5695 = vst [vmem:[#allocation56_spill] sm:$0xff] %v5260_v50  ;;  %v1676_v58 = vmul.f32 %v5089_v63, %v1612_v3  ;;  %3297 = vpow2.f32 %v1927_v30  ;;  %v1808_v26 = vmul.f32 %v1744_v7, %v5108_v25  ;;  %v1678_v49 = vmul.f32 %v5099_v42, %v1614_v38  ;;  %v5697_v30 = vld [vmem:[#allocation25_spill] sm:$0xff] }
 0x289   :  { %v1170_v31 = vmul.f32 1.0614054, %v5257_v5  ;;  %v1746_v10 = vsub.f32 0.0, %v5134_v19  ;;  %3299 = vrcp.f32 %v982_v53  ;;  %v1551_v32 = vmul.f32 %v5137_v59, %v1487_v33  ;;  %v5698_v42 = vld [vmem:[#allocation17_spill] sm:$0xff] }
 0x28a   :  { %3301 = vrcp.f32 %v979_v29  ;;  %v5271_v43 = vmul.f32 0.70710677, %v5260_v50  ;;  %v5274_v35 = vadd.f32 %v534_v14, %v3517_v11  ;;  %v1361_v63 = vadd.f32 1.4214138, %v1297_v4  ;;  %v5714_v50 = vld [vmem:[#allocation31_spill] sm:$0xff] }
 0x28b   :  { %v1296_v52 = vmul.f32 %v5225_v60, %v1232_v16  ;;  %v981_v25 = vadd.f32 1.0, %v917_v24  ;;  %v2268_v38 = vpack.c.bf16 %v5698_v42, %v5697_v30  ;;  %v5279_v61 = vadd.f32 1.0, %v2123_v2  ;;  %v5701_v16 = vld [vmem:[#allocation23_spill] sm:$0xff] }
 0x28c   :  { %5696 = vst [vmem:[#allocation68_spill] sm:$0xff] %v5274_v35  ;;  %v1996_v55 = vmul.f32 %v3288_v44, %v1676_v58  ;;  %v5282_v34 = vmul.f32 0.5, %v5097_v28  ;;  %vm722_vm7 = vcmp.ge.f32.partialorder %v5117_v17, 0.0  ;;  %v2061_v29 = vsub.f32 1.0, %v1997_v27  ;;  %v5700_v44 = vld [vmem:[#allocation27_spill] sm:$0xff] }
 0x28d   :  { %5699 = vst [vmem:[#allocation25_spill] sm:$0xff] %v5279_v61  ;;  %v1234_v33 = vadd.f32 -1.4531521, %v1170_v31  ;;  %v1810_v11 = vmul.f32 %v1746_v10, %v5134_v19  ;;  %v5287_v3 = vand.u32 2147483647, %v5271_v43  ;;  %2594 = vmatprep.mubr.bf16.mxu0 %v2268_v38  ;;  %v1998_v7 = vmul.f32 %v3290_v6, %v1678_v49 }
 0x28e   :  { %v1615_v36 = vadd.f32 0.2548296, %v1551_v32  ;;  %v1925_v4 = vmul.f32 1.442695, %v1808_v26  ;;  %v5290_v2 = vmul.f32 0.70710677, %v5274_v35  ;;  %v5702_v28 = vpack.c.bf16 %v5700_v44, %v5701_v16  ;;  %v536_v16 = vpop.f32.mrf.mxu1 }
 0x28f   :  { %v1425_v24 = vmul.f32 %v5191_v46, %v1361_v63  ;;  %v1360_v53 = vadd.f32 1.4214138, %v1296_v52  ;;  %3303 = vrcp.f32 %v981_v25  ;;  %v919_v19 = vmul.f32 0.3275911, %v5287_v3  ;;  %v3294_v14 = vpop.eup %3293  ;;  %v5704_v44 = vld [vmem:[#allocation26_spill] sm:$0xff] }
 0x290   :  { %2595 = vmatmul.mubr.bf16.vlgmr.msra.gmra.mxu0 %v5702_v28  ;;  %v2060_v27 = vsub.f32 1.0, %v1996_v55  ;;  %v5300_v6 = vsel %vm722_vm7, 1.0, %v5601_v22  ;;  %v1747_v58 = vsub.f32 0.0, %v5215_v37  ;;  %v5304_v26 = vand.u32 2147483647, %v5290_v2 }
 0x291   :  { %v2125_v49 = vmul.f32 %v2061_v29, %v5094_v0  ;;  %v1298_v31 = vmul.f32 %v5257_v5, %v1234_v33  ;;  %v1929_v10 = vmul.f32 1.442695, %v1810_v11  ;;  %v983_v32 = vadd.f32 1.0, %v919_v19  ;;  %v423_v33 = vpop.f32.mrf.mxu0 }
 0x292   :  { %v2062_v63 = vsub.f32 1.0, %v1998_v7  ;;  %3305 = vpow2.f32 %v1925_v4  ;;  %vm723_vm8 = vcmp.ge.f32.partialorder %v5189_v57, 0.0  ;;  %v921_v52 = vmul.f32 0.3275911, %v5304_v26 }
 0x293   :  { %v5310_v17 = vpop.eup %3295  ;;  %v1679_v25 = vmul.f32 %v5137_v59, %v1615_v36  ;;  %v1489_v30 = vadd.f32 -0.28449672, %v1425_v24  ;;  %v1424_v42 = vmul.f32 %v5225_v60, %v1360_v53  ;;  %3307 = vrcp.f32 %v983_v32  ;;  %v5705_v59 = vld [vmem:[#allocation18_spill] sm:$0xff]  ;;  %v5708_v32 = vld [vmem:[#allocation28_spill] sm:$0xff] }
 0x294   :  { %v2124_v0 = vmul.f32 %v2060_v27, %v5131_v23  ;;  %v1811_v38 = vmul.f32 %v1747_v58, %v5215_v37  ;;  %v1172_v55 = vmul.f32 1.0614054, %v5310_v17  ;;  %v985_v29 = vadd.f32 1.0, %v921_v52 }
 0x295   :  { %v5317_v11 = vpop.eup %3297  ;;  %v5319_v7 = vadd.f32 1.0, %v2125_v49  ;;  %v1362_v4 = vadd.f32 1.4214138, %v1298_v31  ;;  %3309 = vpow2.f32 %v1929_v10  ;;  %v2270_v36 = vpack.c.bf16 %v5705_v59, %v5704_v44 }
 0x296   :  { %v5323_v28 = vpop.eup %3299  ;;  %v2126_v23 = vmul.f32 %v2062_v63, %v5155_v13  ;;  %v5329_v37 = vsel %vm723_vm8, 1.0, %v5601_v22  ;;  %v1749_v24 = vsub.f32 0.0, %v5245_v1  ;;  %3311 = vrcp.f32 %v985_v29  ;;  %v5709_v63 = vld [vmem:[#allocation24_spill] sm:$0xff] }
 0x297   :  { %5703 = vst [vmem:[#allocation17_spill] sm:$0xff] %v5319_v7  ;;  %5706 = vst [vmem:[#allocation27_spill] sm:$0xff] %v5329_v37  ;;  %v5332_v53 = vpop.eup %3301  ;;  %v1999_v19 = vmul.f32 %v3294_v14, %v1679_v25  ;;  %v1553_v27 = vmul.f32 %v5191_v46, %v1489_v30  ;;  %v1488_v58 = vadd.f32 -0.28449672, %v1424_v42  ;;  %2691 = vmatprep.mubr.bf16.mxu1 %v2270_v36  ;;  %v2188_v31 = vadd.f32 1.0, %v2124_v0  ;;  %v5712_v0 = vld [vmem:[#allocation30_spill] sm:$0xff] }
 0x298   :  { %v5336_v49 = vadd.f32 %v423_v33, %v3525_v18  ;;  %v1931_v13 = vmul.f32 1.442695, %v1811_v38  ;;  %v1236_v10 = vadd.f32 -1.4531521, %v1172_v55  ;;  %v5339_v57 = vadd.f32 %v536_v16, %v3527_v20  ;;  %v5713_v38 = vld [vmem:[#allocation15_spill] sm:$0xff] }
 0x299   :  { %v5710_v52 = vpack.c.bf16 %v5708_v32, %v5709_v63  ;;  %v1426_v29 = vmul.f32 %v5257_v5, %v1362_v4  ;;  %v5346_v14 = vmul.f32 0.5, %v5177_v56  ;;  %v1174_v25 = vmul.f32 1.0614054, %v5323_v28 }
 0x29a   :  { %5707 = vst [vmem:[#allocation23_spill] sm:$0xff] %v5339_v57  ;;  %v5350_v18 = vmul.f32 0.70710677, %v5336_v49  ;;  %v2190_v30 = vadd.f32 1.0, %v2126_v23  ;;  %v1171_v42 = vmul.f32 1.0614054, %v5332_v53  ;;  %v1813_v20 = vmul.f32 %v1749_v24, %v5245_v1 }
 0x29b   :  { %2692 = vmatmul.mubr.bf16.vlgmr.msra.gmra.mxu1 %v5710_v52  ;;  %5711 = vst [vmem:[#allocation26_spill] sm:$0xff] %v5346_v14  ;;  %v2272_v55 = vpack.c.bf16 %v5713_v38, %v5712_v0  ;;  %v2063_v33 = vsub.f32 1.0, %v1999_v19  ;;  %v1617_v44 = vadd.f32 0.2548296, %v1553_v27  ;;  %v1552_v4 = vmul.f32 %v5225_v60, %v1488_v58 }
 0x29c   :  { %v5358_v56 = vand.u32 2147483647, %v5350_v18  ;;  %v5360_v59 = vpop.eup %3303  ;;  %v1300_v36 = vmul.f32 %v5310_v17, %v1236_v10  ;;  %v1748_v16 = vsub.f32 0.0, %v5229_v9  ;;  %v1750_v23 = vsub.f32 0.0, %v5248_v15 }
 0x29d   :  { %v5366_v1 = vmul.f32 0.70710677, %v5339_v57  ;;  %2602 = vmatprep.mubr.bf16.mxu0 %v2272_v55  ;;  %v5369_v24 = vmul.f32 %v2188_v31, %v5105_v62  ;;  %v1490_v19 = vadd.f32 -0.28449672, %v1426_v29  ;;  %v1238_v27 = vadd.f32 -1.4531521, %v1174_v25 }
 0x29e   :  { %v920_v58 = vmul.f32 0.3275911, %v5358_v56  ;;  %v1235_v32 = vadd.f32 -1.4531521, %v1171_v42  ;;  %3313 = vpow2.f32 %v1931_v13  ;;  %v1935_v63 = vmul.f32 1.442695, %v1813_v20 }
 0x29f   :  { %v5373_v10 = vand.u32 2147483647, %v5366_v1  ;;  %v3306_v52 = vpop.eup %3305  ;;  %v5376_v0 = vmul.f32 %v2190_v30, %v5148_v51  ;;  %v1616_v38 = vadd.f32 0.2548296, %v1552_v4  ;;  %v1173_v55 = vmul.f32 1.0614054, %v5360_v59 }
 0x2a0   :  { %v984_v35 = vadd.f32 1.0, %v920_v58  ;;  %v5379_v62 = vpop.eup %3307  ;;  %v1364_v31 = vadd.f32 1.4214138, %v1300_v36  ;;  %v1812_v29 = vmul.f32 %v1748_v16, %v5229_v9  ;;  %v1814_v25 = vmul.f32 %v1750_v23, %v5248_v15  ;;  %v5723_v57 = vld [vmem:[#allocation41_spill] sm:$0xff] }
 0x2a1   :  { %v922_v13 = vmul.f32 0.3275911, %v5373_v10  ;;  %v1554_v42 = vmul.f32 %v5257_v5, %v1490_v19  ;;  %v1302_v20 = vmul.f32 %v5323_v28, %v1238_v27  ;;  %v1175_v51 = vmul.f32 1.0614054, %v5379_v62  ;;  %v5715_v27 = vld [vmem:[#allocation16_spill] sm:$0xff] }
 0x2a2   :  { %3315 = vrcp.f32 %v984_v35  ;;  %v3310_v30 = vpop.eup %3309  ;;  %v5388_v4 = vmul.f32 %v2063_v33, %v5183_v47  ;;  %v1681_v58 = vmul.f32 %v5191_v46, %v1617_v44  ;;  %v1299_v36 = vmul.f32 %v5332_v53, %v1235_v32 }
 0x2a3   :  { %v986_v9 = vadd.f32 1.0, %v922_v13  ;;  %v5392_v16 = vpop.eup %3311  ;;  %v1680_v15 = vmul.f32 %v5225_v60, %v1616_v38  ;;  %v1237_v23 = vadd.f32 -1.4531521, %v1173_v55  ;;  %v1239_v19 = vadd.f32 -1.4531521, %v1175_v51  ;;  %v5716_v55 = vld [vmem:[#allocation20_spill] sm:$0xff] }
 0x2a4   :  { %v2274_v37 = vpack.c.bf16 %v5715_v27, %v5714_v50  ;;  %v1428_v35 = vmul.f32 %v5310_v17, %v1364_v31  ;;  %v1933_v7 = vmul.f32 1.442695, %v1812_v29  ;;  %v1937_v61 = vmul.f32 1.442695, %v1814_v25  ;;  %v5717_v13 = vld [vmem:[#allocation32_spill] sm:$0xff]  ;;  %v5718_v25 = vld [vmem:[#allocation29_spill] sm:$0xff] }
 0x2a5   :  { %v1177_v47 = vmul.f32 1.0614054, %v5392_v16  ;;  %v1618_v33 = vadd.f32 0.2548296, %v1554_v42  ;;  %v1366_v46 = vadd.f32 1.4214138, %v1302_v20  ;;  %3317 = vrcp.f32 %v986_v9 }
 0x2a6   :  { %v1751_v44 = vsub.f32 0.0, %v5287_v3  ;;  %2699 = vmatprep.mubr.bf16.mxu1 %v2274_v37  ;;  %v1363_v32 = vadd.f32 1.4214138, %v1299_v36  ;;  %v1303_v60 = vmul.f32 %v5379_v62, %v1239_v19  ;;  %v2271_v51 = vpack.c.bf16 %v5717_v13, %v5716_v55  ;;  %v5719_v42 = vld [vmem:[#allocation33_spill] sm:$0xff]  ;;  %v5720_v37 = vld [vmem:[#allocation19_spill] sm:$0xff]  ;;  %v5721_v36 = vld [vmem:[#allocation40_spill] sm:$0xff] }
 0x2a7   :  { %v1241_v38 = vadd.f32 -1.4531521, %v1177_v47  ;;  %v1301_v50 = vmul.f32 %v5360_v59, %v1237_v23  ;;  %v1753_v31 = vsub.f32 0.0, %v5304_v26  ;;  %v1752_v29 = vsub.f32 0.0, %v5358_v56  ;;  %v5722_v47 = vld [vmem:[#allocation36_spill] sm:$0xff] }
 0x2a8   :  { %v2273_v20 = vpack.c.bf16 %v5719_v42, %v5718_v25  ;;  %v1492_v27 = vadd.f32 -0.28449672, %v1428_v35  ;;  %2603 = vmatmul.mubr.bf16.gmra.mxu0 %v2271_v51  ;;  %v2276_v19 = vpack.c.bf16 %v5721_v36, %v5720_v37  ;;  %v2278_v14 = vpack.c.bf16 %v5723_v57, %v5722_v47  ;;  %v5731_v37 = vld [vmem:[#allocation39_spill] sm:$0xff] }
 0x2a9   :  { %v1305_v9 = vmul.f32 %v5392_v16, %v1241_v38  ;;  %v1682_v55 = vmul.f32 %v5257_v5, %v1618_v33  ;;  %3319 = vpow2.f32 %v1935_v63  ;;  %v1430_v23 = vmul.f32 %v5323_v28, %v1366_v46 }
 0x2aa   :  { %v1815_v13 = vmul.f32 %v1751_v44, %v5287_v3  ;;  %2700 = vmatmul.mubr.bf16.gmra.mxu1 %v2273_v20  ;;  %v5417_v25 = vmul.f32 %v5317_v11, %v1681_v58  ;;  %3321 = vpow2.f32 %v1933_v7  ;;  %v1367_v35 = vadd.f32 1.4214138, %v1303_v60  ;;  %2610 = vmatprep.mubr.bf16.mxu0 %v2276_v19  ;;  %v5724_v60 = vld [vmem:[#allocation34_spill] sm:$0xff] }
 0x2ab   :  { %v1754_v38 = vsub.f32 0.0, %v5373_v10  ;;  %2707 = vmatprep.mubr.bf16.mxu1 %v2278_v14  ;;  %v5420_v51 = vpop.eup %3313  ;;  %v5422_v57 = vmul.f32 %v3306_v52, %v1680_v15  ;;  %3323 = vpow2.f32 %v1937_v61  ;;  %v1369_v5 = vadd.f32 1.4214138, %v1305_v9  ;;  %v5725_v14 = vld [vmem:[#allocation50_spill] sm:$0xff]  ;;  %v5727_v15 = vld [vmem:[#allocation37_spill] sm:$0xff] }
 0x2ac   :  { %v1816_v63 = vmul.f32 %v1752_v29, %v5358_v56  ;;  %v1427_v3 = vmul.f32 %v5332_v53, %v1363_v32  ;;  %v1365_v33 = vadd.f32 1.4214138, %v1301_v50  ;;  %v1556_v11 = vmul.f32 %v5310_v17, %v1492_v27  ;;  %v5726_v52 = vld [vmem:[#allocation22_spill] sm:$0xff]  ;;  %v5728_v50 = vld [vmem:[#allocation35_spill] sm:$0xff]  ;;  %v5730_v9 = vld [vmem:[#allocation21_spill] sm:$0xff] }
 0x2ad   :  { %v1817_v7 = vmul.f32 %v1753_v31, %v5304_v26  ;;  %v2002_v58 = vmul.f32 %v3310_v30, %v1682_v55  ;;  %v1494_v46 = vadd.f32 -0.28449672, %v1430_v23  ;;  %v1939_v44 = vmul.f32 1.442695, %v1815_v13  ;;  %v5729_v29 = vld [vmem:[#allocation51_spill] sm:$0xff] }
 0x2ae   :  { %v2280_v42 = vpack.c.bf16 %v5725_v14, %v5724_v60  ;;  %vm724_vm9 = vcmp.ge.f32.partialorder %v5203_v21, 0.0  ;;  %v1431_v61 = vmul.f32 %v5379_v62, %v1367_v35  ;;  %v1818_v56 = vmul.f32 %v1754_v38, %v5373_v10 }
 0x2af   :  { %v5430_v20 = vpop.eup %3315  ;;  %v2275_v32 = vpack.c.bf16 %v5727_v15, %v5726_v52  ;;  %v2282_v26 = vpack.c.bf16 %v5729_v29, %v5728_v50  ;;  %vm726_vm10 = vcmp.ge.f32.partialorder %v5238_v8, 0.0  ;;  %v1433_v30 = vmul.f32 %v5392_v16, %v1369_v5  ;;  %v5735_v50 = vld [vmem:[#allocation38_spill] sm:$0xff] }
 0x2b0   :  { %v1176_v31 = vmul.f32 1.0614054, %v5430_v20  ;;  %v1941_v27 = vmul.f32 1.442695, %v1816_v63  ;;  %v2277_v36 = vpack.c.bf16 %v5731_v37, %v5730_v9  ;;  %v1491_v19 = vadd.f32 -0.28449672, %v1427_v3 }
 0x2b1   :  { %v1429_v47 = vmul.f32 %v5360_v59, %v1365_v33  ;;  %v1620_v10 = vadd.f32 0.2548296, %v1556_v11  ;;  %v1943_v55 = vmul.f32 1.442695, %v1817_v7  ;;  %2611 = vmatmul.mubr.bf16.gmra.mxu0 %v2275_v32  ;;  %v2065_v23 = vsub.f32 1.0, %v5417_v25  ;;  %v5734_v32 = vld [vmem:[#allocation42_spill] sm:$0xff] }
 0x2b2   :  { %v2064_v13 = vsub.f32 1.0, %v5422_v57  ;;  %v1558_v35 = vmul.f32 %v5323_v28, %v1494_v46  ;;  %v1240_v38 = vadd.f32 -1.4531521, %v1176_v31  ;;  %2708 = vmatmul.mubr.bf16.gmra.mxu1 %v2277_v36  ;;  %2618 = vmatprep.mubr.bf16.mxu0 %v2280_v42  ;;  %v5448_v5 = vpop.eup %3317  ;;  %v2066_v63 = vsub.f32 1.0, %v2002_v58  ;;  %v5732_v58 = vld [vmem:[#allocation45_spill] sm:$0xff]  ;;  %v5738_v36 = vld [vmem:[#allocation44_spill] sm:$0xff] }
 0x2b3   :  { %v1495_v60 = vadd.f32 -0.28449672, %v1431_v61  ;;  %3325 = vpow2.f32 %v1939_v44  ;;  %v1945_v3 = vmul.f32 1.442695, %v1818_v56  ;;  %2715 = vmatprep.mubr.bf16.mxu1 %v2282_v26  ;;  %v1497_v33 = vadd.f32 -0.28449672, %v1433_v30 }
 0x2b4   :  { %v1304_v11 = vmul.f32 %v5430_v20, %v1240_v38  ;;  %3327 = vpow2.f32 %v1941_v27  ;;  %v1178_v25 = vmul.f32 1.0614054, %v5448_v5  ;;  %v1555_v57 = vmul.f32 %v5332_v53, %v1491_v19  ;;  %v5733_v61 = vld [vmem:[#allocation55_spill] sm:$0xff]  ;;  %v5736_v26 = vld [vmem:[#allocation46_spill] sm:$0xff]  ;;  %v5737_v30 = vld [vmem:[#allocation57_spill] sm:$0xff] }
 0x2b5   :  { %v1493_v7 = vadd.f32 -0.28449672, %v1429_v47  ;;  %v1684_v46 = vmul.f32 %v5310_v17, %v1620_v10  ;;  %3329 = vpow2.f32 %v1943_v55  ;;  %v1622_v14 = vadd.f32 0.2548296, %v1558_v35  ;;  %v5739_v19 = vld [vmem:[#allocation49_spill] sm:$0xff] }
 0x2b6   :  { %v1368_v42 = vadd.f32 1.4214138, %v1304_v11  ;;  %v1242_v52 = vadd.f32 -1.4531521, %v1178_v25  ;;  %v2284_v44 = vpack.c.bf16 %v5733_v61, %v5732_v58  ;;  %v5456_v56 = vpop.eup %3319  ;;  %v1559_v15 = vmul.f32 %v5379_v62, %v1495_v60 }
 0x2b7   :  { %3331 = vpow2.f32 %v1945_v3  ;;  %v2279_v29 = vpack.c.bf16 %v5735_v50, %v5734_v32  ;;  %v2286_v31 = vpack.c.bf16 %v5737_v30, %v5736_v26  ;;  %v3322_v27 = vpop.eup %3321  ;;  %v1561_v17 = vmul.f32 %v5392_v16, %v1497_v33 }
 0x2b8   :  { %v1432_v9 = vmul.f32 %v5430_v20, %v1368_v42  ;;  %v1306_v37 = vmul.f32 %v5448_v5, %v1242_v52  ;;  %v2281_v47 = vpack.c.bf16 %v5739_v19, %v5738_v36  ;;  %v3324_v10 = vpop.eup %3323  ;;  %v2128_v55 = vmul.f32 %v2064_v13, %v5235_v41 }
 0x2b9   :  { %v2130_v35 = vmul.f32 %v2066_v63, %v5300_v6  ;;  %v1619_v38 = vadd.f32 0.2548296, %v1555_v57  ;;  %v1557_v60 = vmul.f32 %v5360_v59, %v1493_v7  ;;  %2619 = vmatmul.mubr.bf16.gmra.mxu0 %v2279_v29  ;;  %v788_v3 = vsel %vm724_vm9, 1.0, %v5601_v22 }
 0x2ba   :  { %v1686_v33 = vmul.f32 %v5323_v28, %v1622_v14  ;;  %v1496_v11 = vadd.f32 -0.28449672, %v1432_v9  ;;  %v1370_v25 = vadd.f32 1.4214138, %v1306_v37  ;;  %2716 = vmatmul.mubr.bf16.gmra.mxu1 %v2281_v47  ;;  %2626 = vmatprep.mubr.bf16.mxu0 %v2284_v44  ;;  %v5476_v42 = vadd.f32 1.0, %v5388_v4  ;;  %v5740_v44 = vld [vmem:[#allocation60_spill] sm:$0xff] }
 0x2bb   :  { %v2004_v41 = vmul.f32 %v3322_v27, %v1684_v46  ;;  %v790_v6 = vsel %vm726_vm10, 1.0, %v5601_v22  ;;  %v1623_v13 = vadd.f32 0.2548296, %v1559_v15  ;;  %2723 = vmatprep.mubr.bf16.mxu1 %v2286_v31  ;;  %v2129_v63 = vmul.f32 %v2065_v23, %v5220_v39  ;;  %v5741_v39 = vld [vmem:[#allocation43_spill] sm:$0xff]  ;;  %v5742_v23 = vld [vmem:[#allocation53_spill] sm:$0xff]  ;;  %v5743_v27 = vld [vmem:[#allocation48_spill] sm:$0xff] }
 0x2bc   :  { %v1625_v21 = vadd.f32 0.2548296, %v1561_v17  ;;  %v1560_v57 = vmul.f32 %v5430_v20, %v1496_v11  ;;  %v1434_v28 = vmul.f32 %v5448_v5, %v1370_v25  ;;  %v2192_v7 = vadd.f32 1.0, %v2128_v55  ;;  %v5744_v17 = vld [vmem:[#allocation54_spill] sm:$0xff] }
 0x2bd   :  { %v2194_v14 = vadd.f32 1.0, %v2130_v35  ;;  %v1683_v52 = vmul.f32 %v5332_v53, %v1619_v38  ;;  %v1621_v4 = vadd.f32 0.2548296, %v1557_v60  ;;  %v2006_v58 = vmul.f32 %v3324_v10, %v1686_v33 }
 0x2be   :  { %v1624_v46 = vadd.f32 0.2548296, %v1560_v57  ;;  %v1498_v61 = vadd.f32 -0.28449672, %v1434_v28  ;;  %v2288_v8 = vpack.c.bf16 %v5211_v45, %v5740_v44  ;;  %v2068_v15 = vsub.f32 1.0, %v2004_v41 }
 0x2bf   :  { %v1687_v32 = vmul.f32 %v5379_v62, %v1623_v13  ;;  %v2283_v50 = vpack.c.bf16 %v5742_v23, %v5741_v39  ;;  %v2290_v29 = vpack.c.bf16 %v5253_v48, %v5120_v12  ;;  %v1689_v30 = vmul.f32 %v5392_v16, %v1625_v21  ;;  %v5746_v21 = vld [vmem:[#allocation52_spill] sm:$0xff] }
 0x2c0   :  { %v3326_v26 = vpop.eup %3325  ;;  %v1688_v53 = vmul.f32 %v5430_v20, %v1624_v46  ;;  %v1562_v31 = vmul.f32 %v5448_v5, %v1498_v61  ;;  %v2285_v9 = vpack.c.bf16 %v5744_v17, %v5743_v27  ;;  %v2193_v37 = vadd.f32 1.0, %v2129_v63  ;;  %v5745_v63 = vld [vmem:[#allocation47_spill] sm:$0xff]  ;;  %v5755_v27 = vld [vmem:[#allocation25_spill] sm:$0xff] }
 0x2c1   :  { %v3328_v45 = vpop.eup %3327  ;;  %v2256_v62 = vmul.f32 %v2192_v7, %v5196_v40  ;;  %v1685_v36 = vmul.f32 %v5360_v59, %v1621_v4  ;;  %vm727_vm11 = vcmp.ge.f32.partialorder %v5271_v43, 0.0  ;;  %2627 = vmatmul.mubr.bf16.gmra.mxu0 %v2283_v50  ;;  %vm725_vm12 = vcmp.ge.f32.partialorder %v5223_v54, 0.0  ;;  %v5747_v7 = vld [vmem:[#allocation58_spill] sm:$0xff]  ;;  %v5749_v4 = vld [vmem:[#allocation67_spill] sm:$0xff] }
 0x2c2   :  { %v3330_v12 = vpop.eup %3329  ;;  %v2070_v48 = vsub.f32 1.0, %v2006_v58  ;;  %vm728_vm13 = vcmp.ge.f32.partialorder %v5350_v18, 0.0  ;;  %v2008_v16 = vmul.f32 %v3328_v45, %v1688_v53  ;;  %v1626_v20 = vadd.f32 0.2548296, %v1562_v31  ;;  %2724 = vmatmul.mubr.bf16.gmra.mxu1 %v2285_v9  ;;  %2634 = vmatprep.mubr.bf16.mxu0 %v2288_v8  ;;  %v5748_v18 = vld [vmem:[#allocation64_spill] sm:$0xff]  ;;  %v5750_v8 = vld [vmem:[#allocation62_spill] sm:$0xff] }
 0x2c3   :  { %v2258_v19 = vmul.f32 %v2194_v14, %v5282_v34  ;;  %v2132_v47 = vmul.f32 %v2068_v15, %v788_v3  ;;  %v2007_v10 = vmul.f32 %v3326_v26, %v1687_v32  ;;  %vm729_vm14 = vcmp.ge.f32.partialorder %v5290_v2, 0.0  ;;  %2731 = vmatprep.mubr.bf16.mxu1 %v2290_v29  ;;  %v5751_v32 = vld [vmem:[#allocation65_spill] sm:$0xff]  ;;  %v5753_v26 = vld [vmem:[#allocation23_spill] sm:$0xff] }
 0x2c4   :  { %v3332_v40 = vpop.eup %3331  ;;  %v2003_v59 = vmul.f32 %v5420_v51, %v1683_v52  ;;  %v2009_v55 = vmul.f32 %v3330_v12, %v1689_v30  ;;  %v2072_v35 = vsub.f32 1.0, %v2008_v16  ;;  %v1690_v38 = vmul.f32 %v5448_v5, %v1626_v20  ;;  %v5754_v31 = vld [vmem:[#allocation59_spill] sm:$0xff]  ;;  %v5756_v9 = vld [vmem:[#allocation61_spill] sm:$0xff] }
 0x2c5   :  { %v2005_v60 = vmul.f32 %v5456_v56, %v1685_v36  ;;  %v600_v33 = vmul.f32 0.5, %v5336_v49  ;;  %v792_v34 = vsel %vm728_vm13, 1.0, %v5601_v22  ;;  %vm730_vm15 = vcmp.ge.f32.partialorder %v5366_v1, 0.0  ;;  %v5752_v1 = vld [vmem:[#allocation26_spill] sm:$0xff]  ;;  %v5757_v45 = vld [vmem:[#allocation17_spill] sm:$0xff]  ;;  %v5761_v54 = vld [vmem:[#allocation63_spill] sm:$0xff] }
 0x2c6   :  { %v2134_v3 = vmul.f32 %v2070_v48, %v790_v6  ;;  %v2136_v11 = vmul.f32 %v2072_v35, %v792_v34  ;;  %v2010_v25 = vmul.f32 %v3332_v40, %v1690_v38  ;;  %v2292_v41 = vpack.c.bf16 %v2256_v62, %v5369_v24  ;;  %v5758_v62 = vld [vmem:[#allocation27_spill] sm:$0xff] }
 0x2c7   :  { %v2196_v51 = vadd.f32 1.0, %v2132_v47  ;;  %v2071_v13 = vsub.f32 1.0, %v2007_v10  ;;  %v2287_v5 = vpack.c.bf16 %v5746_v21, %v5745_v63  ;;  %v2294_v56 = vpack.c.bf16 %v2258_v19, %v5376_v0 }
 0x2c8   :  { %v2073_v57 = vsub.f32 1.0, %v2009_v55  ;;  %v2200_v49 = vadd.f32 1.0, %v2136_v11  ;;  %v2074_v28 = vsub.f32 1.0, %v2010_v25  ;;  %v2289_v14 = vpack.c.bf16 %v5748_v18, %v5747_v7  ;;  %v5759_v55 = vld [vmem:[#allocation56_spill] sm:$0xff] }
 0x2c9   :  { %v2067_v52 = vsub.f32 1.0, %v2003_v59  ;;  %v598_v6 = vmul.f32 0.5, %v5749_v4  ;;  %v791_v24 = vsel %vm727_vm11, 1.0, %v5601_v22  ;;  %v794_v58 = vsel %vm730_vm15, 1.0, %v5601_v22  ;;  %2635 = vmatmul.mubr.bf16.gmra.mxu0 %v2287_v5 }
 0x2ca   :  { %v2069_v46 = vsub.f32 1.0, %v2005_v60  ;;  %v2198_v0 = vadd.f32 1.0, %v2134_v3  ;;  %v2264_v61 = vmul.f32 %v2200_v49, %v600_v33  ;;  %v2138_v44 = vmul.f32 %v2074_v28, %v794_v58  ;;  %2732 = vmatmul.mubr.bf16.gmra.mxu1 %v2289_v14  ;;  %2642 = vmatprep.mubr.bf16.mxu0 %v2292_v41  ;;  %v5760_v60 = vld [vmem:[#allocation68_spill] sm:$0xff]  ;;  %v5762_v3 = vld [vmem:[#allocation66_spill] sm:$0xff] }
 0x2cb   :  { %v2255_v15 = vmul.f32 %v5476_v42, %v5750_v8  ;;  %v2257_v39 = vmul.f32 %v2193_v37, %v5751_v32  ;;  %v2135_v23 = vmul.f32 %v2071_v13, %v791_v24  ;;  %v793_v43 = vsel %vm729_vm14, 1.0, %v5601_v22  ;;  %2739 = vmatprep.mubr.bf16.mxu1 %v2294_v56  ;;  %v5548_v49 = vld [vmem:[%s5576_s4] ss:$0 sm:$0xff]  ;;  %s3453_s4 = smov [#allocation10]  }
 0x2cc   :  { %v2260_v50 = vmul.f32 %v2196_v51, %v5752_v1  ;;  %v2137_v29 = vmul.f32 %v2073_v57, %v793_v43  ;;  %v602_v30 = vmul.f32 0.5, %v5753_v26  ;;  %v2202_v53 = vadd.f32 1.0, %v2138_v44  ;;  %s2777_s17 = sshll.u32 %s3453_s4, 4  ;;  %s2778_s17 = int_to_ptr.vmem [resolvable:$true] %s2777_s17 }
 0x2cd   :  { %v2251_v17 = vmul.f32 %v5755_v27, %v5754_v31  ;;  %v2253_v42 = vmul.f32 %v5757_v45, %v5756_v9  ;;  %v2131_v37 = vmul.f32 %v2067_v52, %v5758_v62  ;;  %v789_v2 = vsel %vm725_vm12, 1.0, %v5601_v22  ;;  %s3413_s18 = scalar_lea.vmem %s2778_s17, 2048  ;;  %p3418_p7 = scmp.lt.s32.totalorder %s2778_s17, %s2778_s17 }
 0x2ce   :  { %v2133_v36 = vmul.f32 %v2069_v46, %v789_v2  ;;  %v2262_v12 = vmul.f32 %v2198_v0, %v598_v6  ;;  %v2266_v48 = vmul.f32 %v2202_v53, %v602_v30  ;;  %v2296_v16 = vpack.c.bf16 %v2264_v61, %v2260_v50  ;;  %p3414_p6 = scmp.ne.s32.totalorder %s2778_s17, %s3413_s18  ;;  %p3419_p8 = scmp.lt.s32.totalorder %s3413_s18, %s3413_s18 }
 0x2cf   :  { %v2199_v20 = vadd.f32 1.0, %v2135_v23  ;;  %v2291_v19 = vpack.c.bf16 %v2255_v15, %v2251_v17  ;;  %v2201_v47 = vadd.f32 1.0, %v2137_v29  ;;  %v2293_v10 = vpack.c.bf16 %v2257_v39, %v2253_v42 }
 0x2d0   :  { %v2298_v40 = vpack.c.bf16 %v2266_v48, %v2262_v12  ;;  %v2195_v59 = vadd.f32 1.0, %v2131_v37  ;;  %v599_v35 = vmul.f32 0.5, %v5759_v55  ;;  %v2197_v38 = vadd.f32 1.0, %v2133_v36  ;;  %p3420_p9 = por %p3419_p8, %p3418_p7 }
 0x2d1   :  { %2643 = vmatmul.mubr.bf16.gmra.mxu0 %v2291_v19  ;;  %v601_v33 = vmul.f32 0.5, %v5760_v60  ;;  %v595_v22 = vmul.f32 0.5, %v5761_v54  ;;  %v597_v11 = vmul.f32 0.5, %v5762_v3 }
 0x2d2   :  { %2740 = vmatmul.mubr.bf16.gmra.mxu1 %v2293_v10  ;;  %2650 = vmatprep.mubr.bf16.mxu0 %v2296_v16  ;;  %v2263_v34 = vmul.f32 %v2199_v20, %v599_v35  ;;  %p3421_p10 = pnand %p3420_p9, %p3414_p6 }
 0x2d3   :  { %2747 = vmatprep.mubr.bf16.mxu1 %v2298_v40  ;;  %v2265_v25 = vmul.f32 %v2201_v47, %v601_v33  ;;  %v2259_v41 = vmul.f32 %v2195_v59, %v595_v22  ;;  %v2261_v51 = vmul.f32 %v2197_v38, %v597_v11 }
 0x2d5   :  { %v2295_v13 = vpack.c.bf16 %v2263_v34, %v2259_v41  ;;  %v2297_v63 = vpack.c.bf16 %v2265_v25, %v2261_v51 }
 0x2d9   :  { %2651 = vmatmul.mubr.bf16.gmra.mxu0 %v2295_v13 }
 0x2da   :  { %2748 = vmatmul.mubr.bf16.gmra.mxu1 %v2297_v63 }
 0x350   :  { %v2872_v21 = vpop.f32.mrf.mxu0 }
 0x352   :  { %v2873_v5 = vpop.f32.mrf.mxu0 }
 0x353   :  { %v2874_v57 = vadd.f32 %v2873_v5, %v2872_v21 }
 0x354   :  { %v2875_v56 = vpop.f32.mrf.mxu0 }
 0x355   :  { %v2597_v18 = vadd.f32 %v2874_v57, %v5548_v49 }
 0x356   :  { %v2876_v28 = vpop.f32.mrf.mxu0 }
 0x357   :  { %v2877_v14 = vadd.f32 %v2876_v28, %v2875_v56 }
 0x359   :  { %v2600_v58 = vadd.f32 %v2877_v14, %v5548_v49 }
 0x35b   :  { %v2936_v7 = vpop.f32.mrf.mxu1 }
 0x35d   :  { %v2937_v52 = vpop.f32.mrf.mxu1 }
 0x35e   :  { %v2938_v4 = vadd.f32 %v2937_v52, %v2936_v7 }
 0x35f   :  { %v2939_v6 = vpop.f32.mrf.mxu1 }
 0x360   :  { %v2694_v24 = vadd.f32 %v2938_v4, %v2597_v18 }
 0x361   :  { %v2940_v46 = vpop.f32.mrf.mxu1 }
 0x362   :  { %2756 = vst [vmem:[#allocation10] sm:$0xff] %v2694_v24  ;;  %v2941_v0 = vadd.f32 %v2940_v46, %v2939_v6 }
 0x364   :  { %v2697_v61 = vadd.f32 %v2941_v0, %v2600_v58 }
 0x366   :  { %2757 = vst [vmem:[#allocation10 + $0x8] sm:$0xff] %v2697_v61 }
 0x368   :  { %v2878_v44 = vpop.f32.mrf.mxu0 }
 0x36a   :  { %v2942_v8 = vpop.f32.mrf.mxu1  ;;  %v2879_v15 = vpop.f32.mrf.mxu0 }
 0x36b   :  { %v2880_v32 = vadd.f32 %v2879_v15, %v2878_v44 }
 0x36c   :  { %v2943_v39 = vpop.f32.mrf.mxu1  ;;  %v2881_v23 = vpop.f32.mrf.mxu0 }
 0x36d   :  { %v2605_v43 = vadd.f32 %v2880_v32, %v5548_v49  ;;  %v2944_v1 = vadd.f32 %v2943_v39, %v2942_v8 }
 0x36e   :  { %v2945_v50 = vpop.f32.mrf.mxu1  ;;  %v2882_v29 = vpop.f32.mrf.mxu0 }
 0x36f   :  { %v2702_v26 = vadd.f32 %v2944_v1, %v2605_v43  ;;  %v2883_v30 = vadd.f32 %v2882_v29, %v2881_v23 }
 0x370   :  { %v2946_v53 = vpop.f32.mrf.mxu1 }
 0x371   :  { %v2884_v31 = vpop.f32.mrf.mxu0  ;;  %2758 = vst [vmem:[#allocation10 + $0x10] sm:$0xff] %v2702_v26  ;;  %v2608_v27 = vadd.f32 %v2883_v30, %v5548_v49  ;;  %v2947_v17 = vadd.f32 %v2946_v53, %v2945_v50 }
 0x372   :  { %v2948_v9 = vpop.f32.mrf.mxu1 }
 0x373   :  { %v2885_v45 = vpop.f32.mrf.mxu0  ;;  %v2705_v42 = vadd.f32 %v2947_v17, %v2608_v27 }
 0x374   :  { %v2886_v62 = vadd.f32 %v2885_v45, %v2884_v31  ;;  %v2949_v37 = vpop.f32.mrf.mxu1 }
 0x375   :  { %v2887_v2 = vpop.f32.mrf.mxu0  ;;  %2759 = vst [vmem:[#allocation10 + $0x18] sm:$0xff] %v2705_v42  ;;  %v2950_v12 = vadd.f32 %v2949_v37, %v2948_v9 }
 0x376   :  { %v2613_v36 = vadd.f32 %v2886_v62, %v5548_v49  ;;  %v2951_v48 = vpop.f32.mrf.mxu1 }
 0x377   :  { %v2888_v16 = vpop.f32.mrf.mxu0 }
 0x378   :  { %v2710_v20 = vadd.f32 %v2950_v12, %v2613_v36  ;;  %v2889_v19 = vadd.f32 %v2888_v16, %v2887_v2  ;;  %v2952_v47 = vpop.f32.mrf.mxu1 }
 0x379   :  { %v2890_v10 = vpop.f32.mrf.mxu0  ;;  %v2953_v59 = vadd.f32 %v2952_v47, %v2951_v48 }
 0x37a   :  { %2760 = vst [vmem:[#allocation10 + $0x20] sm:$0xff] %v2710_v20  ;;  %v2616_v40 = vadd.f32 %v2889_v19, %v5548_v49  ;;  %v2954_v55 = vpop.f32.mrf.mxu1 }
 0x37b   :  { %v2891_v35 = vpop.f32.mrf.mxu0 }
 0x37c   :  { %v2713_v38 = vadd.f32 %v2953_v59, %v2616_v40  ;;  %v2892_v60 = vadd.f32 %v2891_v35, %v2890_v10  ;;  %v2955_v33 = vpop.f32.mrf.mxu1 }
 0x37d   :  { %v2893_v54 = vpop.f32.mrf.mxu0  ;;  %v2956_v34 = vadd.f32 %v2955_v33, %v2954_v55 }
 0x37e   :  { %2761 = vst [vmem:[#allocation10 + $0x28] sm:$0xff] %v2713_v38  ;;  %v2621_v22 = vadd.f32 %v2892_v60, %v5548_v49  ;;  %v2957_v3 = vpop.f32.mrf.mxu1 }
 0x37f   :  { %v2894_v11 = vpop.f32.mrf.mxu0 }
 0x380   :  { %v2718_v25 = vadd.f32 %v2956_v34, %v2621_v22  ;;  %v2895_v41 = vadd.f32 %v2894_v11, %v2893_v54  ;;  %v2958_v51 = vpop.f32.mrf.mxu1 }
 0x381   :  { %v2896_v13 = vpop.f32.mrf.mxu0  ;;  %v2959_v21 = vadd.f32 %v2958_v51, %v2957_v3 }
 0x382   :  { %2762 = vst [vmem:[#allocation10 + $0x30] sm:$0xff] %v2718_v25  ;;  %v2624_v63 = vadd.f32 %v2895_v41, %v5548_v49  ;;  %v2960_v5 = vpop.f32.mrf.mxu1 }
 0x383   :  { %v2897_v56 = vpop.f32.mrf.mxu0 }
 0x384   :  { %v2721_v57 = vadd.f32 %v2959_v21, %v2624_v63  ;;  %v2898_v28 = vadd.f32 %v2897_v56, %v2896_v13  ;;  %v2961_v7 = vpop.f32.mrf.mxu1 }
 0x385   :  { %v2899_v18 = vpop.f32.mrf.mxu0  ;;  %v2962_v52 = vadd.f32 %v2961_v7, %v2960_v5 }
 0x386   :  { %2763 = vst [vmem:[#allocation10 + $0x38] sm:$0xff] %v2721_v57  ;;  %v2629_v14 = vadd.f32 %v2898_v28, %v5548_v49  ;;  %v2963_v4 = vpop.f32.mrf.mxu1 }
 0x387   :  { %v2900_v6 = vpop.f32.mrf.mxu0 }
 0x388   :  { %v2726_v24 = vadd.f32 %v2962_v52, %v2629_v14  ;;  %v2901_v58 = vadd.f32 %v2900_v6, %v2899_v18  ;;  %v2964_v46 = vpop.f32.mrf.mxu1 }
 0x389   :  { %v2902_v0 = vpop.f32.mrf.mxu0  ;;  %v2965_v44 = vadd.f32 %v2964_v46, %v2963_v4 }
 0x38a   :  { %2764 = vst [vmem:[#allocation10 + $0x40] sm:$0xff] %v2726_v24  ;;  %v2632_v61 = vadd.f32 %v2901_v58, %v5548_v49  ;;  %v2966_v8 = vpop.f32.mrf.mxu1 }
 0x38b   :  { %v2903_v15 = vpop.f32.mrf.mxu0 }
 0x38c   :  { %v2729_v32 = vadd.f32 %v2965_v44, %v2632_v61  ;;  %v2904_v39 = vadd.f32 %v2903_v15, %v2902_v0  ;;  %v2967_v23 = vpop.f32.mrf.mxu1 }
 0x38d   :  { %v2905_v43 = vpop.f32.mrf.mxu0  ;;  %v2968_v50 = vadd.f32 %v2967_v23, %v2966_v8 }
 0x38e   :  { %2765 = vst [vmem:[#allocation10 + $0x48] sm:$0xff] %v2729_v32  ;;  %v2637_v1 = vadd.f32 %v2904_v39, %v5548_v49  ;;  %v2969_v29 = vpop.f32.mrf.mxu1 }
 0x38f   :  { %v2906_v26 = vpop.f32.mrf.mxu0 }
 0x390   :  { %v2734_v30 = vadd.f32 %v2968_v50, %v2637_v1  ;;  %v2907_v53 = vadd.f32 %v2906_v26, %v2905_v43  ;;  %v2970_v31 = vpop.f32.mrf.mxu1 }
 0x391   :  { %v2908_v27 = vpop.f32.mrf.mxu0  ;;  %v2971_v9 = vadd.f32 %v2970_v31, %v2969_v29 }
 0x392   :  { %2766 = vst [vmem:[#allocation10 + $0x50] sm:$0xff] %v2734_v30  ;;  %v2640_v17 = vadd.f32 %v2907_v53, %v5548_v49  ;;  %v2972_v45 = vpop.f32.mrf.mxu1 }
 0x393   :  { %v2909_v42 = vpop.f32.mrf.mxu0 }
 0x394   :  { %v2737_v62 = vadd.f32 %v2971_v9, %v2640_v17  ;;  %v2910_v37 = vadd.f32 %v2909_v42, %v2908_v27  ;;  %v2973_v2 = vpop.f32.mrf.mxu1 }
 0x395   :  { %v2911_v36 = vpop.f32.mrf.mxu0  ;;  %v2974_v48 = vadd.f32 %v2973_v2, %v2972_v45 }
 0x396   :  { %2767 = vst [vmem:[#allocation10 + $0x58] sm:$0xff] %v2737_v62  ;;  %v2645_v12 = vadd.f32 %v2910_v37, %v5548_v49  ;;  %v2975_v16 = vpop.f32.mrf.mxu1 }
 0x397   :  { %v2912_v20 = vpop.f32.mrf.mxu0 }
 0x398   :  { %v2742_v19 = vadd.f32 %v2974_v48, %v2645_v12  ;;  %v2913_v47 = vadd.f32 %v2912_v20, %v2911_v36  ;;  %v2976_v10 = vpop.f32.mrf.mxu1 }
 0x399   :  { %v2914_v40 = vpop.f32.mrf.mxu0  ;;  %v2977_v55 = vadd.f32 %v2976_v10, %v2975_v16 }
 0x39a   :  { %2768 = vst [vmem:[#allocation10 + $0x60] sm:$0xff] %v2742_v19  ;;  %v2648_v59 = vadd.f32 %v2913_v47, %v5548_v49  ;;  %v2978_v35 = vpop.f32.mrf.mxu1 }
 0x39b   :  { %v2915_v38 = vpop.f32.mrf.mxu0 }
 0x39c   :  { %v2745_v60 = vadd.f32 %v2977_v55, %v2648_v59  ;;  %v2916_v33 = vadd.f32 %v2915_v38, %v2914_v40  ;;  %v2979_v54 = vpop.f32.mrf.mxu1 }
 0x39d   :  { %v2917_v22 = vpop.f32.mrf.mxu0  ;;  %v2980_v3 = vadd.f32 %v2979_v54, %v2978_v35 }
 0x39e   :  { %2769 = vst [vmem:[#allocation10 + $0x68] sm:$0xff] %v2745_v60  ;;  %v2653_v34 = vadd.f32 %v2916_v33, %v5548_v49  ;;  %v2981_v11 = vpop.f32.mrf.mxu1 }
 0x39f   :  { %v2918_v25 = vpop.f32.mrf.mxu0 }
 0x3a0   :  { %v2750_v41 = vadd.f32 %v2980_v3, %v2653_v34  ;;  %v2919_v51 = vadd.f32 %v2918_v25, %v2917_v22  ;;  %v2982_v13 = vpop.f32.mrf.mxu1 }
 0x3a1   :  { %v2983_v21 = vadd.f32 %v2982_v13, %v2981_v11 }
 0x3a2   :  { %2770 = vst [vmem:[#allocation10 + $0x70] sm:$0xff] %v2750_v41  ;;  %v2656_v63 = vadd.f32 %v2919_v51, %v5548_v49 }
 0x3a4   :  { %v2753_v5 = vadd.f32 %v2983_v21, %v2656_v63 }
 0x3a6   :  { %2771 = vst [vmem:[#allocation10 + $0x78] sm:$0xff] %v2753_v5 }
 0x3a7   :  { %3424 = shalt.err (!%p3421_p10)
}
 0x3a8   :  { %2783 = dma.vmem_to_hbm [thread:$0]  %s2778_s17, 2048, %s5577_s5, [#allocation4], %s3445_s28, %s3445_s28, %s3446_s29  }
 0x3a9   :  { %3439 = dma.done.wait [#allocation4], 2048  }
 0x3aa   :  { %3440 = vsyncadd [#allocation4], 4294965248 }
 0x3ab   :  { %2787 = vsyncpa [#allocation3], 1 }
 0x3ac   :  { %2788 = vsyncpa [#allocation6], 1 }
 0x3ad   :  { %2789 = vsyncpa [#allocation9], 1 }
 0x3ae   :  { %2790 = vsyncpa [#allocation4], 1 }

</bundles_post_ra>
